<compile_context>
chip_gen: v6e
topology: v6e:2x2x1
jax: 0.10.0
libtpu: 0.0.40
codegen_flags: <defaults>
</compile_context>

<pallas_src>
import jax
import jax.numpy as jnp
from jax import lax
from jax.experimental import pallas as pl
from jax.experimental.pallas import tpu as pltpu


def _layernorm(v, g, b, eps=1e-5):
    mu = jnp.mean(v, axis=-1, keepdims=True)
    var = jnp.mean(jnp.square(v - mu), axis=-1, keepdims=True)
    return (v - mu) * lax.rsqrt(var + eps) * g + b


def _sigmoid(x):
    # sigmoid(x) = 0.5 * tanh(x/2) + 0.5  -> single EUP tanh, no divide on the recurrence path.
    return 0.5 * jnp.tanh(0.5 * x) + 0.5


def _block_kernel(x_ref, first_ref, h0_ref, c0_ref,
                  ln1_g_ref, ln1_b_ref,
                  wih_ref, whh_ref, blstm_ref,
                  ln2_g_ref, ln2_b_ref,
                  w0_ref, w1_ref, b1_ref,
                  y_ref, h_out_ref, c_out_ref,
                  xg_scr, hT_scr):
    B, T, H = x_ref.shape
    H4 = 4 * H

    ln1_g = ln1_g_ref[...]
    ln1_b = ln1_b_ref[...]
    ln2_g = ln2_g_ref[...]
    ln2_b = ln2_b_ref[...]
    wih = wih_ref[...]            # (H, 4H)  bf16, fused gate blocks [i|f|g|o] along columns
    whh = whh_ref[...]            # (H, 4H)  bf16
    b_lstm = blstm_ref[...]       # (1, 4H)  f32  (= bias_ih + bias_hh)
    w0 = w0_ref[...]              # (H, 4H)  bf16
    w1 = w1_ref[...]              # (4H, H)  bf16
    b1 = b1_ref[...]              # (1, H)   f32

    # ---- batched over all timesteps: pre_r_ln + fused input-to-hidden projection ----
    x_all = x_ref[...]                                    # (B, T, H)  f32
    x2 = x_all.reshape(B * T, H)                          # row = b*T + t  (batch-major)
    xn = _layernorm(x2, ln1_g, ln1_b)
    xg = jnp.dot(xn.astype(wih.dtype), wih,
                 preferred_element_type=jnp.float32) + b_lstm        # (B*T, 4H)
    xg_bt = xg.reshape(B, T, H4)
    for t in range(T):                                    # static scatter into time-major scratch
        xg_scr[t] = xg_bt[:, t, :]

    # ---- reset recurrent state on episode start (nn.LSTM path: only first[:, 0] is used) ----
    mask = 1.0 - first_ref[...]                           # (B, 1)
    h0 = h0_ref[...] * mask
    c0 = c0_ref[...] * mask

    # ---- sequential recurrence: one fused (B,H)@(H,4H) matmul + elementwise per step ----
    def step(t, carry):
        h, c = carry
        pre = xg_scr[t] + jnp.dot(h.astype(whh.dtype), whh,
                                  preferred_element_type=jnp.float32)   # (B, 4H)
        i_g = _sigmoid(pre[:, 0 * H:1 * H])
        f_g = _sigmoid(pre[:, 1 * H:2 * H])
        g_g = jnp.tanh(pre[:, 2 * H:3 * H])
        o_g = _sigmoid(pre[:, 3 * H:4 * H])
        c = f_g * c + i_g * g_g
        h = o_g * jnp.tanh(c)
        hT_scr[t] = h
        return (h, c)

    h_n, c_n = lax.fori_loop(0, T, step, (h0, c0), unroll=True)
    h_out_ref[...] = h_n
    c_out_ref[...] = c_n

    # ---- batched post-recurrence: residual + pointwise MLP over all T*B rows ----
    h_all = jnp.stack([hT_scr[t] for t in range(T)], axis=1)            # (B, T, H)
    y1 = (h_all + x_all).reshape(B * T, H)                              # residual around LSTM
    z = jnp.maximum(
        jnp.dot(_layernorm(y1, ln2_g, ln2_b).astype(w0.dtype), w0,
                preferred_element_type=jnp.float32), 0.0)               # (B*T, 4H)
    y2 = jnp.dot(z.astype(w1.dtype), w1,
                 preferred_element_type=jnp.float32) + b1               # (B*T, H)
    y_ref[...] = (y2 + y1).reshape(B, T, H)                             # residual around MLP


def _vmem_limit_bytes(B, T, H):
    H4 = 4 * H
    f32, bf16 = 4, 2
    total = (
        2 * B * T * H * f32          # x in, y out
        + 4 * B * H * f32            # h0, c0, h_out, c_out
        + B * f32                    # first
        + (4 * H + H4 + H) * f32     # LN params, LSTM bias, MLP bias
        + 4 * H * H4 * bf16          # wih, whh, w0, w1
        + T * B * (H4 + H) * f32     # scratch slabs
    )
    # 4x headroom for (8,128) tile padding and compiler temporaries.
    return max(4 * 1024 * 1024, min(4 * total, 64 * 1024 * 1024))


def residual_recurrent_block(x, first, state, params):
    """One ResidualRecurrentBlock (multi_layer_lstm, residual, pointwise MLP).

    x: (B, T, H) f32 ; first: (B, T) bool ; state: (h, c) each (B, 1, H) f32.
    Returns (y (B, T, H), (h_n, c_n) each (B, 1, H)).
    """
    B, T, H = x.shape
    H4 = 4 * H
    h0, c0 = state

    first_f = first[:, 0].astype(jnp.float32).reshape(B, 1)
    h0_ = h0.astype(jnp.float32).reshape(B, H)
    c0_ = c0.astype(jnp.float32).reshape(B, H)

    inputs = (x.astype(jnp.float32), first_f, h0_, c0_) + tuple(params)

    out_shapes = (
        jax.ShapeDtypeStruct((B, T, H), jnp.float32),
        jax.ShapeDtypeStruct((B, H), jnp.float32),
        jax.ShapeDtypeStruct((B, H), jnp.float32),
    )

    cost = pl.CostEstimate(
        flops=8 * B * T * H * H4,                   # 4 fused matmuls (ih, hh, mlp0, mlp1)
        transcendentals=5 * B * T * H,              # 4 gate tanh + tanh(c) per element
        bytes_accessed=2 * B * T * H * 4 + 4 * H * H4 * 2 + 4 * B * H * 4,
    )

    y, h_n, c_n = pl.pallas_call(
        _block_kernel,
        out_shape=out_shapes,
        in_specs=[pl.BlockSpec(memory_space=pltpu.MemorySpace.VMEM)] * len(inputs),
        out_specs=tuple(pl.BlockSpec(memory_space=pltpu.MemorySpace.VMEM)
                        for _ in range(3)),
        scratch_shapes=[pltpu.VMEM((T, B, H4), jnp.float32),   # precomputed x-gates (time-major)
                        pltpu.VMEM((T, B, H), jnp.float32)],   # per-step h (time-major)
        compiler_params=pltpu.CompilerParams(
            vmem_limit_bytes=_vmem_limit_bytes(B, T, H)),
        cost_estimate=cost,
    )(*inputs)

    return y, (h_n.reshape(B, 1, H), c_n.reshape(B, 1, H))


def residual_recurrent_blocks(x, first, states, params_list):
    """ResidualRecurrentBlocks.forward: apply the blocks sequentially, collect per-block state."""
    assert len(states) == len(params_list)
    state_out = []
    for state, params in zip(states, params_list):
        x, s_o = residual_recurrent_block(x, first, state, params)
        state_out.append(s_o)
    return x, state_out


def init_params(key, H, n_block=2):
    """Deterministic synthetic init mirroring ResidualRecurrentBlock.__init__ with
    is_residual=True, use_pointwise_layer=True, init_scale=n_block**-0.5 (stack default)."""
    s = n_block ** -0.5
    s *= 2.0 ** -0.5                     # use_pointwise_layer & is_residual
    k_ih, k_hh, k_w0, k_w1 = jax.random.split(key, 4)

    # nn.LSTM(H, H): weights ~ N(0, s / sqrt(4H)), biases zeroed. Rows ordered [i, f, g, o].
    std = s * (4 * H) ** -0.5
    w_ih = jax.random.normal(k_ih, (4 * H, H), jnp.float32) * std
    w_hh = jax.random.normal(k_hh, (4 * H, H), jnp.float32) * std
    # bias_ih_l0 and bias_hh_l0 are both zeroed by the module; real checkpoints must be SUMMED here.
    b_lstm = jnp.zeros((1, 4 * H), jnp.float32)

    # pre_r_ln / mlp0 LayerNorm: default init
    ln1_g = jnp.ones((1, H), jnp.float32)
    ln1_b = jnp.zeros((1, H), jnp.float32)
    ln2_g = jnp.ones((1, H), jnp.float32)
    ln2_b = jnp.zeros((1, H), jnp.float32)

    # mlp0: Linear(H -> 4H, no bias), rows L2-normalized to init_scale=1
    w0 = jax.random.normal(k_w0, (4 * H, H), jnp.float32)
    w0 = w0 / jnp.linalg.norm(w0, axis=1, keepdims=True)
    # mlp1: Linear(4H -> H, bias zeroed), rows L2-normalized to s
    w1 = jax.random.normal(k_w1, (H, 4 * H), jnp.float32)
    w1 = w1 * (s / jnp.linalg.norm(w1, axis=1, keepdims=True))
    b1 = jnp.zeros((1, H), jnp.float32)

    # Repack for the kernel: transposed to (in, out), fused gate layout, bf16 matmul weights.
    return (ln1_g, ln1_b,
            w_ih.T.astype(jnp.bfloat16),      # (H, 4H)
            w_hh.T.astype(jnp.bfloat16),      # (H, 4H)
            b_lstm,
            ln2_g, ln2_b,
            w0.T.astype(jnp.bfloat16),        # (H, 4H)
            w1.T.astype(jnp.bfloat16),        # (4H, H)
            b1)


if __name__ == "__main__":
    B, T, H, N_BLOCK = 2, 8, 32, 2
    key = jax.random.PRNGKey(0)
    kx, kh, kc, kp = jax.random.split(key, 4)

    x = jax.random.normal(kx, (B, T, H), jnp.float32)
    # episode-start flags; the nn.LSTM path only consumes first[:, 0] for state masking
    first = jnp.zeros((B, T), dtype=jnp.bool_).at[0, 0].set(True)

    pkeys = jax.random.split(kp, N_BLOCK)
    hkeys = jax.random.split(kh, N_BLOCK)
    ckeys = jax.random.split(kc, N_BLOCK)
    params_list = tuple(init_params(pkeys[i], H, n_block=N_BLOCK) for i in range(N_BLOCK))
    states = tuple((jax.random.normal(hkeys[i], (B, 1, H), jnp.float32),
                    jax.random.normal(ckeys[i], (B, 1, H), jnp.float32))
                   for i in range(N_BLOCK))

    y, state_out = jax.jit(residual_recurrent_blocks)(x, first, states, params_list)
    jax.block_until_ready((y, state_out))

    assert y.shape == (B, T, H)
    assert len(state_out) == N_BLOCK
    for h_n, c_n in state_out:
        assert h_n.shape == (B, 1, H) and c_n.shape == (B, 1, H)
    print("KERNEL_OK")
</pallas_src>

<mosaic_0001>
module attributes {stable_mosaic.version = 11 : i64} {
  func.func @_block_kernel(%arg0: memref<2x8x32xf32, #tpu.memory_space<vmem>>, %arg1: memref<2x1xf32, #tpu.memory_space<vmem>>, %arg2: memref<2x32xf32, #tpu.memory_space<vmem>>, %arg3: memref<2x32xf32, #tpu.memory_space<vmem>>, %arg4: memref<1x32xf32, #tpu.memory_space<vmem>>, %arg5: memref<1x32xf32, #tpu.memory_space<vmem>>, %arg6: memref<32x128xbf16, #tpu.memory_space<vmem>>, %arg7: memref<32x128xbf16, #tpu.memory_space<vmem>>, %arg8: memref<1x128xf32, #tpu.memory_space<vmem>>, %arg9: memref<1x32xf32, #tpu.memory_space<vmem>>, %arg10: memref<1x32xf32, #tpu.memory_space<vmem>>, %arg11: memref<32x128xbf16, #tpu.memory_space<vmem>>, %arg12: memref<128x32xbf16, #tpu.memory_space<vmem>>, %arg13: memref<1x32xf32, #tpu.memory_space<vmem>>, %arg14: memref<2x8x32xf32, #tpu.memory_space<vmem>>, %arg15: memref<2x32xf32, #tpu.memory_space<vmem>>, %arg16: memref<2x32xf32, #tpu.memory_space<vmem>>, %arg17: memref<8x2x128xf32, #tpu.memory_space<vmem>>, %arg18: memref<8x2x32xf32, #tpu.memory_space<vmem>>) attributes {dimension_semantics = [], scalar_prefetch = 0 : i64, scratch_operands = 2 : i64, tpu.core_type = #tpu.core_type<tc>} {
    %c0 = arith.constant 0 : index
    %c0_0 = arith.constant 0 : index
    %0 = vector.load %arg4[%c0, %c0_0] : memref<1x32xf32, #tpu.memory_space<vmem>>, vector<1x32xf32>
    %c0_1 = arith.constant 0 : index
    %c0_2 = arith.constant 0 : index
    %1 = vector.load %arg5[%c0_1, %c0_2] : memref<1x32xf32, #tpu.memory_space<vmem>>, vector<1x32xf32>
    %c0_3 = arith.constant 0 : index
    %c0_4 = arith.constant 0 : index
    %2 = vector.load %arg9[%c0_3, %c0_4] : memref<1x32xf32, #tpu.memory_space<vmem>>, vector<1x32xf32>
    %c0_5 = arith.constant 0 : index
    %c0_6 = arith.constant 0 : index
    %3 = vector.load %arg10[%c0_5, %c0_6] : memref<1x32xf32, #tpu.memory_space<vmem>>, vector<1x32xf32>
    %c0_7 = arith.constant 0 : index
    %c0_8 = arith.constant 0 : index
    %4 = vector.load %arg6[%c0_7, %c0_8] : memref<32x128xbf16, #tpu.memory_space<vmem>>, vector<32x128xbf16>
    %c0_9 = arith.constant 0 : index
    %c0_10 = arith.constant 0 : index
    %5 = vector.load %arg7[%c0_9, %c0_10] : memref<32x128xbf16, #tpu.memory_space<vmem>>, vector<32x128xbf16>
    %c0_11 = arith.constant 0 : index
    %c0_12 = arith.constant 0 : index
    %6 = vector.load %arg8[%c0_11, %c0_12] : memref<1x128xf32, #tpu.memory_space<vmem>>, vector<1x128xf32>
    %c0_13 = arith.constant 0 : index
    %c0_14 = arith.constant 0 : index
    %7 = vector.load %arg11[%c0_13, %c0_14] : memref<32x128xbf16, #tpu.memory_space<vmem>>, vector<32x128xbf16>
    %c0_15 = arith.constant 0 : index
    %c0_16 = arith.constant 0 : index
    %8 = vector.load %arg12[%c0_15, %c0_16] : memref<128x32xbf16, #tpu.memory_space<vmem>>, vector<128x32xbf16>
    %c0_17 = arith.constant 0 : index
    %c0_18 = arith.constant 0 : index
    %9 = vector.load %arg13[%c0_17, %c0_18] : memref<1x32xf32, #tpu.memory_space<vmem>>, vector<1x32xf32>
    %c0_19 = arith.constant 0 : index
    %c0_20 = arith.constant 0 : index
    %c0_21 = arith.constant 0 : index
    %10 = vector.load %arg0[%c0_19, %c0_20, %c0_21] : memref<2x8x32xf32, #tpu.memory_space<vmem>>, vector<2x8x32xf32>
    %11 = vector.shape_cast %10 : vector<2x8x32xf32> to vector<16x32xf32>
    %cst = arith.constant dense<0.000000e+00> : vector<16xf32>
    %12 = vector.multi_reduction <add>, %11, %cst [1] : vector<16x32xf32> to vector<16xf32>
    %13 = vector.shape_cast %12 : vector<16xf32> to vector<16x1xf32>
    %cst_22 = arith.constant 3.200000e+01 : f32
    %14 = vector.broadcast %cst_22 : f32 to vector<16x1xf32>
    %15 = arith.divf %13, %14 : vector<16x1xf32>
    %16 = vector.broadcast %15 : vector<16x1xf32> to vector<16x32xf32>
    %17 = arith.subf %11, %16 : vector<16x32xf32>
    %18 = arith.mulf %17, %17 : vector<16x32xf32>
    %cst_23 = arith.constant dense<0.000000e+00> : vector<16xf32>
    %19 = vector.multi_reduction <add>, %18, %cst_23 [1] : vector<16x32xf32> to vector<16xf32>
    %20 = vector.shape_cast %19 : vector<16xf32> to vector<16x1xf32>
    %cst_24 = arith.constant 3.200000e+01 : f32
    %21 = vector.broadcast %cst_24 : f32 to vector<16x1xf32>
    %22 = arith.divf %20, %21 : vector<16x1xf32>
    %23 = vector.broadcast %15 : vector<16x1xf32> to vector<16x32xf32>
    %24 = arith.subf %11, %23 : vector<16x32xf32>
    %cst_25 = arith.constant 9.99999974E-6 : f32
    %25 = vector.broadcast %cst_25 : f32 to vector<16x1xf32>
    %26 = arith.addf %22, %25 : vector<16x1xf32>
    %27 = math.rsqrt %26 : vector<16x1xf32>
    %28 = vector.broadcast %27 : vector<16x1xf32> to vector<16x32xf32>
    %29 = arith.mulf %24, %28 : vector<16x32xf32>
    %30 = vector.broadcast %0 : vector<1x32xf32> to vector<16x32xf32>
    %31 = arith.mulf %29, %30 : vector<16x32xf32>
    %32 = vector.broadcast %1 : vector<1x32xf32> to vector<16x32xf32>
    %33 = arith.addf %31, %32 : vector<16x32xf32>
    %34 = arith.truncf %33 : vector<16x32xf32> to vector<16x32xbf16>
    %cst_26 = arith.constant dense<0.000000e+00> : vector<16x128xf32>
    %35 = tpu.matmul %34, %4, %cst_26 {dimension_numbers = #tpu.dot_dimension_numbers<[1], [0], [0], [1], [0, 0, 1, 1], [], []>} : vector<16x32xbf16>, vector<32x128xbf16>, vector<16x128xf32> -> vector<16x128xf32>
    %36 = vector.broadcast %6 : vector<1x128xf32> to vector<16x128xf32>
    %37 = arith.addf %35, %36 : vector<16x128xf32>
    %38 = vector.shape_cast %37 : vector<16x128xf32> to vector<2x8x128xf32>
    %39 = vector.extract_strided_slice %38 {offsets = [0, 0, 0], sizes = [2, 1, 128], strides = [1, 1, 1]} : vector<2x8x128xf32> to vector<2x1x128xf32>
    %40 = vector.shape_cast %39 : vector<2x1x128xf32> to vector<2x128xf32>
    %c0_27 = arith.constant 0 : index
    %c0_28 = arith.constant 0 : index
    %c0_29 = arith.constant 0 : index
    %41 = vector.load %arg17[%c0_27, %c0_28, %c0_29] : memref<8x2x128xf32, #tpu.memory_space<vmem>>, vector<1x2x128xf32>
    %42 = vector.shape_cast %41 : vector<1x2x128xf32> to vector<2x128xf32>
    %43 = vector.shape_cast %40 : vector<2x128xf32> to vector<1x2x128xf32>
    tpu.vector_store %arg17[%c0_27, %c0_28, %c0_29], %43 {strides = array<i32>} : memref<8x2x128xf32, #tpu.memory_space<vmem>>, vector<1x2x128xf32>,
    %44 = vector.extract_strided_slice %38 {offsets = [0, 1, 0], sizes = [2, 1, 128], strides = [1, 1, 1]} : vector<2x8x128xf32> to vector<2x1x128xf32>
    %45 = vector.shape_cast %44 : vector<2x1x128xf32> to vector<2x128xf32>
    %c1 = arith.constant 1 : index
    %c0_30 = arith.constant 0 : index
    %c0_31 = arith.constant 0 : index
    %46 = vector.load %arg17[%c1, %c0_30, %c0_31] : memref<8x2x128xf32, #tpu.memory_space<vmem>>, vector<1x2x128xf32>
    %47 = vector.shape_cast %46 : vector<1x2x128xf32> to vector<2x128xf32>
    %48 = vector.shape_cast %45 : vector<2x128xf32> to vector<1x2x128xf32>
    tpu.vector_store %arg17[%c1, %c0_30, %c0_31], %48 {strides = array<i32>} : memref<8x2x128xf32, #tpu.memory_space<vmem>>, vector<1x2x128xf32>,
    %49 = vector.extract_strided_slice %38 {offsets = [0, 2, 0], sizes = [2, 1, 128], strides = [1, 1, 1]} : vector<2x8x128xf32> to vector<2x1x128xf32>
    %50 = vector.shape_cast %49 : vector<2x1x128xf32> to vector<2x128xf32>
    %c2 = arith.constant 2 : index
    %c0_32 = arith.constant 0 : index
    %c0_33 = arith.constant 0 : index
    %51 = vector.load %arg17[%c2, %c0_32, %c0_33] : memref<8x2x128xf32, #tpu.memory_space<vmem>>, vector<1x2x128xf32>
    %52 = vector.shape_cast %51 : vector<1x2x128xf32> to vector<2x128xf32>
    %53 = vector.shape_cast %50 : vector<2x128xf32> to vector<1x2x128xf32>
    tpu.vector_store %arg17[%c2, %c0_32, %c0_33], %53 {strides = array<i32>} : memref<8x2x128xf32, #tpu.memory_space<vmem>>, vector<1x2x128xf32>,
    %54 = vector.extract_strided_slice %38 {offsets = [0, 3, 0], sizes = [2, 1, 128], strides = [1, 1, 1]} : vector<2x8x128xf32> to vector<2x1x128xf32>
    %55 = vector.shape_cast %54 : vector<2x1x128xf32> to vector<2x128xf32>
    %c3 = arith.constant 3 : index
    %c0_34 = arith.constant 0 : index
    %c0_35 = arith.constant 0 : index
    %56 = vector.load %arg17[%c3, %c0_34, %c0_35] : memref<8x2x128xf32, #tpu.memory_space<vmem>>, vector<1x2x128xf32>
    %57 = vector.shape_cast %56 : vector<1x2x128xf32> to vector<2x128xf32>
    %58 = vector.shape_cast %55 : vector<2x128xf32> to vector<1x2x128xf32>
    tpu.vector_store %arg17[%c3, %c0_34, %c0_35], %58 {strides = array<i32>} : memref<8x2x128xf32, #tpu.memory_space<vmem>>, vector<1x2x128xf32>,
    %59 = vector.extract_strided_slice %38 {offsets = [0, 4, 0], sizes = [2, 1, 128], strides = [1, 1, 1]} : vector<2x8x128xf32> to vector<2x1x128xf32>
    %60 = vector.shape_cast %59 : vector<2x1x128xf32> to vector<2x128xf32>
    %c4 = arith.constant 4 : index
    %c0_36 = arith.constant 0 : index
    %c0_37 = arith.constant 0 : index
    %61 = vector.load %arg17[%c4, %c0_36, %c0_37] : memref<8x2x128xf32, #tpu.memory_space<vmem>>, vector<1x2x128xf32>
    %62 = vector.shape_cast %61 : vector<1x2x128xf32> to vector<2x128xf32>
    %63 = vector.shape_cast %60 : vector<2x128xf32> to vector<1x2x128xf32>
    tpu.vector_store %arg17[%c4, %c0_36, %c0_37], %63 {strides = array<i32>} : memref<8x2x128xf32, #tpu.memory_space<vmem>>, vector<1x2x128xf32>,
    %64 = vector.extract_strided_slice %38 {offsets = [0, 5, 0], sizes = [2, 1, 128], strides = [1, 1, 1]} : vector<2x8x128xf32> to vector<2x1x128xf32>
    %65 = vector.shape_cast %64 : vector<2x1x128xf32> to vector<2x128xf32>
    %c5 = arith.constant 5 : index
    %c0_38 = arith.constant 0 : index
    %c0_39 = arith.constant 0 : index
    %66 = vector.load %arg17[%c5, %c0_38, %c0_39] : memref<8x2x128xf32, #tpu.memory_space<vmem>>, vector<1x2x128xf32>
    %67 = vector.shape_cast %66 : vector<1x2x128xf32> to vector<2x128xf32>
    %68 = vector.shape_cast %65 : vector<2x128xf32> to vector<1x2x128xf32>
    tpu.vector_store %arg17[%c5, %c0_38, %c0_39], %68 {strides = array<i32>} : memref<8x2x128xf32, #tpu.memory_space<vmem>>, vector<1x2x128xf32>,
    %69 = vector.extract_strided_slice %38 {offsets = [0, 6, 0], sizes = [2, 1, 128], strides = [1, 1, 1]} : vector<2x8x128xf32> to vector<2x1x128xf32>
    %70 = vector.shape_cast %69 : vector<2x1x128xf32> to vector<2x128xf32>
    %c6 = arith.constant 6 : index
    %c0_40 = arith.constant 0 : index
    %c0_41 = arith.constant 0 : index
    %71 = vector.load %arg17[%c6, %c0_40, %c0_41] : memref<8x2x128xf32, #tpu.memory_space<vmem>>, vector<1x2x128xf32>
    %72 = vector.shape_cast %71 : vector<1x2x128xf32> to vector<2x128xf32>
    %73 = vector.shape_cast %70 : vector<2x128xf32> to vector<1x2x128xf32>
    tpu.vector_store %arg17[%c6, %c0_40, %c0_41], %73 {strides = array<i32>} : memref<8x2x128xf32, #tpu.memory_space<vmem>>, vector<1x2x128xf32>,
    %74 = vector.extract_strided_slice %38 {offsets = [0, 7, 0], sizes = [2, 1, 128], strides = [1, 1, 1]} : vector<2x8x128xf32> to vector<2x1x128xf32>
    %75 = vector.shape_cast %74 : vector<2x1x128xf32> to vector<2x128xf32>
    %c7 = arith.constant 7 : index
    %c0_42 = arith.constant 0 : index
    %c0_43 = arith.constant 0 : index
    %76 = vector.load %arg17[%c7, %c0_42, %c0_43] : memref<8x2x128xf32, #tpu.memory_space<vmem>>, vector<1x2x128xf32>
    %77 = vector.shape_cast %76 : vector<1x2x128xf32> to vector<2x128xf32>
    %78 = vector.shape_cast %75 : vector<2x128xf32> to vector<1x2x128xf32>
    tpu.vector_store %arg17[%c7, %c0_42, %c0_43], %78 {strides = array<i32>} : memref<8x2x128xf32, #tpu.memory_space<vmem>>, vector<1x2x128xf32>,
    %c0_44 = arith.constant 0 : index
    %c0_45 = arith.constant 0 : index
    %79 = vector.load %arg1[%c0_44, %c0_45] : memref<2x1xf32, #tpu.memory_space<vmem>>, vector<2x1xf32>
    %cst_46 = arith.constant 1.000000e+00 : f32
    %80 = vector.broadcast %cst_46 : f32 to vector<2x1xf32>
    %81 = arith.subf %80, %79 : vector<2x1xf32>
    %c0_47 = arith.constant 0 : index
    %c0_48 = arith.constant 0 : index
    %82 = vector.load %arg2[%c0_47, %c0_48] : memref<2x32xf32, #tpu.memory_space<vmem>>, vector<2x32xf32>
    %83 = vector.broadcast %81 : vector<2x1xf32> to vector<2x32xf32>
    %84 = arith.mulf %82, %83 : vector<2x32xf32>
    %c0_49 = arith.constant 0 : index
    %c0_50 = arith.constant 0 : index
    %85 = vector.load %arg3[%c0_49, %c0_50] : memref<2x32xf32, #tpu.memory_space<vmem>>, vector<2x32xf32>
    %86 = vector.broadcast %81 : vector<2x1xf32> to vector<2x32xf32>
    %87 = arith.mulf %85, %86 : vector<2x32xf32>
    %c0_i32 = arith.constant 0 : i32
    %88 = arith.index_cast %c0_i32 : i32 to index
    %c0_51 = arith.constant 0 : index
    %c0_52 = arith.constant 0 : index
    %89 = vector.load %arg17[%88, %c0_51, %c0_52] : memref<8x2x128xf32, #tpu.memory_space<vmem>>, vector<1x2x128xf32>
    %90 = vector.shape_cast %89 : vector<1x2x128xf32> to vector<2x128xf32>
    %91 = arith.truncf %84 : vector<2x32xf32> to vector<2x32xbf16>
    %cst_53 = arith.constant dense<0.000000e+00> : vector<2x128xf32>
    %92 = tpu.matmul %91, %5, %cst_53 {dimension_numbers = #tpu.dot_dimension_numbers<[1], [0], [0], [1], [0, 0, 1, 1], [], []>} : vector<2x32xbf16>, vector<32x128xbf16>, vector<2x128xf32> -> vector<2x128xf32>
    %93 = arith.addf %90, %92 : vector<2x128xf32>
    %94 = vector.extract_strided_slice %93 {offsets = [0, 0], sizes = [2, 32], strides = [1, 1]} : vector<2x128xf32> to vector<2x32xf32>
    %cst_54 = arith.constant 5.000000e-01 : f32
    %95 = vector.broadcast %cst_54 : f32 to vector<2x32xf32>
    %96 = arith.mulf %95, %94 : vector<2x32xf32>
    %97 = math.tanh %96 : vector<2x32xf32>
    %cst_55 = arith.constant 5.000000e-01 : f32
    %98 = vector.broadcast %cst_55 : f32 to vector<2x32xf32>
    %99 = arith.mulf %98, %97 : vector<2x32xf32>
    %cst_56 = arith.constant 5.000000e-01 : f32
    %100 = vector.broadcast %cst_56 : f32 to vector<2x32xf32>
    %101 = arith.addf %99, %100 : vector<2x32xf32>
    %102 = vector.extract_strided_slice %93 {offsets = [0, 32], sizes = [2, 32], strides = [1, 1]} : vector<2x128xf32> to vector<2x32xf32>
    %cst_57 = arith.constant 5.000000e-01 : f32
    %103 = vector.broadcast %cst_57 : f32 to vector<2x32xf32>
    %104 = arith.mulf %103, %102 : vector<2x32xf32>
    %105 = math.tanh %104 : vector<2x32xf32>
    %cst_58 = arith.constant 5.000000e-01 : f32
    %106 = vector.broadcast %cst_58 : f32 to vector<2x32xf32>
    %107 = arith.mulf %106, %105 : vector<2x32xf32>
    %cst_59 = arith.constant 5.000000e-01 : f32
    %108 = vector.broadcast %cst_59 : f32 to vector<2x32xf32>
    %109 = arith.addf %107, %108 : vector<2x32xf32>
    %110 = vector.extract_strided_slice %93 {offsets = [0, 64], sizes = [2, 32], strides = [1, 1]} : vector<2x128xf32> to vector<2x32xf32>
    %111 = math.tanh %110 : vector<2x32xf32>
    %112 = vector.extract_strided_slice %93 {offsets = [0, 96], sizes = [2, 32], strides = [1, 1]} : vector<2x128xf32> to vector<2x32xf32>
    %cst_60 = arith.constant 5.000000e-01 : f32
    %113 = vector.broadcast %cst_60 : f32 to vector<2x32xf32>
    %114 = arith.mulf %113, %112 : vector<2x32xf32>
    %115 = math.tanh %114 : vector<2x32xf32>
    %cst_61 = arith.constant 5.000000e-01 : f32
    %116 = vector.broadcast %cst_61 : f32 to vector<2x32xf32>
    %117 = arith.mulf %116, %115 : vector<2x32xf32>
    %cst_62 = arith.constant 5.000000e-01 : f32
    %118 = vector.broadcast %cst_62 : f32 to vector<2x32xf32>
    %119 = arith.addf %117, %118 : vector<2x32xf32>
    %120 = arith.mulf %109, %87 : vector<2x32xf32>
    %121 = arith.mulf %101, %111 : vector<2x32xf32>
    %122 = arith.addf %120, %121 : vector<2x32xf32>
    %123 = math.tanh %122 : vector<2x32xf32>
    %124 = arith.mulf %119, %123 : vector<2x32xf32>
    %125 = arith.index_cast %c0_i32 : i32 to index
    %c0_63 = arith.constant 0 : index
    %c0_64 = arith.constant 0 : index
    %126 = vector.load %arg18[%125, %c0_63, %c0_64] : memref<8x2x32xf32, #tpu.memory_space<vmem>>, vector<1x2x32xf32>
    %127 = vector.shape_cast %126 : vector<1x2x32xf32> to vector<2x32xf32>
    %128 = vector.shape_cast %124 : vector<2x32xf32> to vector<1x2x32xf32>
    tpu.vector_store %arg18[%125, %c0_63, %c0_64], %128 {strides = array<i32>} : memref<8x2x32xf32, #tpu.memory_space<vmem>>, vector<1x2x32xf32>,
    %c1_i32 = arith.constant 1 : i32
    %129 = arith.index_cast %c1_i32 : i32 to index
    %c0_65 = arith.constant 0 : index
    %c0_66 = arith.constant 0 : index
    %130 = vector.load %arg17[%129, %c0_65, %c0_66] : memref<8x2x128xf32, #tpu.memory_space<vmem>>, vector<1x2x128xf32>
    %131 = vector.shape_cast %130 : vector<1x2x128xf32> to vector<2x128xf32>
    %132 = arith.truncf %124 : vector<2x32xf32> to vector<2x32xbf16>
    %cst_67 = arith.constant dense<0.000000e+00> : vector<2x128xf32>
    %133 = tpu.matmul %132, %5, %cst_67 {dimension_numbers = #tpu.dot_dimension_numbers<[1], [0], [0], [1], [0, 0, 1, 1], [], []>} : vector<2x32xbf16>, vector<32x128xbf16>, vector<2x128xf32> -> vector<2x128xf32>
    %134 = arith.addf %131, %133 : vector<2x128xf32>
    %135 = vector.extract_strided_slice %134 {offsets = [0, 0], sizes = [2, 32], strides = [1, 1]} : vector<2x128xf32> to vector<2x32xf32>
    %cst_68 = arith.constant 5.000000e-01 : f32
    %136 = vector.broadcast %cst_68 : f32 to vector<2x32xf32>
    %137 = arith.mulf %136, %135 : vector<2x32xf32>
    %138 = math.tanh %137 : vector<2x32xf32>
    %cst_69 = arith.constant 5.000000e-01 : f32
    %139 = vector.broadcast %cst_69 : f32 to vector<2x32xf32>
    %140 = arith.mulf %139, %138 : vector<2x32xf32>
    %cst_70 = arith.constant 5.000000e-01 : f32
    %141 = vector.broadcast %cst_70 : f32 to vector<2x32xf32>
    %142 = arith.addf %140, %141 : vector<2x32xf32>
    %143 = vector.extract_strided_slice %134 {offsets = [0, 32], sizes = [2, 32], strides = [1, 1]} : vector<2x128xf32> to vector<2x32xf32>
    %cst_71 = arith.constant 5.000000e-01 : f32
    %144 = vector.broadcast %cst_71 : f32 to vector<2x32xf32>
    %145 = arith.mulf %144, %143 : vector<2x32xf32>
    %146 = math.tanh %145 : vector<2x32xf32>
    %cst_72 = arith.constant 5.000000e-01 : f32
    %147 = vector.broadcast %cst_72 : f32 to vector<2x32xf32>
    %148 = arith.mulf %147, %146 : vector<2x32xf32>
    %cst_73 = arith.constant 5.000000e-01 : f32
    %149 = vector.broadcast %cst_73 : f32 to vector<2x32xf32>
    %150 = arith.addf %148, %149 : vector<2x32xf32>
    %151 = vector.extract_strided_slice %134 {offsets = [0, 64], sizes = [2, 32], strides = [1, 1]} : vector<2x128xf32> to vector<2x32xf32>
    %152 = math.tanh %151 : vector<2x32xf32>
    %153 = vector.extract_strided_slice %134 {offsets = [0, 96], sizes = [2, 32], strides = [1, 1]} : vector<2x128xf32> to vector<2x32xf32>
    %cst_74 = arith.constant 5.000000e-01 : f32
    %154 = vector.broadcast %cst_74 : f32 to vector<2x32xf32>
    %155 = arith.mulf %154, %153 : vector<2x32xf32>
    %156 = math.tanh %155 : vector<2x32xf32>
    %cst_75 = arith.constant 5.000000e-01 : f32
    %157 = vector.broadcast %cst_75 : f32 to vector<2x32xf32>
    %158 = arith.mulf %157, %156 : vector<2x32xf32>
    %cst_76 = arith.constant 5.000000e-01 : f32
    %159 = vector.broadcast %cst_76 : f32 to vector<2x32xf32>
    %160 = arith.addf %158, %159 : vector<2x32xf32>
    %161 = arith.mulf %150, %122 : vector<2x32xf32>
    %162 = arith.mulf %142, %152 : vector<2x32xf32>
    %163 = arith.addf %161, %162 : vector<2x32xf32>
    %164 = math.tanh %163 : vector<2x32xf32>
    %165 = arith.mulf %160, %164 : vector<2x32xf32>
    %166 = arith.index_cast %c1_i32 : i32 to index
    %c0_77 = arith.constant 0 : index
    %c0_78 = arith.constant 0 : index
    %167 = vector.load %arg18[%166, %c0_77, %c0_78] : memref<8x2x32xf32, #tpu.memory_space<vmem>>, vector<1x2x32xf32>
    %168 = vector.shape_cast %167 : vector<1x2x32xf32> to vector<2x32xf32>
    %169 = vector.shape_cast %165 : vector<2x32xf32> to vector<1x2x32xf32>
    tpu.vector_store %arg18[%166, %c0_77, %c0_78], %169 {strides = array<i32>} : memref<8x2x32xf32, #tpu.memory_space<vmem>>, vector<1x2x32xf32>,
    %c2_i32 = arith.constant 2 : i32
    %170 = arith.index_cast %c2_i32 : i32 to index
    %c0_79 = arith.constant 0 : index
    %c0_80 = arith.constant 0 : index
    %171 = vector.load %arg17[%170, %c0_79, %c0_80] : memref<8x2x128xf32, #tpu.memory_space<vmem>>, vector<1x2x128xf32>
    %172 = vector.shape_cast %171 : vector<1x2x128xf32> to vector<2x128xf32>
    %173 = arith.truncf %165 : vector<2x32xf32> to vector<2x32xbf16>
    %cst_81 = arith.constant dense<0.000000e+00> : vector<2x128xf32>
    %174 = tpu.matmul %173, %5, %cst_81 {dimension_numbers = #tpu.dot_dimension_numbers<[1], [0], [0], [1], [0, 0, 1, 1], [], []>} : vector<2x32xbf16>, vector<32x128xbf16>, vector<2x128xf32> -> vector<2x128xf32>
    %175 = arith.addf %172, %174 : vector<2x128xf32>
    %176 = vector.extract_strided_slice %175 {offsets = [0, 0], sizes = [2, 32], strides = [1, 1]} : vector<2x128xf32> to vector<2x32xf32>
    %cst_82 = arith.constant 5.000000e-01 : f32
    %177 = vector.broadcast %cst_82 : f32 to vector<2x32xf32>
    %178 = arith.mulf %177, %176 : vector<2x32xf32>
    %179 = math.tanh %178 : vector<2x32xf32>
    %cst_83 = arith.constant 5.000000e-01 : f32
    %180 = vector.broadcast %cst_83 : f32 to vector<2x32xf32>
    %181 = arith.mulf %180, %179 : vector<2x32xf32>
    %cst_84 = arith.constant 5.000000e-01 : f32
    %182 = vector.broadcast %cst_84 : f32 to vector<2x32xf32>
    %183 = arith.addf %181, %182 : vector<2x32xf32>
    %184 = vector.extract_strided_slice %175 {offsets = [0, 32], sizes = [2, 32], strides = [1, 1]} : vector<2x128xf32> to vector<2x32xf32>
    %cst_85 = arith.constant 5.000000e-01 : f32
    %185 = vector.broadcast %cst_85 : f32 to vector<2x32xf32>
    %186 = arith.mulf %185, %184 : vector<2x32xf32>
    %187 = math.tanh %186 : vector<2x32xf32>
    %cst_86 = arith.constant 5.000000e-01 : f32
    %188 = vector.broadcast %cst_86 : f32 to vector<2x32xf32>
    %189 = arith.mulf %188, %187 : vector<2x32xf32>
    %cst_87 = arith.constant 5.000000e-01 : f32
    %190 = vector.broadcast %cst_87 : f32 to vector<2x32xf32>
    %191 = arith.addf %189, %190 : vector<2x32xf32>
    %192 = vector.extract_strided_slice %175 {offsets = [0, 64], sizes = [2, 32], strides = [1, 1]} : vector<2x128xf32> to vector<2x32xf32>
    %193 = math.tanh %192 : vector<2x32xf32>
    %194 = vector.extract_strided_slice %175 {offsets = [0, 96], sizes = [2, 32], strides = [1, 1]} : vector<2x128xf32> to vector<2x32xf32>
    %cst_88 = arith.constant 5.000000e-01 : f32
    %195 = vector.broadcast %cst_88 : f32 to vector<2x32xf32>
    %196 = arith.mulf %195, %194 : vector<2x32xf32>
    %197 = math.tanh %196 : vector<2x32xf32>
    %cst_89 = arith.constant 5.000000e-01 : f32
    %198 = vector.broadcast %cst_89 : f32 to vector<2x32xf32>
    %199 = arith.mulf %198, %197 : vector<2x32xf32>
    %cst_90 = arith.constant 5.000000e-01 : f32
    %200 = vector.broadcast %cst_90 : f32 to vector<2x32xf32>
    %201 = arith.addf %199, %200 : vector<2x32xf32>
    %202 = arith.mulf %191, %163 : vector<2x32xf32>
    %203 = arith.mulf %183, %193 : vector<2x32xf32>
    %204 = arith.addf %202, %203 : vector<2x32xf32>
    %205 = math.tanh %204 : vector<2x32xf32>
    %206 = arith.mulf %201, %205 : vector<2x32xf32>
    %207 = arith.index_cast %c2_i32 : i32 to index
    %c0_91 = arith.constant 0 : index
    %c0_92 = arith.constant 0 : index
    %208 = vector.load %arg18[%207, %c0_91, %c0_92] : memref<8x2x32xf32, #tpu.memory_space<vmem>>, vector<1x2x32xf32>
    %209 = vector.shape_cast %208 : vector<1x2x32xf32> to vector<2x32xf32>
    %210 = vector.shape_cast %206 : vector<2x32xf32> to vector<1x2x32xf32>
    tpu.vector_store %arg18[%207, %c0_91, %c0_92], %210 {strides = array<i32>} : memref<8x2x32xf32, #tpu.memory_space<vmem>>, vector<1x2x32xf32>,
    %c3_i32 = arith.constant 3 : i32
    %211 = arith.index_cast %c3_i32 : i32 to index
    %c0_93 = arith.constant 0 : index
    %c0_94 = arith.constant 0 : index
    %212 = vector.load %arg17[%211, %c0_93, %c0_94] : memref<8x2x128xf32, #tpu.memory_space<vmem>>, vector<1x2x128xf32>
    %213 = vector.shape_cast %212 : vector<1x2x128xf32> to vector<2x128xf32>
    %214 = arith.truncf %206 : vector<2x32xf32> to vector<2x32xbf16>
    %cst_95 = arith.constant dense<0.000000e+00> : vector<2x128xf32>
    %215 = tpu.matmul %214, %5, %cst_95 {dimension_numbers = #tpu.dot_dimension_numbers<[1], [0], [0], [1], [0, 0, 1, 1], [], []>} : vector<2x32xbf16>, vector<32x128xbf16>, vector<2x128xf32> -> vector<2x128xf32>
    %216 = arith.addf %213, %215 : vector<2x128xf32>
    %217 = vector.extract_strided_slice %216 {offsets = [0, 0], sizes = [2, 32], strides = [1, 1]} : vector<2x128xf32> to vector<2x32xf32>
    %cst_96 = arith.constant 5.000000e-01 : f32
    %218 = vector.broadcast %cst_96 : f32 to vector<2x32xf32>
    %219 = arith.mulf %218, %217 : vector<2x32xf32>
    %220 = math.tanh %219 : vector<2x32xf32>
    %cst_97 = arith.constant 5.000000e-01 : f32
    %221 = vector.broadcast %cst_97 : f32 to vector<2x32xf32>
    %222 = arith.mulf %221, %220 : vector<2x32xf32>
    %cst_98 = arith.constant 5.000000e-01 : f32
    %223 = vector.broadcast %cst_98 : f32 to vector<2x32xf32>
    %224 = arith.addf %222, %223 : vector<2x32xf32>
    %225 = vector.extract_strided_slice %216 {offsets = [0, 32], sizes = [2, 32], strides = [1, 1]} : vector<2x128xf32> to vector<2x32xf32>
    %cst_99 = arith.constant 5.000000e-01 : f32
    %226 = vector.broadcast %cst_99 : f32 to vector<2x32xf32>
    %227 = arith.mulf %226, %225 : vector<2x32xf32>
    %228 = math.tanh %227 : vector<2x32xf32>
    %cst_100 = arith.constant 5.000000e-01 : f32
    %229 = vector.broadcast %cst_100 : f32 to vector<2x32xf32>
    %230 = arith.mulf %229, %228 : vector<2x32xf32>
    %cst_101 = arith.constant 5.000000e-01 : f32
    %231 = vector.broadcast %cst_101 : f32 to vector<2x32xf32>
    %232 = arith.addf %230, %231 : vector<2x32xf32>
    %233 = vector.extract_strided_slice %216 {offsets = [0, 64], sizes = [2, 32], strides = [1, 1]} : vector<2x128xf32> to vector<2x32xf32>
    %234 = math.tanh %233 : vector<2x32xf32>
    %235 = vector.extract_strided_slice %216 {offsets = [0, 96], sizes = [2, 32], strides = [1, 1]} : vector<2x128xf32> to vector<2x32xf32>
    %cst_102 = arith.constant 5.000000e-01 : f32
    %236 = vector.broadcast %cst_102 : f32 to vector<2x32xf32>
    %237 = arith.mulf %236, %235 : vector<2x32xf32>
    %238 = math.tanh %237 : vector<2x32xf32>
    %cst_103 = arith.constant 5.000000e-01 : f32
    %239 = vector.broadcast %cst_103 : f32 to vector<2x32xf32>
    %240 = arith.mulf %239, %238 : vector<2x32xf32>
    %cst_104 = arith.constant 5.000000e-01 : f32
    %241 = vector.broadcast %cst_104 : f32 to vector<2x32xf32>
    %242 = arith.addf %240, %241 : vector<2x32xf32>
    %243 = arith.mulf %232, %204 : vector<2x32xf32>
    %244 = arith.mulf %224, %234 : vector<2x32xf32>
    %245 = arith.addf %243, %244 : vector<2x32xf32>
    %246 = math.tanh %245 : vector<2x32xf32>
    %247 = arith.mulf %242, %246 : vector<2x32xf32>
    %248 = arith.index_cast %c3_i32 : i32 to index
    %c0_105 = arith.constant 0 : index
    %c0_106 = arith.constant 0 : index
    %249 = vector.load %arg18[%248, %c0_105, %c0_106] : memref<8x2x32xf32, #tpu.memory_space<vmem>>, vector<1x2x32xf32>
    %250 = vector.shape_cast %249 : vector<1x2x32xf32> to vector<2x32xf32>
    %251 = vector.shape_cast %247 : vector<2x32xf32> to vector<1x2x32xf32>
    tpu.vector_store %arg18[%248, %c0_105, %c0_106], %251 {strides = array<i32>} : memref<8x2x32xf32, #tpu.memory_space<vmem>>, vector<1x2x32xf32>,
    %c4_i32 = arith.constant 4 : i32
    %252 = arith.index_cast %c4_i32 : i32 to index
    %c0_107 = arith.constant 0 : index
    %c0_108 = arith.constant 0 : index
    %253 = vector.load %arg17[%252, %c0_107, %c0_108] : memref<8x2x128xf32, #tpu.memory_space<vmem>>, vector<1x2x128xf32>
    %254 = vector.shape_cast %253 : vector<1x2x128xf32> to vector<2x128xf32>
    %255 = arith.truncf %247 : vector<2x32xf32> to vector<2x32xbf16>
    %cst_109 = arith.constant dense<0.000000e+00> : vector<2x128xf32>
    %256 = tpu.matmul %255, %5, %cst_109 {dimension_numbers = #tpu.dot_dimension_numbers<[1], [0], [0], [1], [0, 0, 1, 1], [], []>} : vector<2x32xbf16>, vector<32x128xbf16>, vector<2x128xf32> -> vector<2x128xf32>
    %257 = arith.addf %254, %256 : vector<2x128xf32>
    %258 = vector.extract_strided_slice %257 {offsets = [0, 0], sizes = [2, 32], strides = [1, 1]} : vector<2x128xf32> to vector<2x32xf32>
    %cst_110 = arith.constant 5.000000e-01 : f32
    %259 = vector.broadcast %cst_110 : f32 to vector<2x32xf32>
    %260 = arith.mulf %259, %258 : vector<2x32xf32>
    %261 = math.tanh %260 : vector<2x32xf32>
    %cst_111 = arith.constant 5.000000e-01 : f32
    %262 = vector.broadcast %cst_111 : f32 to vector<2x32xf32>
    %263 = arith.mulf %262, %261 : vector<2x32xf32>
    %cst_112 = arith.constant 5.000000e-01 : f32
    %264 = vector.broadcast %cst_112 : f32 to vector<2x32xf32>
    %265 = arith.addf %263, %264 : vector<2x32xf32>
    %266 = vector.extract_strided_slice %257 {offsets = [0, 32], sizes = [2, 32], strides = [1, 1]} : vector<2x128xf32> to vector<2x32xf32>
    %cst_113 = arith.constant 5.000000e-01 : f32
    %267 = vector.broadcast %cst_113 : f32 to vector<2x32xf32>
    %268 = arith.mulf %267, %266 : vector<2x32xf32>
    %269 = math.tanh %268 : vector<2x32xf32>
    %cst_114 = arith.constant 5.000000e-01 : f32
    %270 = vector.broadcast %cst_114 : f32 to vector<2x32xf32>
    %271 = arith.mulf %270, %269 : vector<2x32xf32>
    %cst_115 = arith.constant 5.000000e-01 : f32
    %272 = vector.broadcast %cst_115 : f32 to vector<2x32xf32>
    %273 = arith.addf %271, %272 : vector<2x32xf32>
    %274 = vector.extract_strided_slice %257 {offsets = [0, 64], sizes = [2, 32], strides = [1, 1]} : vector<2x128xf32> to vector<2x32xf32>
    %275 = math.tanh %274 : vector<2x32xf32>
    %276 = vector.extract_strided_slice %257 {offsets = [0, 96], sizes = [2, 32], strides = [1, 1]} : vector<2x128xf32> to vector<2x32xf32>
    %cst_116 = arith.constant 5.000000e-01 : f32
    %277 = vector.broadcast %cst_116 : f32 to vector<2x32xf32>
    %278 = arith.mulf %277, %276 : vector<2x32xf32>
    %279 = math.tanh %278 : vector<2x32xf32>
    %cst_117 = arith.constant 5.000000e-01 : f32
    %280 = vector.broadcast %cst_117 : f32 to vector<2x32xf32>
    %281 = arith.mulf %280, %279 : vector<2x32xf32>
    %cst_118 = arith.constant 5.000000e-01 : f32
    %282 = vector.broadcast %cst_118 : f32 to vector<2x32xf32>
    %283 = arith.addf %281, %282 : vector<2x32xf32>
    %284 = arith.mulf %273, %245 : vector<2x32xf32>
    %285 = arith.mulf %265, %275 : vector<2x32xf32>
    %286 = arith.addf %284, %285 : vector<2x32xf32>
    %287 = math.tanh %286 : vector<2x32xf32>
    %288 = arith.mulf %283, %287 : vector<2x32xf32>
    %289 = arith.index_cast %c4_i32 : i32 to index
    %c0_119 = arith.constant 0 : index
    %c0_120 = arith.constant 0 : index
    %290 = vector.load %arg18[%289, %c0_119, %c0_120] : memref<8x2x32xf32, #tpu.memory_space<vmem>>, vector<1x2x32xf32>
    %291 = vector.shape_cast %290 : vector<1x2x32xf32> to vector<2x32xf32>
    %292 = vector.shape_cast %288 : vector<2x32xf32> to vector<1x2x32xf32>
    tpu.vector_store %arg18[%289, %c0_119, %c0_120], %292 {strides = array<i32>} : memref<8x2x32xf32, #tpu.memory_space<vmem>>, vector<1x2x32xf32>,
    %c5_i32 = arith.constant 5 : i32
    %293 = arith.index_cast %c5_i32 : i32 to index
    %c0_121 = arith.constant 0 : index
    %c0_122 = arith.constant 0 : index
    %294 = vector.load %arg17[%293, %c0_121, %c0_122] : memref<8x2x128xf32, #tpu.memory_space<vmem>>, vector<1x2x128xf32>
    %295 = vector.shape_cast %294 : vector<1x2x128xf32> to vector<2x128xf32>
    %296 = arith.truncf %288 : vector<2x32xf32> to vector<2x32xbf16>
    %cst_123 = arith.constant dense<0.000000e+00> : vector<2x128xf32>
    %297 = tpu.matmul %296, %5, %cst_123 {dimension_numbers = #tpu.dot_dimension_numbers<[1], [0], [0], [1], [0, 0, 1, 1], [], []>} : vector<2x32xbf16>, vector<32x128xbf16>, vector<2x128xf32> -> vector<2x128xf32>
    %298 = arith.addf %295, %297 : vector<2x128xf32>
    %299 = vector.extract_strided_slice %298 {offsets = [0, 0], sizes = [2, 32], strides = [1, 1]} : vector<2x128xf32> to vector<2x32xf32>
    %cst_124 = arith.constant 5.000000e-01 : f32
    %300 = vector.broadcast %cst_124 : f32 to vector<2x32xf32>
    %301 = arith.mulf %300, %299 : vector<2x32xf32>
    %302 = math.tanh %301 : vector<2x32xf32>
    %cst_125 = arith.constant 5.000000e-01 : f32
    %303 = vector.broadcast %cst_125 : f32 to vector<2x32xf32>
    %304 = arith.mulf %303, %302 : vector<2x32xf32>
    %cst_126 = arith.constant 5.000000e-01 : f32
    %305 = vector.broadcast %cst_126 : f32 to vector<2x32xf32>
    %306 = arith.addf %304, %305 : vector<2x32xf32>
    %307 = vector.extract_strided_slice %298 {offsets = [0, 32], sizes = [2, 32], strides = [1, 1]} : vector<2x128xf32> to vector<2x32xf32>
    %cst_127 = arith.constant 5.000000e-01 : f32
    %308 = vector.broadcast %cst_127 : f32 to vector<2x32xf32>
    %309 = arith.mulf %308, %307 : vector<2x32xf32>
    %310 = math.tanh %309 : vector<2x32xf32>
    %cst_128 = arith.constant 5.000000e-01 : f32
    %311 = vector.broadcast %cst_128 : f32 to vector<2x32xf32>
    %312 = arith.mulf %311, %310 : vector<2x32xf32>
    %cst_129 = arith.constant 5.000000e-01 : f32
    %313 = vector.broadcast %cst_129 : f32 to vector<2x32xf32>
    %314 = arith.addf %312, %313 : vector<2x32xf32>
    %315 = vector.extract_strided_slice %298 {offsets = [0, 64], sizes = [2, 32], strides = [1, 1]} : vector<2x128xf32> to vector<2x32xf32>
    %316 = math.tanh %315 : vector<2x32xf32>
    %317 = vector.extract_strided_slice %298 {offsets = [0, 96], sizes = [2, 32], strides = [1, 1]} : vector<2x128xf32> to vector<2x32xf32>
    %cst_130 = arith.constant 5.000000e-01 : f32
    %318 = vector.broadcast %cst_130 : f32 to vector<2x32xf32>
    %319 = arith.mulf %318, %317 : vector<2x32xf32>
    %320 = math.tanh %319 : vector<2x32xf32>
    %cst_131 = arith.constant 5.000000e-01 : f32
    %321 = vector.broadcast %cst_131 : f32 to vector<2x32xf32>
    %322 = arith.mulf %321, %320 : vector<2x32xf32>
    %cst_132 = arith.constant 5.000000e-01 : f32
    %323 = vector.broadcast %cst_132 : f32 to vector<2x32xf32>
    %324 = arith.addf %322, %323 : vector<2x32xf32>
    %325 = arith.mulf %314, %286 : vector<2x32xf32>
    %326 = arith.mulf %306, %316 : vector<2x32xf32>
    %327 = arith.addf %325, %326 : vector<2x32xf32>
    %328 = math.tanh %327 : vector<2x32xf32>
    %329 = arith.mulf %324, %328 : vector<2x32xf32>
    %330 = arith.index_cast %c5_i32 : i32 to index
    %c0_133 = arith.constant 0 : index
    %c0_134 = arith.constant 0 : index
    %331 = vector.load %arg18[%330, %c0_133, %c0_134] : memref<8x2x32xf32, #tpu.memory_space<vmem>>, vector<1x2x32xf32>
    %332 = vector.shape_cast %331 : vector<1x2x32xf32> to vector<2x32xf32>
    %333 = vector.shape_cast %329 : vector<2x32xf32> to vector<1x2x32xf32>
    tpu.vector_store %arg18[%330, %c0_133, %c0_134], %333 {strides = array<i32>} : memref<8x2x32xf32, #tpu.memory_space<vmem>>, vector<1x2x32xf32>,
    %c6_i32 = arith.constant 6 : i32
    %334 = arith.index_cast %c6_i32 : i32 to index
    %c0_135 = arith.constant 0 : index
    %c0_136 = arith.constant 0 : index
    %335 = vector.load %arg17[%334, %c0_135, %c0_136] : memref<8x2x128xf32, #tpu.memory_space<vmem>>, vector<1x2x128xf32>
    %336 = vector.shape_cast %335 : vector<1x2x128xf32> to vector<2x128xf32>
    %337 = arith.truncf %329 : vector<2x32xf32> to vector<2x32xbf16>
    %cst_137 = arith.constant dense<0.000000e+00> : vector<2x128xf32>
    %338 = tpu.matmul %337, %5, %cst_137 {dimension_numbers = #tpu.dot_dimension_numbers<[1], [0], [0], [1], [0, 0, 1, 1], [], []>} : vector<2x32xbf16>, vector<32x128xbf16>, vector<2x128xf32> -> vector<2x128xf32>
    %339 = arith.addf %336, %338 : vector<2x128xf32>
    %340 = vector.extract_strided_slice %339 {offsets = [0, 0], sizes = [2, 32], strides = [1, 1]} : vector<2x128xf32> to vector<2x32xf32>
    %cst_138 = arith.constant 5.000000e-01 : f32
    %341 = vector.broadcast %cst_138 : f32 to vector<2x32xf32>
    %342 = arith.mulf %341, %340 : vector<2x32xf32>
    %343 = math.tanh %342 : vector<2x32xf32>
    %cst_139 = arith.constant 5.000000e-01 : f32
    %344 = vector.broadcast %cst_139 : f32 to vector<2x32xf32>
    %345 = arith.mulf %344, %343 : vector<2x32xf32>
    %cst_140 = arith.constant 5.000000e-01 : f32
    %346 = vector.broadcast %cst_140 : f32 to vector<2x32xf32>
    %347 = arith.addf %345, %346 : vector<2x32xf32>
    %348 = vector.extract_strided_slice %339 {offsets = [0, 32], sizes = [2, 32], strides = [1, 1]} : vector<2x128xf32> to vector<2x32xf32>
    %cst_141 = arith.constant 5.000000e-01 : f32
    %349 = vector.broadcast %cst_141 : f32 to vector<2x32xf32>
    %350 = arith.mulf %349, %348 : vector<2x32xf32>
    %351 = math.tanh %350 : vector<2x32xf32>
    %cst_142 = arith.constant 5.000000e-01 : f32
    %352 = vector.broadcast %cst_142 : f32 to vector<2x32xf32>
    %353 = arith.mulf %352, %351 : vector<2x32xf32>
    %cst_143 = arith.constant 5.000000e-01 : f32
    %354 = vector.broadcast %cst_143 : f32 to vector<2x32xf32>
    %355 = arith.addf %353, %354 : vector<2x32xf32>
    %356 = vector.extract_strided_slice %339 {offsets = [0, 64], sizes = [2, 32], strides = [1, 1]} : vector<2x128xf32> to vector<2x32xf32>
    %357 = math.tanh %356 : vector<2x32xf32>
    %358 = vector.extract_strided_slice %339 {offsets = [0, 96], sizes = [2, 32], strides = [1, 1]} : vector<2x128xf32> to vector<2x32xf32>
    %cst_144 = arith.constant 5.000000e-01 : f32
    %359 = vector.broadcast %cst_144 : f32 to vector<2x32xf32>
    %360 = arith.mulf %359, %358 : vector<2x32xf32>
    %361 = math.tanh %360 : vector<2x32xf32>
    %cst_145 = arith.constant 5.000000e-01 : f32
    %362 = vector.broadcast %cst_145 : f32 to vector<2x32xf32>
    %363 = arith.mulf %362, %361 : vector<2x32xf32>
    %cst_146 = arith.constant 5.000000e-01 : f32
    %364 = vector.broadcast %cst_146 : f32 to vector<2x32xf32>
    %365 = arith.addf %363, %364 : vector<2x32xf32>
    %366 = arith.mulf %355, %327 : vector<2x32xf32>
    %367 = arith.mulf %347, %357 : vector<2x32xf32>
    %368 = arith.addf %366, %367 : vector<2x32xf32>
    %369 = math.tanh %368 : vector<2x32xf32>
    %370 = arith.mulf %365, %369 : vector<2x32xf32>
    %371 = arith.index_cast %c6_i32 : i32 to index
    %c0_147 = arith.constant 0 : index
    %c0_148 = arith.constant 0 : index
    %372 = vector.load %arg18[%371, %c0_147, %c0_148] : memref<8x2x32xf32, #tpu.memory_space<vmem>>, vector<1x2x32xf32>
    %373 = vector.shape_cast %372 : vector<1x2x32xf32> to vector<2x32xf32>
    %374 = vector.shape_cast %370 : vector<2x32xf32> to vector<1x2x32xf32>
    tpu.vector_store %arg18[%371, %c0_147, %c0_148], %374 {strides = array<i32>} : memref<8x2x32xf32, #tpu.memory_space<vmem>>, vector<1x2x32xf32>,
    %c7_i32 = arith.constant 7 : i32
    %375 = arith.index_cast %c7_i32 : i32 to index
    %c0_149 = arith.constant 0 : index
    %c0_150 = arith.constant 0 : index
    %376 = vector.load %arg17[%375, %c0_149, %c0_150] : memref<8x2x128xf32, #tpu.memory_space<vmem>>, vector<1x2x128xf32>
    %377 = vector.shape_cast %376 : vector<1x2x128xf32> to vector<2x128xf32>
    %378 = arith.truncf %370 : vector<2x32xf32> to vector<2x32xbf16>
    %cst_151 = arith.constant dense<0.000000e+00> : vector<2x128xf32>
    %379 = tpu.matmul %378, %5, %cst_151 {dimension_numbers = #tpu.dot_dimension_numbers<[1], [0], [0], [1], [0, 0, 1, 1], [], []>} : vector<2x32xbf16>, vector<32x128xbf16>, vector<2x128xf32> -> vector<2x128xf32>
    %380 = arith.addf %377, %379 : vector<2x128xf32>
    %381 = vector.extract_strided_slice %380 {offsets = [0, 0], sizes = [2, 32], strides = [1, 1]} : vector<2x128xf32> to vector<2x32xf32>
    %cst_152 = arith.constant 5.000000e-01 : f32
    %382 = vector.broadcast %cst_152 : f32 to vector<2x32xf32>
    %383 = arith.mulf %382, %381 : vector<2x32xf32>
    %384 = math.tanh %383 : vector<2x32xf32>
    %cst_153 = arith.constant 5.000000e-01 : f32
    %385 = vector.broadcast %cst_153 : f32 to vector<2x32xf32>
    %386 = arith.mulf %385, %384 : vector<2x32xf32>
    %cst_154 = arith.constant 5.000000e-01 : f32
    %387 = vector.broadcast %cst_154 : f32 to vector<2x32xf32>
    %388 = arith.addf %386, %387 : vector<2x32xf32>
    %389 = vector.extract_strided_slice %380 {offsets = [0, 32], sizes = [2, 32], strides = [1, 1]} : vector<2x128xf32> to vector<2x32xf32>
    %cst_155 = arith.constant 5.000000e-01 : f32
    %390 = vector.broadcast %cst_155 : f32 to vector<2x32xf32>
    %391 = arith.mulf %390, %389 : vector<2x32xf32>
    %392 = math.tanh %391 : vector<2x32xf32>
    %cst_156 = arith.constant 5.000000e-01 : f32
    %393 = vector.broadcast %cst_156 : f32 to vector<2x32xf32>
    %394 = arith.mulf %393, %392 : vector<2x32xf32>
    %cst_157 = arith.constant 5.000000e-01 : f32
    %395 = vector.broadcast %cst_157 : f32 to vector<2x32xf32>
    %396 = arith.addf %394, %395 : vector<2x32xf32>
    %397 = vector.extract_strided_slice %380 {offsets = [0, 64], sizes = [2, 32], strides = [1, 1]} : vector<2x128xf32> to vector<2x32xf32>
    %398 = math.tanh %397 : vector<2x32xf32>
    %399 = vector.extract_strided_slice %380 {offsets = [0, 96], sizes = [2, 32], strides = [1, 1]} : vector<2x128xf32> to vector<2x32xf32>
    %cst_158 = arith.constant 5.000000e-01 : f32
    %400 = vector.broadcast %cst_158 : f32 to vector<2x32xf32>
    %401 = arith.mulf %400, %399 : vector<2x32xf32>
    %402 = math.tanh %401 : vector<2x32xf32>
    %cst_159 = arith.constant 5.000000e-01 : f32
    %403 = vector.broadcast %cst_159 : f32 to vector<2x32xf32>
    %404 = arith.mulf %403, %402 : vector<2x32xf32>
    %cst_160 = arith.constant 5.000000e-01 : f32
    %405 = vector.broadcast %cst_160 : f32 to vector<2x32xf32>
    %406 = arith.addf %404, %405 : vector<2x32xf32>
    %407 = arith.mulf %396, %368 : vector<2x32xf32>
    %408 = arith.mulf %388, %398 : vector<2x32xf32>
    %409 = arith.addf %407, %408 : vector<2x32xf32>
    %410 = math.tanh %409 : vector<2x32xf32>
    %411 = arith.mulf %406, %410 : vector<2x32xf32>
    %412 = arith.index_cast %c7_i32 : i32 to index
    %c0_161 = arith.constant 0 : index
    %c0_162 = arith.constant 0 : index
    %413 = vector.load %arg18[%412, %c0_161, %c0_162] : memref<8x2x32xf32, #tpu.memory_space<vmem>>, vector<1x2x32xf32>
    %414 = vector.shape_cast %413 : vector<1x2x32xf32> to vector<2x32xf32>
    %415 = vector.shape_cast %411 : vector<2x32xf32> to vector<1x2x32xf32>
    tpu.vector_store %arg18[%412, %c0_161, %c0_162], %415 {strides = array<i32>} : memref<8x2x32xf32, #tpu.memory_space<vmem>>, vector<1x2x32xf32>,
    %c8_i32 = arith.constant 8 : i32
    %c0_163 = arith.constant 0 : index
    %c0_164 = arith.constant 0 : index
    %416 = vector.load %arg15[%c0_163, %c0_164] : memref<2x32xf32, #tpu.memory_space<vmem>>, vector<2x32xf32>
    tpu.vector_store %arg15[%c0_163, %c0_164], %411 {strides = array<i32>} : memref<2x32xf32, #tpu.memory_space<vmem>>, vector<2x32xf32>,
    %c0_165 = arith.constant 0 : index
    %c0_166 = arith.constant 0 : index
    %417 = vector.load %arg16[%c0_165, %c0_166] : memref<2x32xf32, #tpu.memory_space<vmem>>, vector<2x32xf32>
    tpu.vector_store %arg16[%c0_165, %c0_166], %409 {strides = array<i32>} : memref<2x32xf32, #tpu.memory_space<vmem>>, vector<2x32xf32>,
    %c0_167 = arith.constant 0 : index
    %c0_168 = arith.constant 0 : index
    %c0_169 = arith.constant 0 : index
    %418 = vector.load %arg18[%c0_167, %c0_168, %c0_169] : memref<8x2x32xf32, #tpu.memory_space<vmem>>, vector<1x2x32xf32>
    %419 = vector.shape_cast %418 : vector<1x2x32xf32> to vector<2x32xf32>
    %c1_170 = arith.constant 1 : index
    %c0_171 = arith.constant 0 : index
    %c0_172 = arith.constant 0 : index
    %420 = vector.load %arg18[%c1_170, %c0_171, %c0_172] : memref<8x2x32xf32, #tpu.memory_space<vmem>>, vector<1x2x32xf32>
    %421 = vector.shape_cast %420 : vector<1x2x32xf32> to vector<2x32xf32>
    %c2_173 = arith.constant 2 : index
    %c0_174 = arith.constant 0 : index
    %c0_175 = arith.constant 0 : index
    %422 = vector.load %arg18[%c2_173, %c0_174, %c0_175] : memref<8x2x32xf32, #tpu.memory_space<vmem>>, vector<1x2x32xf32>
    %423 = vector.shape_cast %422 : vector<1x2x32xf32> to vector<2x32xf32>
    %c3_176 = arith.constant 3 : index
    %c0_177 = arith.constant 0 : index
    %c0_178 = arith.constant 0 : index
    %424 = vector.load %arg18[%c3_176, %c0_177, %c0_178] : memref<8x2x32xf32, #tpu.memory_space<vmem>>, vector<1x2x32xf32>
    %425 = vector.shape_cast %424 : vector<1x2x32xf32> to vector<2x32xf32>
    %c4_179 = arith.constant 4 : index
    %c0_180 = arith.constant 0 : index
    %c0_181 = arith.constant 0 : index
    %426 = vector.load %arg18[%c4_179, %c0_180, %c0_181] : memref<8x2x32xf32, #tpu.memory_space<vmem>>, vector<1x2x32xf32>
    %427 = vector.shape_cast %426 : vector<1x2x32xf32> to vector<2x32xf32>
    %c5_182 = arith.constant 5 : index
    %c0_183 = arith.constant 0 : index
    %c0_184 = arith.constant 0 : index
    %428 = vector.load %arg18[%c5_182, %c0_183, %c0_184] : memref<8x2x32xf32, #tpu.memory_space<vmem>>, vector<1x2x32xf32>
    %429 = vector.shape_cast %428 : vector<1x2x32xf32> to vector<2x32xf32>
    %c6_185 = arith.constant 6 : index
    %c0_186 = arith.constant 0 : index
    %c0_187 = arith.constant 0 : index
    %430 = vector.load %arg18[%c6_185, %c0_186, %c0_187] : memref<8x2x32xf32, #tpu.memory_space<vmem>>, vector<1x2x32xf32>
    %431 = vector.shape_cast %430 : vector<1x2x32xf32> to vector<2x32xf32>
    %c7_188 = arith.constant 7 : index
    %c0_189 = arith.constant 0 : index
    %c0_190 = arith.constant 0 : index
    %432 = vector.load %arg18[%c7_188, %c0_189, %c0_190] : memref<8x2x32xf32, #tpu.memory_space<vmem>>, vector<1x2x32xf32>
    %433 = vector.shape_cast %432 : vector<1x2x32xf32> to vector<2x32xf32>
    %434 = vector.shape_cast %419 : vector<2x32xf32> to vector<2x1x32xf32>
    %435 = vector.shape_cast %421 : vector<2x32xf32> to vector<2x1x32xf32>
    %436 = vector.shape_cast %423 : vector<2x32xf32> to vector<2x1x32xf32>
    %437 = vector.shape_cast %425 : vector<2x32xf32> to vector<2x1x32xf32>
    %438 = vector.shape_cast %427 : vector<2x32xf32> to vector<2x1x32xf32>
    %439 = vector.shape_cast %429 : vector<2x32xf32> to vector<2x1x32xf32>
    %440 = vector.shape_cast %431 : vector<2x32xf32> to vector<2x1x32xf32>
    %441 = vector.shape_cast %433 : vector<2x32xf32> to vector<2x1x32xf32>
    %442 = tpu.concatenate %434, %435, %436, %437, %438, %439, %440, %441 in 1 : vector<2x1x32xf32>, vector<2x1x32xf32>, vector<2x1x32xf32>, vector<2x1x32xf32>, vector<2x1x32xf32>, vector<2x1x32xf32>, vector<2x1x32xf32>, vector<2x1x32xf32> -> vector<2x8x32xf32>
    %443 = arith.addf %442, %10 : vector<2x8x32xf32>
    %444 = vector.shape_cast %443 : vector<2x8x32xf32> to vector<16x32xf32>
    %cst_191 = arith.constant dense<0.000000e+00> : vector<16xf32>
    %445 = vector.multi_reduction <add>, %444, %cst_191 [1] : vector<16x32xf32> to vector<16xf32>
    %446 = vector.shape_cast %445 : vector<16xf32> to vector<16x1xf32>
    %cst_192 = arith.constant 3.200000e+01 : f32
    %447 = vector.broadcast %cst_192 : f32 to vector<16x1xf32>
    %448 = arith.divf %446, %447 : vector<16x1xf32>
    %449 = vector.broadcast %448 : vector<16x1xf32> to vector<16x32xf32>
    %450 = arith.subf %444, %449 : vector<16x32xf32>
    %451 = arith.mulf %450, %450 : vector<16x32xf32>
    %cst_193 = arith.constant dense<0.000000e+00> : vector<16xf32>
    %452 = vector.multi_reduction <add>, %451, %cst_193 [1] : vector<16x32xf32> to vector<16xf32>
    %453 = vector.shape_cast %452 : vector<16xf32> to vector<16x1xf32>
    %cst_194 = arith.constant 3.200000e+01 : f32
    %454 = vector.broadcast %cst_194 : f32 to vector<16x1xf32>
    %455 = arith.divf %453, %454 : vector<16x1xf32>
    %456 = vector.broadcast %448 : vector<16x1xf32> to vector<16x32xf32>
    %457 = arith.subf %444, %456 : vector<16x32xf32>
    %cst_195 = arith.constant 9.99999974E-6 : f32
    %458 = vector.broadcast %cst_195 : f32 to vector<16x1xf32>
    %459 = arith.addf %455, %458 : vector<16x1xf32>
    %460 = math.rsqrt %459 : vector<16x1xf32>
    %461 = vector.broadcast %460 : vector<16x1xf32> to vector<16x32xf32>
    %462 = arith.mulf %457, %461 : vector<16x32xf32>
    %463 = vector.broadcast %2 : vector<1x32xf32> to vector<16x32xf32>
    %464 = arith.mulf %462, %463 : vector<16x32xf32>
    %465 = vector.broadcast %3 : vector<1x32xf32> to vector<16x32xf32>
    %466 = arith.addf %464, %465 : vector<16x32xf32>
    %467 = arith.truncf %466 : vector<16x32xf32> to vector<16x32xbf16>
    %cst_196 = arith.constant dense<0.000000e+00> : vector<16x128xf32>
    %468 = tpu.matmul %467, %7, %cst_196 {dimension_numbers = #tpu.dot_dimension_numbers<[1], [0], [0], [1], [0, 0, 1, 1], [], []>} : vector<16x32xbf16>, vector<32x128xbf16>, vector<16x128xf32> -> vector<16x128xf32>
    %cst_197 = arith.constant 0.000000e+00 : f32
    %469 = vector.broadcast %cst_197 : f32 to vector<16x128xf32>
    %470 = arith.maximumf %468, %469 : vector<16x128xf32>
    %471 = arith.truncf %470 : vector<16x128xf32> to vector<16x128xbf16>
    %cst_198 = arith.constant dense<0.000000e+00> : vector<16x32xf32>
    %472 = tpu.matmul %471, %8, %cst_198 {dimension_numbers = #tpu.dot_dimension_numbers<[1], [0], [0], [1], [0, 0, 1, 1], [], []>} : vector<16x128xbf16>, vector<128x32xbf16>, vector<16x32xf32> -> vector<16x32xf32>
    %473 = vector.broadcast %9 : vector<1x32xf32> to vector<16x32xf32>
    %474 = arith.addf %472, %473 : vector<16x32xf32>
    %475 = arith.addf %474, %444 : vector<16x32xf32>
    %476 = vector.shape_cast %475 : vector<16x32xf32> to vector<2x8x32xf32>
    %c0_199 = arith.constant 0 : index
    %c0_200 = arith.constant 0 : index
    %c0_201 = arith.constant 0 : index
    %477 = vector.load %arg14[%c0_199, %c0_200, %c0_201] : memref<2x8x32xf32, #tpu.memory_space<vmem>>, vector<2x8x32xf32>
    tpu.vector_store %arg14[%c0_199, %c0_200, %c0_201], %476 {strides = array<i32>} : memref<2x8x32xf32, #tpu.memory_space<vmem>>, vector<2x8x32xf32>,
    return
  }
}

module attributes {stable_mosaic.version = 11 : i64} {
  func.func @_block_kernel(%arg0: memref<2x8x32xf32, #tpu.memory_space<vmem>>, %arg1: memref<2x1xf32, #tpu.memory_space<vmem>>, %arg2: memref<2x32xf32, #tpu.memory_space<vmem>>, %arg3: memref<2x32xf32, #tpu.memory_space<vmem>>, %arg4: memref<1x32xf32, #tpu.memory_space<vmem>>, %arg5: memref<1x32xf32, #tpu.memory_space<vmem>>, %arg6: memref<32x128xbf16, #tpu.memory_space<vmem>>, %arg7: memref<32x128xbf16, #tpu.memory_space<vmem>>, %arg8: memref<1x128xf32, #tpu.memory_space<vmem>>, %arg9: memref<1x32xf32, #tpu.memory_space<vmem>>, %arg10: memref<1x32xf32, #tpu.memory_space<vmem>>, %arg11: memref<32x128xbf16, #tpu.memory_space<vmem>>, %arg12: memref<128x32xbf16, #tpu.memory_space<vmem>>, %arg13: memref<1x32xf32, #tpu.memory_space<vmem>>, %arg14: memref<2x8x32xf32, #tpu.memory_space<vmem>>, %arg15: memref<2x32xf32, #tpu.memory_space<vmem>>, %arg16: memref<2x32xf32, #tpu.memory_space<vmem>>, %arg17: memref<8x2x128xf32, #tpu.memory_space<vmem>>, %arg18: memref<8x2x32xf32, #tpu.memory_space<vmem>>) attributes {dimension_semantics = [], scalar_prefetch = 0 : i64, scratch_operands = 2 : i64, tpu.core_type = #tpu.core_type<tc>} {
    %c0 = arith.constant 0 : index
    %c0_0 = arith.constant 0 : index
    %0 = vector.load %arg4[%c0, %c0_0] : memref<1x32xf32, #tpu.memory_space<vmem>>, vector<1x32xf32>
    %c0_1 = arith.constant 0 : index
    %c0_2 = arith.constant 0 : index
    %1 = vector.load %arg5[%c0_1, %c0_2] : memref<1x32xf32, #tpu.memory_space<vmem>>, vector<1x32xf32>
    %c0_3 = arith.constant 0 : index
    %c0_4 = arith.constant 0 : index
    %2 = vector.load %arg9[%c0_3, %c0_4] : memref<1x32xf32, #tpu.memory_space<vmem>>, vector<1x32xf32>
    %c0_5 = arith.constant 0 : index
    %c0_6 = arith.constant 0 : index
    %3 = vector.load %arg10[%c0_5, %c0_6] : memref<1x32xf32, #tpu.memory_space<vmem>>, vector<1x32xf32>
    %c0_7 = arith.constant 0 : index
    %c0_8 = arith.constant 0 : index
    %4 = vector.load %arg6[%c0_7, %c0_8] : memref<32x128xbf16, #tpu.memory_space<vmem>>, vector<32x128xbf16>
    %c0_9 = arith.constant 0 : index
    %c0_10 = arith.constant 0 : index
    %5 = vector.load %arg7[%c0_9, %c0_10] : memref<32x128xbf16, #tpu.memory_space<vmem>>, vector<32x128xbf16>
    %c0_11 = arith.constant 0 : index
    %c0_12 = arith.constant 0 : index
    %6 = vector.load %arg8[%c0_11, %c0_12] : memref<1x128xf32, #tpu.memory_space<vmem>>, vector<1x128xf32>
    %c0_13 = arith.constant 0 : index
    %c0_14 = arith.constant 0 : index
    %7 = vector.load %arg11[%c0_13, %c0_14] : memref<32x128xbf16, #tpu.memory_space<vmem>>, vector<32x128xbf16>
    %c0_15 = arith.constant 0 : index
    %c0_16 = arith.constant 0 : index
    %8 = vector.load %arg12[%c0_15, %c0_16] : memref<128x32xbf16, #tpu.memory_space<vmem>>, vector<128x32xbf16>
    %c0_17 = arith.constant 0 : index
    %c0_18 = arith.constant 0 : index
    %9 = vector.load %arg13[%c0_17, %c0_18] : memref<1x32xf32, #tpu.memory_space<vmem>>, vector<1x32xf32>
    %c0_19 = arith.constant 0 : index
    %c0_20 = arith.constant 0 : index
    %c0_21 = arith.constant 0 : index
    %10 = vector.load %arg0[%c0_19, %c0_20, %c0_21] : memref<2x8x32xf32, #tpu.memory_space<vmem>>, vector<2x8x32xf32>
    %11 = vector.shape_cast %10 : vector<2x8x32xf32> to vector<16x32xf32>
    %cst = arith.constant dense<0.000000e+00> : vector<16xf32>
    %12 = vector.multi_reduction <add>, %11, %cst [1] : vector<16x32xf32> to vector<16xf32>
    %13 = vector.shape_cast %12 : vector<16xf32> to vector<16x1xf32>
    %cst_22 = arith.constant 3.200000e+01 : f32
    %14 = vector.broadcast %cst_22 : f32 to vector<16x1xf32>
    %15 = arith.divf %13, %14 : vector<16x1xf32>
    %16 = vector.broadcast %15 : vector<16x1xf32> to vector<16x32xf32>
    %17 = arith.subf %11, %16 : vector<16x32xf32>
    %18 = arith.mulf %17, %17 : vector<16x32xf32>
    %cst_23 = arith.constant dense<0.000000e+00> : vector<16xf32>
    %19 = vector.multi_reduction <add>, %18, %cst_23 [1] : vector<16x32xf32> to vector<16xf32>
    %20 = vector.shape_cast %19 : vector<16xf32> to vector<16x1xf32>
    %cst_24 = arith.constant 3.200000e+01 : f32
    %21 = vector.broadcast %cst_24 : f32 to vector<16x1xf32>
    %22 = arith.divf %20, %21 : vector<16x1xf32>
    %23 = vector.broadcast %15 : vector<16x1xf32> to vector<16x32xf32>
    %24 = arith.subf %11, %23 : vector<16x32xf32>
    %cst_25 = arith.constant 9.99999974E-6 : f32
    %25 = vector.broadcast %cst_25 : f32 to vector<16x1xf32>
    %26 = arith.addf %22, %25 : vector<16x1xf32>
    %27 = math.rsqrt %26 : vector<16x1xf32>
    %28 = vector.broadcast %27 : vector<16x1xf32> to vector<16x32xf32>
    %29 = arith.mulf %24, %28 : vector<16x32xf32>
    %30 = vector.broadcast %0 : vector<1x32xf32> to vector<16x32xf32>
    %31 = arith.mulf %29, %30 : vector<16x32xf32>
    %32 = vector.broadcast %1 : vector<1x32xf32> to vector<16x32xf32>
    %33 = arith.addf %31, %32 : vector<16x32xf32>
    %34 = arith.truncf %33 : vector<16x32xf32> to vector<16x32xbf16>
    %cst_26 = arith.constant dense<0.000000e+00> : vector<16x128xf32>
    %35 = tpu.matmul %34, %4, %cst_26 {dimension_numbers = #tpu.dot_dimension_numbers<[1], [0], [0], [1], [0, 0, 1, 1], [], []>} : vector<16x32xbf16>, vector<32x128xbf16>, vector<16x128xf32> -> vector<16x128xf32>
    %36 = vector.broadcast %6 : vector<1x128xf32> to vector<16x128xf32>
    %37 = arith.addf %35, %36 : vector<16x128xf32>
    %38 = vector.shape_cast %37 : vector<16x128xf32> to vector<2x8x128xf32>
    %39 = vector.extract_strided_slice %38 {offsets = [0, 0, 0], sizes = [2, 1, 128], strides = [1, 1, 1]} : vector<2x8x128xf32> to vector<2x1x128xf32>
    %40 = vector.shape_cast %39 : vector<2x1x128xf32> to vector<2x128xf32>
    %c0_27 = arith.constant 0 : index
    %c0_28 = arith.constant 0 : index
    %c0_29 = arith.constant 0 : index
    %41 = vector.load %arg17[%c0_27, %c0_28, %c0_29] : memref<8x2x128xf32, #tpu.memory_space<vmem>>, vector<1x2x128xf32>
    %42 = vector.shape_cast %41 : vector<1x2x128xf32> to vector<2x128xf32>
    %43 = vector.shape_cast %40 : vector<2x128xf32> to vector<1x2x128xf32>
    tpu.vector_store %arg17[%c0_27, %c0_28, %c0_29], %43 {strides = array<i32>} : memref<8x2x128xf32, #tpu.memory_space<vmem>>, vector<1x2x128xf32>,
    %44 = vector.extract_strided_slice %38 {offsets = [0, 1, 0], sizes = [2, 1, 128], strides = [1, 1, 1]} : vector<2x8x128xf32> to vector<2x1x128xf32>
    %45 = vector.shape_cast %44 : vector<2x1x128xf32> to vector<2x128xf32>
    %c1 = arith.constant 1 : index
    %c0_30 = arith.constant 0 : index
    %c0_31 = arith.constant 0 : index
    %46 = vector.load %arg17[%c1, %c0_30, %c0_31] : memref<8x2x128xf32, #tpu.memory_space<vmem>>, vector<1x2x128xf32>
    %47 = vector.shape_cast %46 : vector<1x2x128xf32> to vector<2x128xf32>
    %48 = vector.shape_cast %45 : vector<2x128xf32> to vector<1x2x128xf32>
    tpu.vector_store %arg17[%c1, %c0_30, %c0_31], %48 {strides = array<i32>} : memref<8x2x128xf32, #tpu.memory_space<vmem>>, vector<1x2x128xf32>,
    %49 = vector.extract_strided_slice %38 {offsets = [0, 2, 0], sizes = [2, 1, 128], strides = [1, 1, 1]} : vector<2x8x128xf32> to vector<2x1x128xf32>
    %50 = vector.shape_cast %49 : vector<2x1x128xf32> to vector<2x128xf32>
    %c2 = arith.constant 2 : index
    %c0_32 = arith.constant 0 : index
    %c0_33 = arith.constant 0 : index
    %51 = vector.load %arg17[%c2, %c0_32, %c0_33] : memref<8x2x128xf32, #tpu.memory_space<vmem>>, vector<1x2x128xf32>
    %52 = vector.shape_cast %51 : vector<1x2x128xf32> to vector<2x128xf32>
    %53 = vector.shape_cast %50 : vector<2x128xf32> to vector<1x2x128xf32>
    tpu.vector_store %arg17[%c2, %c0_32, %c0_33], %53 {strides = array<i32>} : memref<8x2x128xf32, #tpu.memory_space<vmem>>, vector<1x2x128xf32>,
    %54 = vector.extract_strided_slice %38 {offsets = [0, 3, 0], sizes = [2, 1, 128], strides = [1, 1, 1]} : vector<2x8x128xf32> to vector<2x1x128xf32>
    %55 = vector.shape_cast %54 : vector<2x1x128xf32> to vector<2x128xf32>
    %c3 = arith.constant 3 : index
    %c0_34 = arith.constant 0 : index
    %c0_35 = arith.constant 0 : index
    %56 = vector.load %arg17[%c3, %c0_34, %c0_35] : memref<8x2x128xf32, #tpu.memory_space<vmem>>, vector<1x2x128xf32>
    %57 = vector.shape_cast %56 : vector<1x2x128xf32> to vector<2x128xf32>
    %58 = vector.shape_cast %55 : vector<2x128xf32> to vector<1x2x128xf32>
    tpu.vector_store %arg17[%c3, %c0_34, %c0_35], %58 {strides = array<i32>} : memref<8x2x128xf32, #tpu.memory_space<vmem>>, vector<1x2x128xf32>,
    %59 = vector.extract_strided_slice %38 {offsets = [0, 4, 0], sizes = [2, 1, 128], strides = [1, 1, 1]} : vector<2x8x128xf32> to vector<2x1x128xf32>
    %60 = vector.shape_cast %59 : vector<2x1x128xf32> to vector<2x128xf32>
    %c4 = arith.constant 4 : index
    %c0_36 = arith.constant 0 : index
    %c0_37 = arith.constant 0 : index
    %61 = vector.load %arg17[%c4, %c0_36, %c0_37] : memref<8x2x128xf32, #tpu.memory_space<vmem>>, vector<1x2x128xf32>
    %62 = vector.shape_cast %61 : vector<1x2x128xf32> to vector<2x128xf32>
    %63 = vector.shape_cast %60 : vector<2x128xf32> to vector<1x2x128xf32>
    tpu.vector_store %arg17[%c4, %c0_36, %c0_37], %63 {strides = array<i32>} : memref<8x2x128xf32, #tpu.memory_space<vmem>>, vector<1x2x128xf32>,
    %64 = vector.extract_strided_slice %38 {offsets = [0, 5, 0], sizes = [2, 1, 128], strides = [1, 1, 1]} : vector<2x8x128xf32> to vector<2x1x128xf32>
    %65 = vector.shape_cast %64 : vector<2x1x128xf32> to vector<2x128xf32>
    %c5 = arith.constant 5 : index
    %c0_38 = arith.constant 0 : index
    %c0_39 = arith.constant 0 : index
    %66 = vector.load %arg17[%c5, %c0_38, %c0_39] : memref<8x2x128xf32, #tpu.memory_space<vmem>>, vector<1x2x128xf32>
    %67 = vector.shape_cast %66 : vector<1x2x128xf32> to vector<2x128xf32>
    %68 = vector.shape_cast %65 : vector<2x128xf32> to vector<1x2x128xf32>
    tpu.vector_store %arg17[%c5, %c0_38, %c0_39], %68 {strides = array<i32>} : memref<8x2x128xf32, #tpu.memory_space<vmem>>, vector<1x2x128xf32>,
    %69 = vector.extract_strided_slice %38 {offsets = [0, 6, 0], sizes = [2, 1, 128], strides = [1, 1, 1]} : vector<2x8x128xf32> to vector<2x1x128xf32>
    %70 = vector.shape_cast %69 : vector<2x1x128xf32> to vector<2x128xf32>
    %c6 = arith.constant 6 : index
    %c0_40 = arith.constant 0 : index
    %c0_41 = arith.constant 0 : index
    %71 = vector.load %arg17[%c6, %c0_40, %c0_41] : memref<8x2x128xf32, #tpu.memory_space<vmem>>, vector<1x2x128xf32>
    %72 = vector.shape_cast %71 : vector<1x2x128xf32> to vector<2x128xf32>
    %73 = vector.shape_cast %70 : vector<2x128xf32> to vector<1x2x128xf32>
    tpu.vector_store %arg17[%c6, %c0_40, %c0_41], %73 {strides = array<i32>} : memref<8x2x128xf32, #tpu.memory_space<vmem>>, vector<1x2x128xf32>,
    %74 = vector.extract_strided_slice %38 {offsets = [0, 7, 0], sizes = [2, 1, 128], strides = [1, 1, 1]} : vector<2x8x128xf32> to vector<2x1x128xf32>
    %75 = vector.shape_cast %74 : vector<2x1x128xf32> to vector<2x128xf32>
    %c7 = arith.constant 7 : index
    %c0_42 = arith.constant 0 : index
    %c0_43 = arith.constant 0 : index
    %76 = vector.load %arg17[%c7, %c0_42, %c0_43] : memref<8x2x128xf32, #tpu.memory_space<vmem>>, vector<1x2x128xf32>
    %77 = vector.shape_cast %76 : vector<1x2x128xf32> to vector<2x128xf32>
    %78 = vector.shape_cast %75 : vector<2x128xf32> to vector<1x2x128xf32>
    tpu.vector_store %arg17[%c7, %c0_42, %c0_43], %78 {strides = array<i32>} : memref<8x2x128xf32, #tpu.memory_space<vmem>>, vector<1x2x128xf32>,
    %c0_44 = arith.constant 0 : index
    %c0_45 = arith.constant 0 : index
    %79 = vector.load %arg1[%c0_44, %c0_45] : memref<2x1xf32, #tpu.memory_space<vmem>>, vector<2x1xf32>
    %cst_46 = arith.constant 1.000000e+00 : f32
    %80 = vector.broadcast %cst_46 : f32 to vector<2x1xf32>
    %81 = arith.subf %80, %79 : vector<2x1xf32>
    %c0_47 = arith.constant 0 : index
    %c0_48 = arith.constant 0 : index
    %82 = vector.load %arg2[%c0_47, %c0_48] : memref<2x32xf32, #tpu.memory_space<vmem>>, vector<2x32xf32>
    %83 = vector.broadcast %81 : vector<2x1xf32> to vector<2x32xf32>
    %84 = arith.mulf %82, %83 : vector<2x32xf32>
    %c0_49 = arith.constant 0 : index
    %c0_50 = arith.constant 0 : index
    %85 = vector.load %arg3[%c0_49, %c0_50] : memref<2x32xf32, #tpu.memory_space<vmem>>, vector<2x32xf32>
    %86 = vector.broadcast %81 : vector<2x1xf32> to vector<2x32xf32>
    %87 = arith.mulf %85, %86 : vector<2x32xf32>
    %c0_i32 = arith.constant 0 : i32
    %88 = arith.index_cast %c0_i32 : i32 to index
    %c0_51 = arith.constant 0 : index
    %c0_52 = arith.constant 0 : index
    %89 = vector.load %arg17[%88, %c0_51, %c0_52] : memref<8x2x128xf32, #tpu.memory_space<vmem>>, vector<1x2x128xf32>
    %90 = vector.shape_cast %89 : vector<1x2x128xf32> to vector<2x128xf32>
    %91 = arith.truncf %84 : vector<2x32xf32> to vector<2x32xbf16>
    %cst_53 = arith.constant dense<0.000000e+00> : vector<2x128xf32>
    %92 = tpu.matmul %91, %5, %cst_53 {dimension_numbers = #tpu.dot_dimension_numbers<[1], [0], [0], [1], [0, 0, 1, 1], [], []>} : vector<2x32xbf16>, vector<32x128xbf16>, vector<2x128xf32> -> vector<2x128xf32>
    %93 = arith.addf %90, %92 : vector<2x128xf32>
    %94 = vector.extract_strided_slice %93 {offsets = [0, 0], sizes = [2, 32], strides = [1, 1]} : vector<2x128xf32> to vector<2x32xf32>
    %cst_54 = arith.constant 5.000000e-01 : f32
    %95 = vector.broadcast %cst_54 : f32 to vector<2x32xf32>
    %96 = arith.mulf %95, %94 : vector<2x32xf32>
    %97 = math.tanh %96 : vector<2x32xf32>
    %cst_55 = arith.constant 5.000000e-01 : f32
    %98 = vector.broadcast %cst_55 : f32 to vector<2x32xf32>
    %99 = arith.mulf %98, %97 : vector<2x32xf32>
    %cst_56 = arith.constant 5.000000e-01 : f32
    %100 = vector.broadcast %cst_56 : f32 to vector<2x32xf32>
    %101 = arith.addf %99, %100 : vector<2x32xf32>
    %102 = vector.extract_strided_slice %93 {offsets = [0, 32], sizes = [2, 32], strides = [1, 1]} : vector<2x128xf32> to vector<2x32xf32>
    %cst_57 = arith.constant 5.000000e-01 : f32
    %103 = vector.broadcast %cst_57 : f32 to vector<2x32xf32>
    %104 = arith.mulf %103, %102 : vector<2x32xf32>
    %105 = math.tanh %104 : vector<2x32xf32>
    %cst_58 = arith.constant 5.000000e-01 : f32
    %106 = vector.broadcast %cst_58 : f32 to vector<2x32xf32>
    %107 = arith.mulf %106, %105 : vector<2x32xf32>
    %cst_59 = arith.constant 5.000000e-01 : f32
    %108 = vector.broadcast %cst_59 : f32 to vector<2x32xf32>
    %109 = arith.addf %107, %108 : vector<2x32xf32>
    %110 = vector.extract_strided_slice %93 {offsets = [0, 64], sizes = [2, 32], strides = [1, 1]} : vector<2x128xf32> to vector<2x32xf32>
    %111 = math.tanh %110 : vector<2x32xf32>
    %112 = vector.extract_strided_slice %93 {offsets = [0, 96], sizes = [2, 32], strides = [1, 1]} : vector<2x128xf32> to vector<2x32xf32>
    %cst_60 = arith.constant 5.000000e-01 : f32
    %113 = vector.broadcast %cst_60 : f32 to vector<2x32xf32>
    %114 = arith.mulf %113, %112 : vector<2x32xf32>
    %115 = math.tanh %114 : vector<2x32xf32>
    %cst_61 = arith.constant 5.000000e-01 : f32
    %116 = vector.broadcast %cst_61 : f32 to vector<2x32xf32>
    %117 = arith.mulf %116, %115 : vector<2x32xf32>
    %cst_62 = arith.constant 5.000000e-01 : f32
    %118 = vector.broadcast %cst_62 : f32 to vector<2x32xf32>
    %119 = arith.addf %117, %118 : vector<2x32xf32>
    %120 = arith.mulf %109, %87 : vector<2x32xf32>
    %121 = arith.mulf %101, %111 : vector<2x32xf32>
    %122 = arith.addf %120, %121 : vector<2x32xf32>
    %123 = math.tanh %122 : vector<2x32xf32>
    %124 = arith.mulf %119, %123 : vector<2x32xf32>
    %125 = arith.index_cast %c0_i32 : i32 to index
    %c0_63 = arith.constant 0 : index
    %c0_64 = arith.constant 0 : index
    %126 = vector.load %arg18[%125, %c0_63, %c0_64] : memref<8x2x32xf32, #tpu.memory_space<vmem>>, vector<1x2x32xf32>
    %127 = vector.shape_cast %126 : vector<1x2x32xf32> to vector<2x32xf32>
    %128 = vector.shape_cast %124 : vector<2x32xf32> to vector<1x2x32xf32>
    tpu.vector_store %arg18[%125, %c0_63, %c0_64], %128 {strides = array<i32>} : memref<8x2x32xf32, #tpu.memory_space<vmem>>, vector<1x2x32xf32>,
    %c1_i32 = arith.constant 1 : i32
    %129 = arith.index_cast %c1_i32 : i32 to index
    %c0_65 = arith.constant 0 : index
    %c0_66 = arith.constant 0 : index
    %130 = vector.load %arg17[%129, %c0_65, %c0_66] : memref<8x2x128xf32, #tpu.memory_space<vmem>>, vector<1x2x128xf32>
    %131 = vector.shape_cast %130 : vector<1x2x128xf32> to vector<2x128xf32>
    %132 = arith.truncf %124 : vector<2x32xf32> to vector<2x32xbf16>
    %cst_67 = arith.constant dense<0.000000e+00> : vector<2x128xf32>
    %133 = tpu.matmul %132, %5, %cst_67 {dimension_numbers = #tpu.dot_dimension_numbers<[1], [0], [0], [1], [0, 0, 1, 1], [], []>} : vector<2x32xbf16>, vector<32x128xbf16>, vector<2x128xf32> -> vector<2x128xf32>
    %134 = arith.addf %131, %133 : vector<2x128xf32>
    %135 = vector.extract_strided_slice %134 {offsets = [0, 0], sizes = [2, 32], strides = [1, 1]} : vector<2x128xf32> to vector<2x32xf32>
    %cst_68 = arith.constant 5.000000e-01 : f32
    %136 = vector.broadcast %cst_68 : f32 to vector<2x32xf32>
    %137 = arith.mulf %136, %135 : vector<2x32xf32>
    %138 = math.tanh %137 : vector<2x32xf32>
    %cst_69 = arith.constant 5.000000e-01 : f32
    %139 = vector.broadcast %cst_69 : f32 to vector<2x32xf32>
    %140 = arith.mulf %139, %138 : vector<2x32xf32>
    %cst_70 = arith.constant 5.000000e-01 : f32
    %141 = vector.broadcast %cst_70 : f32 to vector<2x32xf32>
    %142 = arith.addf %140, %141 : vector<2x32xf32>
    %143 = vector.extract_strided_slice %134 {offsets = [0, 32], sizes = [2, 32], strides = [1, 1]} : vector<2x128xf32> to vector<2x32xf32>
    %cst_71 = arith.constant 5.000000e-01 : f32
    %144 = vector.broadcast %cst_71 : f32 to vector<2x32xf32>
    %145 = arith.mulf %144, %143 : vector<2x32xf32>
    %146 = math.tanh %145 : vector<2x32xf32>
    %cst_72 = arith.constant 5.000000e-01 : f32
    %147 = vector.broadcast %cst_72 : f32 to vector<2x32xf32>
    %148 = arith.mulf %147, %146 : vector<2x32xf32>
    %cst_73 = arith.constant 5.000000e-01 : f32
    %149 = vector.broadcast %cst_73 : f32 to vector<2x32xf32>
    %150 = arith.addf %148, %149 : vector<2x32xf32>
    %151 = vector.extract_strided_slice %134 {offsets = [0, 64], sizes = [2, 32], strides = [1, 1]} : vector<2x128xf32> to vector<2x32xf32>
    %152 = math.tanh %151 : vector<2x32xf32>
    %153 = vector.extract_strided_slice %134 {offsets = [0, 96], sizes = [2, 32], strides = [1, 1]} : vector<2x128xf32> to vector<2x32xf32>
    %cst_74 = arith.constant 5.000000e-01 : f32
    %154 = vector.broadcast %cst_74 : f32 to vector<2x32xf32>
    %155 = arith.mulf %154, %153 : vector<2x32xf32>
    %156 = math.tanh %155 : vector<2x32xf32>
    %cst_75 = arith.constant 5.000000e-01 : f32
    %157 = vector.broadcast %cst_75 : f32 to vector<2x32xf32>
    %158 = arith.mulf %157, %156 : vector<2x32xf32>
    %cst_76 = arith.constant 5.000000e-01 : f32
    %159 = vector.broadcast %cst_76 : f32 to vector<2x32xf32>
    %160 = arith.addf %158, %159 : vector<2x32xf32>
    %161 = arith.mulf %150, %122 : vector<2x32xf32>
    %162 = arith.mulf %142, %152 : vector<2x32xf32>
    %163 = arith.addf %161, %162 : vector<2x32xf32>
    %164 = math.tanh %163 : vector<2x32xf32>
    %165 = arith.mulf %160, %164 : vector<2x32xf32>
    %166 = arith.index_cast %c1_i32 : i32 to index
    %c0_77 = arith.constant 0 : index
    %c0_78 = arith.constant 0 : index
    %167 = vector.load %arg18[%166, %c0_77, %c0_78] : memref<8x2x32xf32, #tpu.memory_space<vmem>>, vector<1x2x32xf32>
    %168 = vector.shape_cast %167 : vector<1x2x32xf32> to vector<2x32xf32>
    %169 = vector.shape_cast %165 : vector<2x32xf32> to vector<1x2x32xf32>
    tpu.vector_store %arg18[%166, %c0_77, %c0_78], %169 {strides = array<i32>} : memref<8x2x32xf32, #tpu.memory_space<vmem>>, vector<1x2x32xf32>,
    %c2_i32 = arith.constant 2 : i32
    %170 = arith.index_cast %c2_i32 : i32 to index
    %c0_79 = arith.constant 0 : index
    %c0_80 = arith.constant 0 : index
    %171 = vector.load %arg17[%170, %c0_79, %c0_80] : memref<8x2x128xf32, #tpu.memory_space<vmem>>, vector<1x2x128xf32>
    %172 = vector.shape_cast %171 : vector<1x2x128xf32> to vector<2x128xf32>
    %173 = arith.truncf %165 : vector<2x32xf32> to vector<2x32xbf16>
    %cst_81 = arith.constant dense<0.000000e+00> : vector<2x128xf32>
    %174 = tpu.matmul %173, %5, %cst_81 {dimension_numbers = #tpu.dot_dimension_numbers<[1], [0], [0], [1], [0, 0, 1, 1], [], []>} : vector<2x32xbf16>, vector<32x128xbf16>, vector<2x128xf32> -> vector<2x128xf32>
    %175 = arith.addf %172, %174 : vector<2x128xf32>
    %176 = vector.extract_strided_slice %175 {offsets = [0, 0], sizes = [2, 32], strides = [1, 1]} : vector<2x128xf32> to vector<2x32xf32>
    %cst_82 = arith.constant 5.000000e-01 : f32
    %177 = vector.broadcast %cst_82 : f32 to vector<2x32xf32>
    %178 = arith.mulf %177, %176 : vector<2x32xf32>
    %179 = math.tanh %178 : vector<2x32xf32>
    %cst_83 = arith.constant 5.000000e-01 : f32
    %180 = vector.broadcast %cst_83 : f32 to vector<2x32xf32>
    %181 = arith.mulf %180, %179 : vector<2x32xf32>
    %cst_84 = arith.constant 5.000000e-01 : f32
    %182 = vector.broadcast %cst_84 : f32 to vector<2x32xf32>
    %183 = arith.addf %181, %182 : vector<2x32xf32>
    %184 = vector.extract_strided_slice %175 {offsets = [0, 32], sizes = [2, 32], strides = [1, 1]} : vector<2x128xf32> to vector<2x32xf32>
    %cst_85 = arith.constant 5.000000e-01 : f32
    %185 = vector.broadcast %cst_85 : f32 to vector<2x32xf32>
    %186 = arith.mulf %185, %184 : vector<2x32xf32>
    %187 = math.tanh %186 : vector<2x32xf32>
    %cst_86 = arith.constant 5.000000e-01 : f32
    %188 = vector.broadcast %cst_86 : f32 to vector<2x32xf32>
    %189 = arith.mulf %188, %187 : vector<2x32xf32>
    %cst_87 = arith.constant 5.000000e-01 : f32
    %190 = vector.broadcast %cst_87 : f32 to vector<2x32xf32>
    %191 = arith.addf %189, %190 : vector<2x32xf32>
    %192 = vector.extract_strided_slice %175 {offsets = [0, 64], sizes = [2, 32], strides = [1, 1]} : vector<2x128xf32> to vector<2x32xf32>
    %193 = math.tanh %192 : vector<2x32xf32>
    %194 = vector.extract_strided_slice %175 {offsets = [0, 96], sizes = [2, 32], strides = [1, 1]} : vector<2x128xf32> to vector<2x32xf32>
    %cst_88 = arith.constant 5.000000e-01 : f32
    %195 = vector.broadcast %cst_88 : f32 to vector<2x32xf32>
    %196 = arith.mulf %195, %194 : vector<2x32xf32>
    %197 = math.tanh %196 : vector<2x32xf32>
    %cst_89 = arith.constant 5.000000e-01 : f32
    %198 = vector.broadcast %cst_89 : f32 to vector<2x32xf32>
    %199 = arith.mulf %198, %197 : vector<2x32xf32>
    %cst_90 = arith.constant 5.000000e-01 : f32
    %200 = vector.broadcast %cst_90 : f32 to vector<2x32xf32>
    %201 = arith.addf %199, %200 : vector<2x32xf32>
    %202 = arith.mulf %191, %163 : vector<2x32xf32>
    %203 = arith.mulf %183, %193 : vector<2x32xf32>
    %204 = arith.addf %202, %203 : vector<2x32xf32>
    %205 = math.tanh %204 : vector<2x32xf32>
    %206 = arith.mulf %201, %205 : vector<2x32xf32>
    %207 = arith.index_cast %c2_i32 : i32 to index
    %c0_91 = arith.constant 0 : index
    %c0_92 = arith.constant 0 : index
    %208 = vector.load %arg18[%207, %c0_91, %c0_92] : memref<8x2x32xf32, #tpu.memory_space<vmem>>, vector<1x2x32xf32>
    %209 = vector.shape_cast %208 : vector<1x2x32xf32> to vector<2x32xf32>
    %210 = vector.shape_cast %206 : vector<2x32xf32> to vector<1x2x32xf32>
    tpu.vector_store %arg18[%207, %c0_91, %c0_92], %210 {strides = array<i32>} : memref<8x2x32xf32, #tpu.memory_space<vmem>>, vector<1x2x32xf32>,
    %c3_i32 = arith.constant 3 : i32
    %211 = arith.index_cast %c3_i32 : i32 to index
    %c0_93 = arith.constant 0 : index
    %c0_94 = arith.constant 0 : index
    %212 = vector.load %arg17[%211, %c0_93, %c0_94] : memref<8x2x128xf32, #tpu.memory_space<vmem>>, vector<1x2x128xf32>
    %213 = vector.shape_cast %212 : vector<1x2x128xf32> to vector<2x128xf32>
    %214 = arith.truncf %206 : vector<2x32xf32> to vector<2x32xbf16>
    %cst_95 = arith.constant dense<0.000000e+00> : vector<2x128xf32>
    %215 = tpu.matmul %214, %5, %cst_95 {dimension_numbers = #tpu.dot_dimension_numbers<[1], [0], [0], [1], [0, 0, 1, 1], [], []>} : vector<2x32xbf16>, vector<32x128xbf16>, vector<2x128xf32> -> vector<2x128xf32>
    %216 = arith.addf %213, %215 : vector<2x128xf32>
    %217 = vector.extract_strided_slice %216 {offsets = [0, 0], sizes = [2, 32], strides = [1, 1]} : vector<2x128xf32> to vector<2x32xf32>
    %cst_96 = arith.constant 5.000000e-01 : f32
    %218 = vector.broadcast %cst_96 : f32 to vector<2x32xf32>
    %219 = arith.mulf %218, %217 : vector<2x32xf32>
    %220 = math.tanh %219 : vector<2x32xf32>
    %cst_97 = arith.constant 5.000000e-01 : f32
    %221 = vector.broadcast %cst_97 : f32 to vector<2x32xf32>
    %222 = arith.mulf %221, %220 : vector<2x32xf32>
    %cst_98 = arith.constant 5.000000e-01 : f32
    %223 = vector.broadcast %cst_98 : f32 to vector<2x32xf32>
    %224 = arith.addf %222, %223 : vector<2x32xf32>
    %225 = vector.extract_strided_slice %216 {offsets = [0, 32], sizes = [2, 32], strides = [1, 1]} : vector<2x128xf32> to vector<2x32xf32>
    %cst_99 = arith.constant 5.000000e-01 : f32
    %226 = vector.broadcast %cst_99 : f32 to vector<2x32xf32>
    %227 = arith.mulf %226, %225 : vector<2x32xf32>
    %228 = math.tanh %227 : vector<2x32xf32>
    %cst_100 = arith.constant 5.000000e-01 : f32
    %229 = vector.broadcast %cst_100 : f32 to vector<2x32xf32>
    %230 = arith.mulf %229, %228 : vector<2x32xf32>
    %cst_101 = arith.constant 5.000000e-01 : f32
    %231 = vector.broadcast %cst_101 : f32 to vector<2x32xf32>
    %232 = arith.addf %230, %231 : vector<2x32xf32>
    %233 = vector.extract_strided_slice %216 {offsets = [0, 64], sizes = [2, 32], strides = [1, 1]} : vector<2x128xf32> to vector<2x32xf32>
    %234 = math.tanh %233 : vector<2x32xf32>
    %235 = vector.extract_strided_slice %216 {offsets = [0, 96], sizes = [2, 32], strides = [1, 1]} : vector<2x128xf32> to vector<2x32xf32>
    %cst_102 = arith.constant 5.000000e-01 : f32
    %236 = vector.broadcast %cst_102 : f32 to vector<2x32xf32>
    %237 = arith.mulf %236, %235 : vector<2x32xf32>
    %238 = math.tanh %237 : vector<2x32xf32>
    %cst_103 = arith.constant 5.000000e-01 : f32
    %239 = vector.broadcast %cst_103 : f32 to vector<2x32xf32>
    %240 = arith.mulf %239, %238 : vector<2x32xf32>
    %cst_104 = arith.constant 5.000000e-01 : f32
    %241 = vector.broadcast %cst_104 : f32 to vector<2x32xf32>
    %242 = arith.addf %240, %241 : vector<2x32xf32>
    %243 = arith.mulf %232, %204 : vector<2x32xf32>
    %244 = arith.mulf %224, %234 : vector<2x32xf32>
    %245 = arith.addf %243, %244 : vector<2x32xf32>
    %246 = math.tanh %245 : vector<2x32xf32>
    %247 = arith.mulf %242, %246 : vector<2x32xf32>
    %248 = arith.index_cast %c3_i32 : i32 to index
    %c0_105 = arith.constant 0 : index
    %c0_106 = arith.constant 0 : index
    %249 = vector.load %arg18[%248, %c0_105, %c0_106] : memref<8x2x32xf32, #tpu.memory_space<vmem>>, vector<1x2x32xf32>
    %250 = vector.shape_cast %249 : vector<1x2x32xf32> to vector<2x32xf32>
    %251 = vector.shape_cast %247 : vector<2x32xf32> to vector<1x2x32xf32>
    tpu.vector_store %arg18[%248, %c0_105, %c0_106], %251 {strides = array<i32>} : memref<8x2x32xf32, #tpu.memory_space<vmem>>, vector<1x2x32xf32>,
    %c4_i32 = arith.constant 4 : i32
    %252 = arith.index_cast %c4_i32 : i32 to index
    %c0_107 = arith.constant 0 : index
    %c0_108 = arith.constant 0 : index
    %253 = vector.load %arg17[%252, %c0_107, %c0_108] : memref<8x2x128xf32, #tpu.memory_space<vmem>>, vector<1x2x128xf32>
    %254 = vector.shape_cast %253 : vector<1x2x128xf32> to vector<2x128xf32>
    %255 = arith.truncf %247 : vector<2x32xf32> to vector<2x32xbf16>
    %cst_109 = arith.constant dense<0.000000e+00> : vector<2x128xf32>
    %256 = tpu.matmul %255, %5, %cst_109 {dimension_numbers = #tpu.dot_dimension_numbers<[1], [0], [0], [1], [0, 0, 1, 1], [], []>} : vector<2x32xbf16>, vector<32x128xbf16>, vector<2x128xf32> -> vector<2x128xf32>
    %257 = arith.addf %254, %256 : vector<2x128xf32>
    %258 = vector.extract_strided_slice %257 {offsets = [0, 0], sizes = [2, 32], strides = [1, 1]} : vector<2x128xf32> to vector<2x32xf32>
    %cst_110 = arith.constant 5.000000e-01 : f32
    %259 = vector.broadcast %cst_110 : f32 to vector<2x32xf32>
    %260 = arith.mulf %259, %258 : vector<2x32xf32>
    %261 = math.tanh %260 : vector<2x32xf32>
    %cst_111 = arith.constant 5.000000e-01 : f32
    %262 = vector.broadcast %cst_111 : f32 to vector<2x32xf32>
    %263 = arith.mulf %262, %261 : vector<2x32xf32>
    %cst_112 = arith.constant 5.000000e-01 : f32
    %264 = vector.broadcast %cst_112 : f32 to vector<2x32xf32>
    %265 = arith.addf %263, %264 : vector<2x32xf32>
    %266 = vector.extract_strided_slice %257 {offsets = [0, 32], sizes = [2, 32], strides = [1, 1]} : vector<2x128xf32> to vector<2x32xf32>
    %cst_113 = arith.constant 5.000000e-01 : f32
    %267 = vector.broadcast %cst_113 : f32 to vector<2x32xf32>
    %268 = arith.mulf %267, %266 : vector<2x32xf32>
    %269 = math.tanh %268 : vector<2x32xf32>
    %cst_114 = arith.constant 5.000000e-01 : f32
    %270 = vector.broadcast %cst_114 : f32 to vector<2x32xf32>
    %271 = arith.mulf %270, %269 : vector<2x32xf32>
    %cst_115 = arith.constant 5.000000e-01 : f32
    %272 = vector.broadcast %cst_115 : f32 to vector<2x32xf32>
    %273 = arith.addf %271, %272 : vector<2x32xf32>
    %274 = vector.extract_strided_slice %257 {offsets = [0, 64], sizes = [2, 32], strides = [1, 1]} : vector<2x128xf32> to vector<2x32xf32>
    %275 = math.tanh %274 : vector<2x32xf32>
    %276 = vector.extract_strided_slice %257 {offsets = [0, 96], sizes = [2, 32], strides = [1, 1]} : vector<2x128xf32> to vector<2x32xf32>
    %cst_116 = arith.constant 5.000000e-01 : f32
    %277 = vector.broadcast %cst_116 : f32 to vector<2x32xf32>
    %278 = arith.mulf %277, %276 : vector<2x32xf32>
    %279 = math.tanh %278 : vector<2x32xf32>
    %cst_117 = arith.constant 5.000000e-01 : f32
    %280 = vector.broadcast %cst_117 : f32 to vector<2x32xf32>
    %281 = arith.mulf %280, %279 : vector<2x32xf32>
    %cst_118 = arith.constant 5.000000e-01 : f32
    %282 = vector.broadcast %cst_118 : f32 to vector<2x32xf32>
    %283 = arith.addf %281, %282 : vector<2x32xf32>
    %284 = arith.mulf %273, %245 : vector<2x32xf32>
    %285 = arith.mulf %265, %275 : vector<2x32xf32>
    %286 = arith.addf %284, %285 : vector<2x32xf32>
    %287 = math.tanh %286 : vector<2x32xf32>
    %288 = arith.mulf %283, %287 : vector<2x32xf32>
    %289 = arith.index_cast %c4_i32 : i32 to index
    %c0_119 = arith.constant 0 : index
    %c0_120 = arith.constant 0 : index
    %290 = vector.load %arg18[%289, %c0_119, %c0_120] : memref<8x2x32xf32, #tpu.memory_space<vmem>>, vector<1x2x32xf32>
    %291 = vector.shape_cast %290 : vector<1x2x32xf32> to vector<2x32xf32>
    %292 = vector.shape_cast %288 : vector<2x32xf32> to vector<1x2x32xf32>
    tpu.vector_store %arg18[%289, %c0_119, %c0_120], %292 {strides = array<i32>} : memref<8x2x32xf32, #tpu.memory_space<vmem>>, vector<1x2x32xf32>,
    %c5_i32 = arith.constant 5 : i32
    %293 = arith.index_cast %c5_i32 : i32 to index
    %c0_121 = arith.constant 0 : index
    %c0_122 = arith.constant 0 : index
    %294 = vector.load %arg17[%293, %c0_121, %c0_122] : memref<8x2x128xf32, #tpu.memory_space<vmem>>, vector<1x2x128xf32>
    %295 = vector.shape_cast %294 : vector<1x2x128xf32> to vector<2x128xf32>
    %296 = arith.truncf %288 : vector<2x32xf32> to vector<2x32xbf16>
    %cst_123 = arith.constant dense<0.000000e+00> : vector<2x128xf32>
    %297 = tpu.matmul %296, %5, %cst_123 {dimension_numbers = #tpu.dot_dimension_numbers<[1], [0], [0], [1], [0, 0, 1, 1], [], []>} : vector<2x32xbf16>, vector<32x128xbf16>, vector<2x128xf32> -> vector<2x128xf32>
    %298 = arith.addf %295, %297 : vector<2x128xf32>
    %299 = vector.extract_strided_slice %298 {offsets = [0, 0], sizes = [2, 32], strides = [1, 1]} : vector<2x128xf32> to vector<2x32xf32>
    %cst_124 = arith.constant 5.000000e-01 : f32
    %300 = vector.broadcast %cst_124 : f32 to vector<2x32xf32>
    %301 = arith.mulf %300, %299 : vector<2x32xf32>
    %302 = math.tanh %301 : vector<2x32xf32>
    %cst_125 = arith.constant 5.000000e-01 : f32
    %303 = vector.broadcast %cst_125 : f32 to vector<2x32xf32>
    %304 = arith.mulf %303, %302 : vector<2x32xf32>
    %cst_126 = arith.constant 5.000000e-01 : f32
    %305 = vector.broadcast %cst_126 : f32 to vector<2x32xf32>
    %306 = arith.addf %304, %305 : vector<2x32xf32>
    %307 = vector.extract_strided_slice %298 {offsets = [0, 32], sizes = [2, 32], strides = [1, 1]} : vector<2x128xf32> to vector<2x32xf32>
    %cst_127 = arith.constant 5.000000e-01 : f32
    %308 = vector.broadcast %cst_127 : f32 to vector<2x32xf32>
    %309 = arith.mulf %308, %307 : vector<2x32xf32>
    %310 = math.tanh %309 : vector<2x32xf32>
    %cst_128 = arith.constant 5.000000e-01 : f32
    %311 = vector.broadcast %cst_128 : f32 to vector<2x32xf32>
    %312 = arith.mulf %311, %310 : vector<2x32xf32>
    %cst_129 = arith.constant 5.000000e-01 : f32
    %313 = vector.broadcast %cst_129 : f32 to vector<2x32xf32>
    %314 = arith.addf %312, %313 : vector<2x32xf32>
    %315 = vector.extract_strided_slice %298 {offsets = [0, 64], sizes = [2, 32], strides = [1, 1]} : vector<2x128xf32> to vector<2x32xf32>
    %316 = math.tanh %315 : vector<2x32xf32>
    %317 = vector.extract_strided_slice %298 {offsets = [0, 96], sizes = [2, 32], strides = [1, 1]} : vector<2x128xf32> to vector<2x32xf32>
    %cst_130 = arith.constant 5.000000e-01 : f32
    %318 = vector.broadcast %cst_130 : f32 to vector<2x32xf32>
    %319 = arith.mulf %318, %317 : vector<2x32xf32>
    %320 = math.tanh %319 : vector<2x32xf32>
    %cst_131 = arith.constant 5.000000e-01 : f32
    %321 = vector.broadcast %cst_131 : f32 to vector<2x32xf32>
    %322 = arith.mulf %321, %320 : vector<2x32xf32>
    %cst_132 = arith.constant 5.000000e-01 : f32
    %323 = vector.broadcast %cst_132 : f32 to vector<2x32xf32>
    %324 = arith.addf %322, %323 : vector<2x32xf32>
    %325 = arith.mulf %314, %286 : vector<2x32xf32>
    %326 = arith.mulf %306, %316 : vector<2x32xf32>
    %327 = arith.addf %325, %326 : vector<2x32xf32>
    %328 = math.tanh %327 : vector<2x32xf32>
    %329 = arith.mulf %324, %328 : vector<2x32xf32>
    %330 = arith.index_cast %c5_i32 : i32 to index
    %c0_133 = arith.constant 0 : index
    %c0_134 = arith.constant 0 : index
    %331 = vector.load %arg18[%330, %c0_133, %c0_134] : memref<8x2x32xf32, #tpu.memory_space<vmem>>, vector<1x2x32xf32>
    %332 = vector.shape_cast %331 : vector<1x2x32xf32> to vector<2x32xf32>
    %333 = vector.shape_cast %329 : vector<2x32xf32> to vector<1x2x32xf32>
    tpu.vector_store %arg18[%330, %c0_133, %c0_134], %333 {strides = array<i32>} : memref<8x2x32xf32, #tpu.memory_space<vmem>>, vector<1x2x32xf32>,
    %c6_i32 = arith.constant 6 : i32
    %334 = arith.index_cast %c6_i32 : i32 to index
    %c0_135 = arith.constant 0 : index
    %c0_136 = arith.constant 0 : index
    %335 = vector.load %arg17[%334, %c0_135, %c0_136] : memref<8x2x128xf32, #tpu.memory_space<vmem>>, vector<1x2x128xf32>
    %336 = vector.shape_cast %335 : vector<1x2x128xf32> to vector<2x128xf32>
    %337 = arith.truncf %329 : vector<2x32xf32> to vector<2x32xbf16>
    %cst_137 = arith.constant dense<0.000000e+00> : vector<2x128xf32>
    %338 = tpu.matmul %337, %5, %cst_137 {dimension_numbers = #tpu.dot_dimension_numbers<[1], [0], [0], [1], [0, 0, 1, 1], [], []>} : vector<2x32xbf16>, vector<32x128xbf16>, vector<2x128xf32> -> vector<2x128xf32>
    %339 = arith.addf %336, %338 : vector<2x128xf32>
    %340 = vector.extract_strided_slice %339 {offsets = [0, 0], sizes = [2, 32], strides = [1, 1]} : vector<2x128xf32> to vector<2x32xf32>
    %cst_138 = arith.constant 5.000000e-01 : f32
    %341 = vector.broadcast %cst_138 : f32 to vector<2x32xf32>
    %342 = arith.mulf %341, %340 : vector<2x32xf32>
    %343 = math.tanh %342 : vector<2x32xf32>
    %cst_139 = arith.constant 5.000000e-01 : f32
    %344 = vector.broadcast %cst_139 : f32 to vector<2x32xf32>
    %345 = arith.mulf %344, %343 : vector<2x32xf32>
    %cst_140 = arith.constant 5.000000e-01 : f32
    %346 = vector.broadcast %cst_140 : f32 to vector<2x32xf32>
    %347 = arith.addf %345, %346 : vector<2x32xf32>
    %348 = vector.extract_strided_slice %339 {offsets = [0, 32], sizes = [2, 32], strides = [1, 1]} : vector<2x128xf32> to vector<2x32xf32>
    %cst_141 = arith.constant 5.000000e-01 : f32
    %349 = vector.broadcast %cst_141 : f32 to vector<2x32xf32>
    %350 = arith.mulf %349, %348 : vector<2x32xf32>
    %351 = math.tanh %350 : vector<2x32xf32>
    %cst_142 = arith.constant 5.000000e-01 : f32
    %352 = vector.broadcast %cst_142 : f32 to vector<2x32xf32>
    %353 = arith.mulf %352, %351 : vector<2x32xf32>
    %cst_143 = arith.constant 5.000000e-01 : f32
    %354 = vector.broadcast %cst_143 : f32 to vector<2x32xf32>
    %355 = arith.addf %353, %354 : vector<2x32xf32>
    %356 = vector.extract_strided_slice %339 {offsets = [0, 64], sizes = [2, 32], strides = [1, 1]} : vector<2x128xf32> to vector<2x32xf32>
    %357 = math.tanh %356 : vector<2x32xf32>
    %358 = vector.extract_strided_slice %339 {offsets = [0, 96], sizes = [2, 32], strides = [1, 1]} : vector<2x128xf32> to vector<2x32xf32>
    %cst_144 = arith.constant 5.000000e-01 : f32
    %359 = vector.broadcast %cst_144 : f32 to vector<2x32xf32>
    %360 = arith.mulf %359, %358 : vector<2x32xf32>
    %361 = math.tanh %360 : vector<2x32xf32>
    %cst_145 = arith.constant 5.000000e-01 : f32
    %362 = vector.broadcast %cst_145 : f32 to vector<2x32xf32>
    %363 = arith.mulf %362, %361 : vector<2x32xf32>
    %cst_146 = arith.constant 5.000000e-01 : f32
    %364 = vector.broadcast %cst_146 : f32 to vector<2x32xf32>
    %365 = arith.addf %363, %364 : vector<2x32xf32>
    %366 = arith.mulf %355, %327 : vector<2x32xf32>
    %367 = arith.mulf %347, %357 : vector<2x32xf32>
    %368 = arith.addf %366, %367 : vector<2x32xf32>
    %369 = math.tanh %368 : vector<2x32xf32>
    %370 = arith.mulf %365, %369 : vector<2x32xf32>
    %371 = arith.index_cast %c6_i32 : i32 to index
    %c0_147 = arith.constant 0 : index
    %c0_148 = arith.constant 0 : index
    %372 = vector.load %arg18[%371, %c0_147, %c0_148] : memref<8x2x32xf32, #tpu.memory_space<vmem>>, vector<1x2x32xf32>
    %373 = vector.shape_cast %372 : vector<1x2x32xf32> to vector<2x32xf32>
    %374 = vector.shape_cast %370 : vector<2x32xf32> to vector<1x2x32xf32>
    tpu.vector_store %arg18[%371, %c0_147, %c0_148], %374 {strides = array<i32>} : memref<8x2x32xf32, #tpu.memory_space<vmem>>, vector<1x2x32xf32>,
    %c7_i32 = arith.constant 7 : i32
    %375 = arith.index_cast %c7_i32 : i32 to index
    %c0_149 = arith.constant 0 : index
    %c0_150 = arith.constant 0 : index
    %376 = vector.load %arg17[%375, %c0_149, %c0_150] : memref<8x2x128xf32, #tpu.memory_space<vmem>>, vector<1x2x128xf32>
    %377 = vector.shape_cast %376 : vector<1x2x128xf32> to vector<2x128xf32>
    %378 = arith.truncf %370 : vector<2x32xf32> to vector<2x32xbf16>
    %cst_151 = arith.constant dense<0.000000e+00> : vector<2x128xf32>
    %379 = tpu.matmul %378, %5, %cst_151 {dimension_numbers = #tpu.dot_dimension_numbers<[1], [0], [0], [1], [0, 0, 1, 1], [], []>} : vector<2x32xbf16>, vector<32x128xbf16>, vector<2x128xf32> -> vector<2x128xf32>
    %380 = arith.addf %377, %379 : vector<2x128xf32>
    %381 = vector.extract_strided_slice %380 {offsets = [0, 0], sizes = [2, 32], strides = [1, 1]} : vector<2x128xf32> to vector<2x32xf32>
    %cst_152 = arith.constant 5.000000e-01 : f32
    %382 = vector.broadcast %cst_152 : f32 to vector<2x32xf32>
    %383 = arith.mulf %382, %381 : vector<2x32xf32>
    %384 = math.tanh %383 : vector<2x32xf32>
    %cst_153 = arith.constant 5.000000e-01 : f32
    %385 = vector.broadcast %cst_153 : f32 to vector<2x32xf32>
    %386 = arith.mulf %385, %384 : vector<2x32xf32>
    %cst_154 = arith.constant 5.000000e-01 : f32
    %387 = vector.broadcast %cst_154 : f32 to vector<2x32xf32>
    %388 = arith.addf %386, %387 : vector<2x32xf32>
    %389 = vector.extract_strided_slice %380 {offsets = [0, 32], sizes = [2, 32], strides = [1, 1]} : vector<2x128xf32> to vector<2x32xf32>
    %cst_155 = arith.constant 5.000000e-01 : f32
    %390 = vector.broadcast %cst_155 : f32 to vector<2x32xf32>
    %391 = arith.mulf %390, %389 : vector<2x32xf32>
    %392 = math.tanh %391 : vector<2x32xf32>
    %cst_156 = arith.constant 5.000000e-01 : f32
    %393 = vector.broadcast %cst_156 : f32 to vector<2x32xf32>
    %394 = arith.mulf %393, %392 : vector<2x32xf32>
    %cst_157 = arith.constant 5.000000e-01 : f32
    %395 = vector.broadcast %cst_157 : f32 to vector<2x32xf32>
    %396 = arith.addf %394, %395 : vector<2x32xf32>
    %397 = vector.extract_strided_slice %380 {offsets = [0, 64], sizes = [2, 32], strides = [1, 1]} : vector<2x128xf32> to vector<2x32xf32>
    %398 = math.tanh %397 : vector<2x32xf32>
    %399 = vector.extract_strided_slice %380 {offsets = [0, 96], sizes = [2, 32], strides = [1, 1]} : vector<2x128xf32> to vector<2x32xf32>
    %cst_158 = arith.constant 5.000000e-01 : f32
    %400 = vector.broadcast %cst_158 : f32 to vector<2x32xf32>
    %401 = arith.mulf %400, %399 : vector<2x32xf32>
    %402 = math.tanh %401 : vector<2x32xf32>
    %cst_159 = arith.constant 5.000000e-01 : f32
    %403 = vector.broadcast %cst_159 : f32 to vector<2x32xf32>
    %404 = arith.mulf %403, %402 : vector<2x32xf32>
    %cst_160 = arith.constant 5.000000e-01 : f32
    %405 = vector.broadcast %cst_160 : f32 to vector<2x32xf32>
    %406 = arith.addf %404, %405 : vector<2x32xf32>
    %407 = arith.mulf %396, %368 : vector<2x32xf32>
    %408 = arith.mulf %388, %398 : vector<2x32xf32>
    %409 = arith.addf %407, %408 : vector<2x32xf32>
    %410 = math.tanh %409 : vector<2x32xf32>
    %411 = arith.mulf %406, %410 : vector<2x32xf32>
    %412 = arith.index_cast %c7_i32 : i32 to index
    %c0_161 = arith.constant 0 : index
    %c0_162 = arith.constant 0 : index
    %413 = vector.load %arg18[%412, %c0_161, %c0_162] : memref<8x2x32xf32, #tpu.memory_space<vmem>>, vector<1x2x32xf32>
    %414 = vector.shape_cast %413 : vector<1x2x32xf32> to vector<2x32xf32>
    %415 = vector.shape_cast %411 : vector<2x32xf32> to vector<1x2x32xf32>
    tpu.vector_store %arg18[%412, %c0_161, %c0_162], %415 {strides = array<i32>} : memref<8x2x32xf32, #tpu.memory_space<vmem>>, vector<1x2x32xf32>,
    %c8_i32 = arith.constant 8 : i32
    %c0_163 = arith.constant 0 : index
    %c0_164 = arith.constant 0 : index
    %416 = vector.load %arg15[%c0_163, %c0_164] : memref<2x32xf32, #tpu.memory_space<vmem>>, vector<2x32xf32>
    tpu.vector_store %arg15[%c0_163, %c0_164], %411 {strides = array<i32>} : memref<2x32xf32, #tpu.memory_space<vmem>>, vector<2x32xf32>,
    %c0_165 = arith.constant 0 : index
    %c0_166 = arith.constant 0 : index
    %417 = vector.load %arg16[%c0_165, %c0_166] : memref<2x32xf32, #tpu.memory_space<vmem>>, vector<2x32xf32>
    tpu.vector_store %arg16[%c0_165, %c0_166], %409 {strides = array<i32>} : memref<2x32xf32, #tpu.memory_space<vmem>>, vector<2x32xf32>,
    %c0_167 = arith.constant 0 : index
    %c0_168 = arith.constant 0 : index
    %c0_169 = arith.constant 0 : index
    %418 = vector.load %arg18[%c0_167, %c0_168, %c0_169] : memref<8x2x32xf32, #tpu.memory_space<vmem>>, vector<1x2x32xf32>
    %419 = vector.shape_cast %418 : vector<1x2x32xf32> to vector<2x32xf32>
    %c1_170 = arith.constant 1 : index
    %c0_171 = arith.constant 0 : index
    %c0_172 = arith.constant 0 : index
    %420 = vector.load %arg18[%c1_170, %c0_171, %c0_172] : memref<8x2x32xf32, #tpu.memory_space<vmem>>, vector<1x2x32xf32>
    %421 = vector.shape_cast %420 : vector<1x2x32xf32> to vector<2x32xf32>
    %c2_173 = arith.constant 2 : index
    %c0_174 = arith.constant 0 : index
    %c0_175 = arith.constant 0 : index
    %422 = vector.load %arg18[%c2_173, %c0_174, %c0_175] : memref<8x2x32xf32, #tpu.memory_space<vmem>>, vector<1x2x32xf32>
    %423 = vector.shape_cast %422 : vector<1x2x32xf32> to vector<2x32xf32>
    %c3_176 = arith.constant 3 : index
    %c0_177 = arith.constant 0 : index
    %c0_178 = arith.constant 0 : index
    %424 = vector.load %arg18[%c3_176, %c0_177, %c0_178] : memref<8x2x32xf32, #tpu.memory_space<vmem>>, vector<1x2x32xf32>
    %425 = vector.shape_cast %424 : vector<1x2x32xf32> to vector<2x32xf32>
    %c4_179 = arith.constant 4 : index
    %c0_180 = arith.constant 0 : index
    %c0_181 = arith.constant 0 : index
    %426 = vector.load %arg18[%c4_179, %c0_180, %c0_181] : memref<8x2x32xf32, #tpu.memory_space<vmem>>, vector<1x2x32xf32>
    %427 = vector.shape_cast %426 : vector<1x2x32xf32> to vector<2x32xf32>
    %c5_182 = arith.constant 5 : index
    %c0_183 = arith.constant 0 : index
    %c0_184 = arith.constant 0 : index
    %428 = vector.load %arg18[%c5_182, %c0_183, %c0_184] : memref<8x2x32xf32, #tpu.memory_space<vmem>>, vector<1x2x32xf32>
    %429 = vector.shape_cast %428 : vector<1x2x32xf32> to vector<2x32xf32>
    %c6_185 = arith.constant 6 : index
    %c0_186 = arith.constant 0 : index
    %c0_187 = arith.constant 0 : index
    %430 = vector.load %arg18[%c6_185, %c0_186, %c0_187] : memref<8x2x32xf32, #tpu.memory_space<vmem>>, vector<1x2x32xf32>
    %431 = vector.shape_cast %430 : vector<1x2x32xf32> to vector<2x32xf32>
    %c7_188 = arith.constant 7 : index
    %c0_189 = arith.constant 0 : index
    %c0_190 = arith.constant 0 : index
    %432 = vector.load %arg18[%c7_188, %c0_189, %c0_190] : memref<8x2x32xf32, #tpu.memory_space<vmem>>, vector<1x2x32xf32>
    %433 = vector.shape_cast %432 : vector<1x2x32xf32> to vector<2x32xf32>
    %434 = vector.shape_cast %419 : vector<2x32xf32> to vector<2x1x32xf32>
    %435 = vector.shape_cast %421 : vector<2x32xf32> to vector<2x1x32xf32>
    %436 = vector.shape_cast %423 : vector<2x32xf32> to vector<2x1x32xf32>
    %437 = vector.shape_cast %425 : vector<2x32xf32> to vector<2x1x32xf32>
    %438 = vector.shape_cast %427 : vector<2x32xf32> to vector<2x1x32xf32>
    %439 = vector.shape_cast %429 : vector<2x32xf32> to vector<2x1x32xf32>
    %440 = vector.shape_cast %431 : vector<2x32xf32> to vector<2x1x32xf32>
    %441 = vector.shape_cast %433 : vector<2x32xf32> to vector<2x1x32xf32>
    %442 = tpu.concatenate %434, %435, %436, %437, %438, %439, %440, %441 in 1 : vector<2x1x32xf32>, vector<2x1x32xf32>, vector<2x1x32xf32>, vector<2x1x32xf32>, vector<2x1x32xf32>, vector<2x1x32xf32>, vector<2x1x32xf32>, vector<2x1x32xf32> -> vector<2x8x32xf32>
    %443 = arith.addf %442, %10 : vector<2x8x32xf32>
    %444 = vector.shape_cast %443 : vector<2x8x32xf32> to vector<16x32xf32>
    %cst_191 = arith.constant dense<0.000000e+00> : vector<16xf32>
    %445 = vector.multi_reduction <add>, %444, %cst_191 [1] : vector<16x32xf32> to vector<16xf32>
    %446 = vector.shape_cast %445 : vector<16xf32> to vector<16x1xf32>
    %cst_192 = arith.constant 3.200000e+01 : f32
    %447 = vector.broadcast %cst_192 : f32 to vector<16x1xf32>
    %448 = arith.divf %446, %447 : vector<16x1xf32>
    %449 = vector.broadcast %448 : vector<16x1xf32> to vector<16x32xf32>
    %450 = arith.subf %444, %449 : vector<16x32xf32>
    %451 = arith.mulf %450, %450 : vector<16x32xf32>
    %cst_193 = arith.constant dense<0.000000e+00> : vector<16xf32>
    %452 = vector.multi_reduction <add>, %451, %cst_193 [1] : vector<16x32xf32> to vector<16xf32>
    %453 = vector.shape_cast %452 : vector<16xf32> to vector<16x1xf32>
    %cst_194 = arith.constant 3.200000e+01 : f32
    %454 = vector.broadcast %cst_194 : f32 to vector<16x1xf32>
    %455 = arith.divf %453, %454 : vector<16x1xf32>
    %456 = vector.broadcast %448 : vector<16x1xf32> to vector<16x32xf32>
    %457 = arith.subf %444, %456 : vector<16x32xf32>
    %cst_195 = arith.constant 9.99999974E-6 : f32
    %458 = vector.broadcast %cst_195 : f32 to vector<16x1xf32>
    %459 = arith.addf %455, %458 : vector<16x1xf32>
    %460 = math.rsqrt %459 : vector<16x1xf32>
    %461 = vector.broadcast %460 : vector<16x1xf32> to vector<16x32xf32>
    %462 = arith.mulf %457, %461 : vector<16x32xf32>
    %463 = vector.broadcast %2 : vector<1x32xf32> to vector<16x32xf32>
    %464 = arith.mulf %462, %463 : vector<16x32xf32>
    %465 = vector.broadcast %3 : vector<1x32xf32> to vector<16x32xf32>
    %466 = arith.addf %464, %465 : vector<16x32xf32>
    %467 = arith.truncf %466 : vector<16x32xf32> to vector<16x32xbf16>
    %cst_196 = arith.constant dense<0.000000e+00> : vector<16x128xf32>
    %468 = tpu.matmul %467, %7, %cst_196 {dimension_numbers = #tpu.dot_dimension_numbers<[1], [0], [0], [1], [0, 0, 1, 1], [], []>} : vector<16x32xbf16>, vector<32x128xbf16>, vector<16x128xf32> -> vector<16x128xf32>
    %cst_197 = arith.constant 0.000000e+00 : f32
    %469 = vector.broadcast %cst_197 : f32 to vector<16x128xf32>
    %470 = arith.maximumf %468, %469 : vector<16x128xf32>
    %471 = arith.truncf %470 : vector<16x128xf32> to vector<16x128xbf16>
    %cst_198 = arith.constant dense<0.000000e+00> : vector<16x32xf32>
    %472 = tpu.matmul %471, %8, %cst_198 {dimension_numbers = #tpu.dot_dimension_numbers<[1], [0], [0], [1], [0, 0, 1, 1], [], []>} : vector<16x128xbf16>, vector<128x32xbf16>, vector<16x32xf32> -> vector<16x32xf32>
    %473 = vector.broadcast %9 : vector<1x32xf32> to vector<16x32xf32>
    %474 = arith.addf %472, %473 : vector<16x32xf32>
    %475 = arith.addf %474, %444 : vector<16x32xf32>
    %476 = vector.shape_cast %475 : vector<16x32xf32> to vector<2x8x32xf32>
    %c0_199 = arith.constant 0 : index
    %c0_200 = arith.constant 0 : index
    %c0_201 = arith.constant 0 : index
    %477 = vector.load %arg14[%c0_199, %c0_200, %c0_201] : memref<2x8x32xf32, #tpu.memory_space<vmem>>, vector<2x8x32xf32>
    tpu.vector_store %arg14[%c0_199, %c0_200, %c0_201], %476 {strides = array<i32>} : memref<2x8x32xf32, #tpu.memory_space<vmem>>, vector<2x8x32xf32>,
    return
  }
}

</mosaic_0001>

<bundles_post_ra>
// kernel: residual_recurrent_blocks.3
= control target key start
LH: loop header
LB: loop body
LE: loop exit
PB: predicated region body
PF: predicated region fallthrough
CT: control target
= control target key end

     0   :  { %s2140_s0 = inlined_call_operand.vmem [shape: f32[2,8,32], index: 0, kind: input, shape index: {}]   ;;  %s2141_s1 = inlined_call_operand.vmem [shape: f32[2,1], index: 1, kind: input, shape index: {}]   ;;  %s2142_s2 = inlined_call_operand.vmem [shape: f32[2,32], index: 2, kind: input, shape index: {}]   ;;  %s2143_s3 = inlined_call_operand.vmem [shape: f32[2,32], index: 3, kind: input, shape index: {}]   ;;  %s2144_s4 = inlined_call_operand.vmem [shape: f32[1,32], index: 4, kind: input, shape index: {}]   ;;  %s2145_s5 = inlined_call_operand.vmem [shape: f32[1,32], index: 5, kind: input, shape index: {}]   ;;  %s2146_s6 = inlined_call_operand.vmem [shape: bf16[32,128], index: 6, kind: input, shape index: {}]   ;;  %s2147_s7 = inlined_call_operand.vmem [shape: bf16[32,128], index: 7, kind: input, shape index: {}]   ;;  %s2148_s8 = inlined_call_operand.vmem [shape: f32[1,128], index: 8, kind: input, shape index: {}]   ;;  %s2149_s9 = inlined_call_operand.vmem [shape: f32[1,32], index: 9, kind: input, shape index: {}]   ;;  %s2150_s10 = inlined_call_operand.vmem [shape: f32[1,32], index: 10, kind: input, shape index: {}]   ;;  %s2151_s11 = inlined_call_operand.vmem [shape: bf16[32,128], index: 11, kind: input, shape index: {}]   ;;  %s2152_s12 = inlined_call_operand.vmem [shape: bf16[128,32], index: 12, kind: input, shape index: {}]   ;;  %s2153_s13 = inlined_call_operand.vmem [shape: f32[1,32], index: 13, kind: input, shape index: {}]   ;;  %s2154_s14 = inlined_call_operand.hbm [shape: f32[2,8,32], index: 14, kind: output, shape index: {0}]   ;;  %s2155_s15 = inlined_call_operand.hbm [shape: f32[2,32], index: 15, kind: output, shape index: {1}]   ;;  %s2156_s16 = inlined_call_operand.hbm [shape: f32[2,32], index: 16, kind: output, shape index: {2}]  }
   0x1   :  { %2158 = sst [smem:[#allocation11_spill]] %s2140_s0 }
   0x2   :  { %22 = vsyncpa [#allocation5], 0  ;;  %s2159_s23 = sld [smem:[#allocation11_spill]]  ;;  %vm89_vm0 = vcmask 261120  }
   0x8   :  { %v1839_v0 = vld [vmem:[%s2159_s23] sm:$0xff]  ;;  %v1844_v1 = vld [vmem:[%s2159_s23 + $0x8] sm:$0xff] }
   0x9   :  { %v90_v2 = vsel %vm89_vm0, %v1839_v0, 0.0  ;;  %v93_v3 = vsel %vm89_vm0, %v1844_v1, 0.0 }
   0xa   :  { %91 = vadd.xlane.f32.xlu0 %v90_v2 }
   0xe   :  { %94 = vadd.xlane.f32.xlu0 %v93_v3 }
   0xf   :  { %23 = vsyncpa [#allocation7], 0  ;;  %v238_v4 = vld [vmem:[%s2141_s1] sm:$0x3]  ;;  %v1739_v5 = vmov 0   ;;  %v1605_v17 = vld [vmem:[%s2146_s6 + $0x8] sm:$0xff]  }
  0x10   :  { %1604 = vset.pattern.permute.xlu0 %v1739_v5  ;;  %v239_v6 = vsub.f32 1.0, %v238_v4  ;;  %v1740_v18 = vmov 0.0   ;;  %vm1741_vm1 = vmmov 0   ;;  %v1606_v19 = vld [vmem:[%s2146_s6] sm:$0xff]   ;;  %v1874_v20 = vld [vmem:[%s2147_s7 + $0x8] sm:$0xff]   ;;  %vm199_vm2 = vcmask 1041409  }
  0x11   :  { %1492 = vmatprep.subr.bf16.mxu1 %v1740_v18  ;;  %1496 = vmatprep.mubr.msk.bf16.mxu1 %vm1741_vm1, %v1740_v18  ;;  %v1881_v21 = vld [vmem:[%s2147_s7] sm:$0xff]   ;;  %vm203_vm3 = vcmask 1042434   ;;  %vm208_vm4 = vcmask 1043459   ;;  %vm213_vm5 = vcmask 1044484   ;;  %vm218_vm6 = vcmask 1045509   ;;  %s1742_s24 = smov 64  }
  0x12   :  { %1493 = vmatpush3.bf16.msra.mxu1 %v1605_v17  ;;  %1524 = vmatprep.subr.bf16.mxu0 %v1740_v18  ;;  %v1415_v30 = vld [vmem:[%s2144_s4] ss:$0 sm:$0xff]  ;;  %vm223_vm7 = vcmask 1046534   ;;  %vm228_vm8 = vcmask 1047559   ;;  %s1743_s25 = smov 32   ;;  %vm337_vm9 = vcmask 254976  }
  0x13   :  { %1494 = vmatprep.subr.bf16.mxu1 %v1740_v18  ;;  %1528 = vmatprep.mubr.msk.bf16.mxu0 %vm1741_vm1, %v1740_v18  ;;  %v1416_v34 = vld [vmem:[%s2145_s5] ss:$0 sm:$0xff]  ;;  %vm1148_vm10 = vcmask 1040384   ;;  %vm1151_vm11 = vcmask 1041408   ;;  %vm1154_vm12 = vcmask 1042432   ;;  %vm1157_vm13 = vcmask 1043456  }
  0x14   :  { %1525 = vmatpush3.bf16.msra.mxu0 %v1874_v20  ;;  %v240_v38 = vld [vmem:[%s2142_s2] sm:$0x3]  ;;  %vm1160_vm14 = vcmask 1044480   ;;  %vm1163_vm15 = vcmask 1045504  }
  0x15   :  { %1526 = vmatprep.subr.bf16.mxu0 %v1740_v18  ;;  %v1417_v43 = vld [vmem:[%s2148_s8] ss:$0 sm:$0xff] }
  0x16   :  { %1495 = vmatpush3.bf16.msra.mxu1 %v1606_v19  ;;  %v247_v3 = vld [vmem:[%s2143_s3] sm:$0x3]  ;;  %s1745_s3 = smov 96  }
  0x17   :  { %1500 = vmatprep.subr.bf16.mxu1 %v1740_v18 }
  0x18   :  { %1527 = vmatpush3.bf16.msra.mxu0 %v1881_v21 }
  0x19   :  { %1540 = vmatprep.subr.bf16.mxu0 %v1740_v18 }
  0x24   :  { %243 = vperm.xlu0 %1604, %v239_v6  }
  0x93   :  { %v92_v7 = vpop.xlane.xlu0 %91 }
  0x94   :  { %v97_v8 = vmul.f32 0.03125, %v92_v7 }
  0x96   :  { %v99_v9 = vsub.f32 %v1839_v0, %v97_v8 }
  0x97   :  { %v95_v10 = vpop.xlane.xlu0 %94 }
  0x98   :  { %v98_v11 = vmul.f32 0.03125, %v95_v10  ;;  %v101_v12 = vmul.f32 %v99_v9, %v99_v9 }
  0x9a   :  { %v100_v13 = vsub.f32 %v1844_v1, %v98_v11  ;;  %v103_v14 = vsel %vm89_vm0, %v101_v12, 0.0 }
  0x9b   :  { %104 = vadd.xlane.f32.xlu1 %v103_v14 }
  0x9c   :  { %v102_v15 = vmul.f32 %v100_v13, %v100_v13 }
  0x9e   :  { %v106_v16 = vsel %vm89_vm0, %v102_v15, 0.0 }
  0x9f   :  { %107 = vadd.xlane.f32.xlu1 %v106_v16  ;;  %v244_v39 = vpop.permute.xlu0 %243 }
  0xa0   :  { %v246_v41 = vmul.f32 %v244_v39, %v240_v38  ;;  %v248_v4 = vmul.f32 %v247_v3, %v244_v39 }
  0xa2   :  { %v250_v42 = vpack.c.bf16 %v246_v41, %v246_v41 }
 0x124   :  { %v105_v22 = vpop.xlane.xlu1 %104 }
 0x125   :  { %v109_v23 = vmul.f32 0.03125, %v105_v22 }
 0x127   :  { %v111_v24 = vadd.f32 1e-05, %v109_v23 }
 0x128   :  { %v108_v25 = vpop.xlane.xlu1 %107 }
 0x129   :  { %1619 = vrsqrt.f32 %v111_v24  ;;  %v110_v26 = vmul.f32 0.03125, %v108_v25 }
 0x12b   :  { %v112_v27 = vadd.f32 1e-05, %v110_v26 }
 0x12d   :  { %1621 = vrsqrt.f32 %v112_v27 }
 0x136   :  { %v1620_v28 = vpop.eup %1619 }
 0x137   :  { %v115_v29 = vmul.f32 %v1620_v28, %v99_v9 }
 0x139   :  { %v123_v33 = vmul.f32 %v1415_v30, %v115_v29 }
 0x13a   :  { %v1622_v31 = vpop.eup %1621 }
 0x13b   :  { %v116_v32 = vmul.f32 %v1622_v31, %v100_v13  ;;  %v131_v36 = vadd.f32 %v1416_v34, %v123_v33 }
 0x13d   :  { %v124_v35 = vmul.f32 %v1415_v30, %v116_v32 }
 0x13f   :  { %v132_v37 = vadd.f32 %v1416_v34, %v124_v35 }
 0x141   :  { %v133_v40 = vpack.c.bf16 %v132_v37, %v131_v36 }
 0x143   :  { %1497 = vmatmul.mubr.msk.bf16.vlgmr.msra.gmra.mxu1 %vm89_vm0, %v133_v40 }
 0x144   :  { %1501 = vmatpush3.bf16.msra.mxu1 %v1874_v20  ;;  %1504 = vmatprep.mubr.msk.bf16.mxu1 %vm1741_vm1, %v1740_v18 }
 0x145   :  { %1502 = vmatprep.subr.bf16.mxu1 %v1740_v18 }
 0x148   :  { %1503 = vmatpush3.bf16.msra.mxu1 %v1881_v21 }
 0x149   :  { %1508 = vmatprep.subr.bf16.mxu1 %v1740_v18 }
 0x14b   :  { %1505 = vmatmul.mubr.msk.bf16.vlgmr.msra.gmra.mxu1 %vm89_vm0, %v250_v42 }
 0x14c   :  { %1509 = vmatpush3.bf16.msra.mxu1 %v1874_v20  ;;  %1512 = vmatprep.mubr.msk.bf16.mxu1 %vm1741_vm1, %v1740_v18 }
 0x14d   :  { %1510 = vmatprep.subr.bf16.mxu1 %v1740_v18 }
 0x150   :  { %1511 = vmatpush3.bf16.msra.mxu1 %v1881_v21 }
 0x151   :  { %1516 = vmatprep.subr.bf16.mxu1 %v1740_v18 }
 0x203   :  { %v189_v44 = vpop.f32.mrf.mxu1 }
 0x204   :  { %v190_v45 = vadd.f32 %v1417_v43, %v189_v44 }
 0x205   :  { %v1498_v46 = vpop.f32.mrf.mxu1 }
 0x206   :  { %236 = vst [vmem:[#allocation2 + $0x7] sm:$0x80] %v190_v45 }
 0x207   :  { %v192_v47 = vpop.f32.mrf.mxu1 }
 0x208   :  { %v193_v48 = vadd.f32 %v1417_v43, %v192_v47 }
 0x209   :  { %v1499_v49 = vpop.f32.mrf.mxu1 }
 0x20a   :  { %v198_v50 = vrot.slane %v193_v48, 7 }
 0x20b   :  { %v300_v51 = vpop.f32.mrf.mxu1 }
 0x20c   :  { %v200_v52 = vsel %vm199_vm2, %v198_v50, %v190_v45  ;;  %v204_v53 = vsel %vm203_vm3, %v198_v50, %v190_v45  ;;  %v209_v54 = vsel %vm208_vm4, %v198_v50, %v190_v45  ;;  %v214_v55 = vsel %vm213_vm5, %v198_v50, %v190_v45  ;;  %237 = vst [vmem:[#allocation2 + $0xf] sm:$0x1] %v198_v50 }
 0x20d   :  { %202 = vst [vmem:[#allocation2] sm:$0x3] %v200_v52  ;;  %207 = vst [vmem:[#allocation2 + $0x1] sm:$0x6] %v204_v53  ;;  %v219_v56 = vsel %vm218_vm6, %v198_v50, %v190_v45  ;;  %v224_v57 = vsel %vm223_vm7, %v198_v50, %v190_v45  ;;  %v229_v58 = vsel %vm228_vm8, %v198_v50, %v190_v45  ;;  %v1506_v59 = vpop.f32.mrf.mxu1 }
 0x20e   :  { %212 = vst [vmem:[#allocation2 + $0x2] sm:$0xc] %v209_v54  ;;  %217 = vst [vmem:[#allocation2 + $0x3] sm:$0x18] %v214_v55 }
 0x20f   :  { %222 = vst [vmem:[#allocation2 + $0x4] sm:$0x30] %v219_v56  ;;  %227 = vst [vmem:[#allocation2 + $0x5] sm:$0x60] %v224_v57  ;;  %v303_v60 = vpop.f32.mrf.mxu1 }
 0x210   :  { %232 = vst [vmem:[#allocation2 + $0x6] sm:$0xc0] %v229_v58 }
 0x211   :  { %v1507_v61 = vpop.f32.mrf.mxu1 }
 0x214   :  { %v249_v62 = vld [vmem:[#allocation2] sm:$0x3]  ;;  %v339_v23 = vld [vmem:[#allocation2 + $0x2] sm:$0x3] }
 0x215   :  { %v306_v63 = vadd.f32 %v300_v51, %v249_v62  ;;  %v416_v44 = vld [vmem:[#allocation2 + $0x4] sm:$0x3]  ;;  %v493_v3 = vld [vmem:[#allocation2 + $0x6] sm:$0x3] }
 0x217   :  { %1623 = vtanh.f32 %v306_v63  ;;  %v307_v5 = vmul.f32 0.5, %v306_v63 }
 0x219   :  { %1625 = vtanh.f32 %v307_v5 }
 0x224   :  { %v1624_v2 = vpop.eup %1623 }
 0x225   :  { %318 = vrot.lane.b32.xlu1 %v1624_v2, %s1742_s24 }
 0x226   :  { %v1626_v6 = vpop.eup %1625 }
 0x227   :  { %v309_v7 = vmul.f32 0.5, %v1626_v6 }
 0x229   :  { %313 = vrot.lane.b32.xlu1 %v248_v4, %s1743_s25  ;;  %v310_v8 = vadd.f32 0.5, %v309_v7 }
 0x297   :  { %v319_v9 = vpop.permute.xlu1 %318 }
 0x298   :  { %v321_v10 = vmul.f32 %v319_v9, %v310_v8 }
 0x29a   :  { %323 = vrot.lane.b32.xlu1 %v321_v10, %s1743_s25 }
 0x29b   :  { %v314_v11 = vpop.permute.xlu1 %313 }
 0x29c   :  { %v316_v12 = vmul.f32 %v314_v11, %v310_v8 }
 0x30c   :  { %v324_v13 = vpop.permute.xlu1 %323 }
 0x30d   :  { %v326_v14 = vadd.f32 %v324_v13, %v316_v12 }
 0x30f   :  { %1627 = vtanh.f32 %v326_v14 }
 0x31c   :  { %v1628_v15 = vpop.eup %1627 }
 0x31d   :  { %329 = vrot.lane.b32.xlu1 %v1628_v15, %s1742_s24 }
 0x38f   :  { %v330_v16 = vpop.permute.xlu1 %329 }
 0x390   :  { %v1918_v17 = vmul.f32 %v330_v16, %v310_v8 }
 0x392   :  { %v340_v19 = vpack.c.bf16 %v1918_v17, %v1918_v17 }
 0x394   :  { %342 = vrot.lane.b32.xlu1 %v340_v19, %s1743_s25 }
 0x406   :  { %v343_v22 = vpop.permute.xlu1 %342 }
 0x407   :  { %1513 = vmatmul.mubr.msk.bf16.vlgmr.msra.gmra.mxu1 %vm89_vm0, %v343_v22 }
 0x408   :  { %1517 = vmatpush3.bf16.msra.mxu1 %v1874_v20  ;;  %1520 = vmatprep.mubr.msk.bf16.mxu1 %vm1741_vm1, %v1740_v18 }
 0x409   :  { %1518 = vmatprep.subr.bf16.mxu1 %v1740_v18 }
 0x40c   :  { %1519 = vmatpush3.bf16.msra.mxu1 %v1881_v21 }
 0x40d   :  { %1532 = vmatprep.subr.bf16.mxu1 %v1740_v18 }
 0x4c7   :  { %v381_v24 = vpop.f32.mrf.mxu1 }
 0x4c8   :  { %v387_v25 = vadd.f32 %v381_v24, %v339_v23 }
 0x4c9   :  { %v1514_v26 = vpop.f32.mrf.mxu1 }
 0x4ca   :  { %1629 = vtanh.f32 %v387_v25  ;;  %v388_v30 = vmul.f32 0.5, %v387_v25 }
 0x4cb   :  { %v384_v27 = vpop.f32.mrf.mxu1 }
 0x4cc   :  { %1631 = vtanh.f32 %v388_v30 }
 0x4cd   :  { %v1515_v28 = vpop.f32.mrf.mxu1 }
 0x4ce   :  { %v570_v28 = vld [vmem:[#allocation2 + $0x8] sm:$0x3] }
 0x4d7   :  { %v1630_v29 = vpop.eup %1629 }
 0x4d8   :  { %395 = vrot.lane.b32.xlu1 %v1630_v29, %s1742_s24 }
 0x4d9   :  { %v1632_v31 = vpop.eup %1631 }
 0x4da   :  { %v390_v32 = vmul.f32 0.5, %v1632_v31 }
 0x4dc   :  { %v391_v33 = vadd.f32 0.5, %v390_v32 }
 0x4de   :  { %v393_v36 = vmul.f32 %v391_v33, %v326_v14 }
 0x54a   :  { %v396_v34 = vpop.permute.xlu1 %395 }
 0x54b   :  { %v398_v35 = vmul.f32 %v396_v34, %v391_v33 }
 0x54d   :  { %400 = vrot.lane.b32.xlu1 %v398_v35, %s1743_s25 }
 0x5bf   :  { %v401_v37 = vpop.permute.xlu1 %400 }
 0x5c0   :  { %v403_v38 = vadd.f32 %v401_v37, %v393_v36 }
 0x5c2   :  { %1633 = vtanh.f32 %v403_v38 }
 0x5cf   :  { %v1634_v39 = vpop.eup %1633 }
 0x5d0   :  { %406 = vrot.lane.b32.xlu1 %v1634_v39, %s1742_s24 }
 0x642   :  { %v407_v40 = vpop.permute.xlu1 %406 }
 0x643   :  { %v1933_v41 = vmul.f32 %v407_v40, %v391_v33 }
 0x645   :  { %v417_v42 = vpack.c.bf16 %v1933_v41, %v1933_v41 }
 0x647   :  { %419 = vrot.lane.b32.xlu0 %v417_v42, %s1743_s25 }
 0x6b9   :  { %v420_v43 = vpop.permute.xlu0 %419 }
 0x6ba   :  { %1521 = vmatmul.mubr.msk.bf16.vlgmr.msra.gmra.mxu1 %vm89_vm0, %v420_v43 }
 0x6bb   :  { %1533 = vmatpush3.bf16.msra.mxu1 %v1874_v20  ;;  %1536 = vmatprep.mubr.msk.bf16.mxu1 %vm1741_vm1, %v1740_v18 }
 0x6bc   :  { %1534 = vmatprep.subr.bf16.mxu1 %v1740_v18 }
 0x6bf   :  { %1535 = vmatpush3.bf16.msra.mxu1 %v1881_v21 }
 0x6c0   :  { %1548 = vmatprep.subr.bf16.mxu1 %v1740_v18 }
 0x77a   :  { %v458_v45 = vpop.f32.mrf.mxu1 }
 0x77b   :  { %v464_v46 = vadd.f32 %v458_v45, %v416_v44 }
 0x77c   :  { %v1522_v47 = vpop.f32.mrf.mxu1 }
 0x77d   :  { %1635 = vtanh.f32 %v464_v46  ;;  %v465_v51 = vmul.f32 0.5, %v464_v46 }
 0x77e   :  { %v461_v48 = vpop.f32.mrf.mxu1 }
 0x77f   :  { %1637 = vtanh.f32 %v465_v51 }
 0x780   :  { %v1523_v49 = vpop.f32.mrf.mxu1 }
 0x78a   :  { %v1636_v50 = vpop.eup %1635 }
 0x78b   :  { %472 = vrot.lane.b32.xlu1 %v1636_v50, %s1742_s24  ;;  %v647_v50 = vld [vmem:[#allocation2 + $0xa] sm:$0x3] }
 0x78c   :  { %v1638_v52 = vpop.eup %1637 }
 0x78d   :  { %v467_v53 = vmul.f32 0.5, %v1638_v52 }
 0x78f   :  { %v468_v54 = vadd.f32 0.5, %v467_v53 }
 0x791   :  { %v470_v57 = vmul.f32 %v468_v54, %v403_v38 }
 0x7fd   :  { %v473_v55 = vpop.permute.xlu1 %472 }
 0x7fe   :  { %v475_v56 = vmul.f32 %v473_v55, %v468_v54 }
 0x800   :  { %477 = vrot.lane.b32.xlu0 %v475_v56, %s1743_s25 }
 0x872   :  { %v478_v58 = vpop.permute.xlu0 %477 }
 0x873   :  { %v480_v59 = vadd.f32 %v478_v58, %v470_v57 }
 0x875   :  { %1639 = vtanh.f32 %v480_v59 }
 0x882   :  { %v1640_v60 = vpop.eup %1639 }
 0x883   :  { %483 = vrot.lane.b32.xlu1 %v1640_v60, %s1742_s24 }
 0x8f5   :  { %v484_v61 = vpop.permute.xlu1 %483 }
 0x8f6   :  { %v1948_v62 = vmul.f32 %v484_v61, %v468_v54 }
 0x8f8   :  { %v494_v63 = vpack.c.bf16 %v1948_v62, %v1948_v62 }
 0x8fa   :  { %496 = vrot.lane.b32.xlu0 %v494_v63, %s1743_s25 }
 0x96c   :  { %v497_v2 = vpop.permute.xlu0 %496 }
 0x96d   :  { %1529 = vmatmul.mubr.msk.bf16.vlgmr.msra.gmra.mxu0 %vm89_vm0, %v497_v2 }
 0x96e   :  { %1541 = vmatpush3.bf16.msra.mxu0 %v1874_v20  ;;  %1544 = vmatprep.mubr.msk.bf16.mxu0 %vm1741_vm1, %v1740_v18 }
 0x96f   :  { %1542 = vmatprep.subr.bf16.mxu0 %v1740_v18 }
 0x972   :  { %1543 = vmatpush3.bf16.msra.mxu0 %v1881_v21 }
 0x973   :  { %1556 = vmatprep.subr.bf16.mxu0 %v1740_v18 }
 0xa2d   :  { %v535_v4 = vpop.f32.mrf.mxu0 }
 0xa2e   :  { %v541_v5 = vadd.f32 %v535_v4, %v493_v3 }
 0xa2f   :  { %v1530_v6 = vpop.f32.mrf.mxu0 }
 0xa30   :  { %1641 = vtanh.f32 %v541_v5  ;;  %v542_v10 = vmul.f32 0.5, %v541_v5 }
 0xa31   :  { %v538_v7 = vpop.f32.mrf.mxu0 }
 0xa32   :  { %1643 = vtanh.f32 %v542_v10 }
 0xa33   :  { %v1531_v8 = vpop.f32.mrf.mxu0 }
 0xa34   :  { %v724_v8 = vld [vmem:[#allocation2 + $0xc] sm:$0x3] }
 0xa3d   :  { %v1642_v9 = vpop.eup %1641 }
 0xa3e   :  { %549 = vrot.lane.b32.xlu1 %v1642_v9, %s1742_s24 }
 0xa3f   :  { %v1644_v11 = vpop.eup %1643 }
 0xa40   :  { %v544_v12 = vmul.f32 0.5, %v1644_v11 }
 0xa42   :  { %v545_v13 = vadd.f32 0.5, %v544_v12 }
 0xa44   :  { %v547_v16 = vmul.f32 %v545_v13, %v480_v59 }
 0xab0   :  { %v550_v14 = vpop.permute.xlu1 %549 }
 0xab1   :  { %v552_v15 = vmul.f32 %v550_v14, %v545_v13 }
 0xab3   :  { %554 = vrot.lane.b32.xlu0 %v552_v15, %s1743_s25 }
 0xb25   :  { %v555_v19 = vpop.permute.xlu0 %554 }
 0xb26   :  { %v557_v22 = vadd.f32 %v555_v19, %v547_v16 }
 0xb28   :  { %1645 = vtanh.f32 %v557_v22 }
 0xb35   :  { %v1646_v23 = vpop.eup %1645 }
 0xb36   :  { %560 = vrot.lane.b32.xlu1 %v1646_v23, %s1742_s24 }
 0xba8   :  { %v561_v24 = vpop.permute.xlu1 %560 }
 0xba9   :  { %v1963_v25 = vmul.f32 %v561_v24, %v545_v13 }
 0xbab   :  { %v571_v26 = vpack.c.bf16 %v1963_v25, %v1963_v25 }
 0xbad   :  { %573 = vrot.lane.b32.xlu0 %v571_v26, %s1743_s25 }
 0xc1f   :  { %v574_v27 = vpop.permute.xlu0 %573 }
 0xc20   :  { %1537 = vmatmul.mubr.msk.bf16.vlgmr.msra.gmra.mxu1 %vm89_vm0, %v574_v27 }
 0xc21   :  { %1549 = vmatpush3.bf16.msra.mxu1 %v1874_v20  ;;  %1552 = vmatprep.mubr.msk.bf16.mxu1 %vm1741_vm1, %v1740_v18 }
 0xc22   :  { %1550 = vmatprep.subr.bf16.mxu1 %v1740_v18 }
 0xc25   :  { %1551 = vmatpush3.bf16.msra.mxu1 %v1881_v21 }
 0xc26   :  { %1564 = vmatprep.subr.bf16.mxu1 %v1740_v18 }
 0xce0   :  { %v612_v29 = vpop.f32.mrf.mxu1 }
 0xce1   :  { %v618_v30 = vadd.f32 %v612_v29, %v570_v28 }
 0xce2   :  { %v1538_v31 = vpop.f32.mrf.mxu1 }
 0xce3   :  { %1647 = vtanh.f32 %v618_v30  ;;  %v619_v35 = vmul.f32 0.5, %v618_v30 }
 0xce4   :  { %v615_v32 = vpop.f32.mrf.mxu1 }
 0xce5   :  { %1649 = vtanh.f32 %v619_v35 }
 0xce6   :  { %v1539_v33 = vpop.f32.mrf.mxu1 }
 0xcf0   :  { %v1648_v34 = vpop.eup %1647 }
 0xcf1   :  { %626 = vrot.lane.b32.xlu1 %v1648_v34, %s1742_s24  ;;  %v801_v34 = vld [vmem:[#allocation2 + $0xe] sm:$0x3] }
 0xcf2   :  { %v1650_v36 = vpop.eup %1649 }
 0xcf3   :  { %v621_v37 = vmul.f32 0.5, %v1650_v36 }
 0xcf5   :  { %v622_v38 = vadd.f32 0.5, %v621_v37 }
 0xcf7   :  { %v624_v42 = vmul.f32 %v622_v38, %v557_v22 }
 0xd63   :  { %v627_v39 = vpop.permute.xlu1 %626 }
 0xd64   :  { %v629_v40 = vmul.f32 %v627_v39, %v622_v38 }
 0xd66   :  { %631 = vrot.lane.b32.xlu0 %v629_v40, %s1743_s25 }
 0xdd8   :  { %v632_v43 = vpop.permute.xlu0 %631 }
 0xdd9   :  { %v634_v44 = vadd.f32 %v632_v43, %v624_v42 }
 0xddb   :  { %1651 = vtanh.f32 %v634_v44 }
 0xde8   :  { %v1652_v45 = vpop.eup %1651 }
 0xde9   :  { %637 = vrot.lane.b32.xlu1 %v1652_v45, %s1742_s24 }
 0xe5b   :  { %v638_v46 = vpop.permute.xlu1 %637 }
 0xe5c   :  { %v1978_v47 = vmul.f32 %v638_v46, %v622_v38 }
 0xe5e   :  { %v648_v48 = vpack.c.bf16 %v1978_v47, %v1978_v47 }
 0xe60   :  { %650 = vrot.lane.b32.xlu0 %v648_v48, %s1743_s25 }
 0xed2   :  { %v651_v49 = vpop.permute.xlu0 %650 }
 0xed3   :  { %1545 = vmatmul.mubr.msk.bf16.vlgmr.msra.gmra.mxu0 %vm89_vm0, %v651_v49 }
 0xed4   :  { %1557 = vmatpush3.bf16.msra.mxu0 %v1874_v20  ;;  %1560 = vmatprep.mubr.msk.bf16.mxu0 %vm1741_vm1, %v1740_v18 }
 0xed5   :  { %1558 = vmatprep.subr.bf16.mxu0 %v1740_v18 }
 0xed8   :  { %1559 = vmatpush3.bf16.msra.mxu0 %v1881_v21 }
 0xed9   :  { %1572 = vmatprep.subr.bf16.mxu0 %v1740_v18 }
 0xf93   :  { %v689_v51 = vpop.f32.mrf.mxu0 }
 0xf94   :  { %v695_v52 = vadd.f32 %v689_v51, %v647_v50 }
 0xf95   :  { %v1546_v53 = vpop.f32.mrf.mxu0 }
 0xf96   :  { %1653 = vtanh.f32 %v695_v52  ;;  %v696_v20 = vmul.f32 0.5, %v695_v52 }
 0xf97   :  { %v692_v54 = vpop.f32.mrf.mxu0 }
 0xf98   :  { %1655 = vtanh.f32 %v696_v20 }
 0xf99   :  { %v1547_v55 = vpop.f32.mrf.mxu0 }
 0xfa3   :  { %v1654_v56 = vpop.eup %1653 }
 0xfa4   :  { %703 = vrot.lane.b32.xlu1 %v1654_v56, %s1742_s24 }
 0xfa5   :  { %v1656_v57 = vpop.eup %1655 }
 0xfa6   :  { %v698_v58 = vmul.f32 0.5, %v1656_v57 }
 0xfa8   :  { %v699_v59 = vadd.f32 0.5, %v698_v58 }
 0xfaa   :  { %v701_v21 = vmul.f32 %v699_v59, %v634_v44 }
0x1016   :  { %v704_v60 = vpop.permute.xlu1 %703 }
0x1017   :  { %v706_v61 = vmul.f32 %v704_v60, %v699_v59 }
0x1019   :  { %708 = vrot.lane.b32.xlu0 %v706_v61, %s1743_s25 }
0x108b   :  { %v709_v63 = vpop.permute.xlu0 %708 }
0x108c   :  { %v711_v2 = vadd.f32 %v709_v63, %v701_v21 }
0x108e   :  { %1657 = vtanh.f32 %v711_v2 }
0x109b   :  { %v1658_v3 = vpop.eup %1657 }
0x109c   :  { %714 = vrot.lane.b32.xlu1 %v1658_v3, %s1742_s24 }
0x110e   :  { %v715_v4 = vpop.permute.xlu1 %714 }
0x110f   :  { %v1993_v5 = vmul.f32 %v715_v4, %v699_v59  ;;  %v904_v59 = vlaneseq }
0x1111   :  { %v725_v6 = vpack.c.bf16 %v1993_v5, %v1993_v5  ;;  %v905_v60 = vshrl.u32 %v904_v59, 7 }
0x1113   :  { %727 = vrot.lane.b32.xlu0 %v725_v6, %s1743_s25 }
0x1185   :  { %v728_v7 = vpop.permute.xlu0 %727 }
0x1186   :  { %1553 = vmatmul.mubr.msk.bf16.vlgmr.msra.gmra.mxu1 %vm89_vm0, %v728_v7 }
0x1187   :  { %1568 = vmatprep.mubr.msk.bf16.mxu1 %vm1741_vm1, %v1740_v18 }
0x1246   :  { %v766_v9 = vpop.f32.mrf.mxu1 }
0x1247   :  { %v772_v10 = vadd.f32 %v766_v9, %v724_v8 }
0x1248   :  { %v1554_v11 = vpop.f32.mrf.mxu1 }
0x1249   :  { %1659 = vtanh.f32 %v772_v10  ;;  %v773_v15 = vmul.f32 0.5, %v772_v10  ;;  %v2035_v10 = vsub.s32 0, %v905_v60 }
0x124a   :  { %v769_v12 = vpop.f32.mrf.mxu1 }
0x124b   :  { %1661 = vtanh.f32 %v773_v15 }
0x124c   :  { %v1555_v13 = vpop.f32.mrf.mxu1 }
0x1256   :  { %v1660_v14 = vpop.eup %1659 }
0x1257   :  { %780 = vrot.lane.b32.xlu1 %v1660_v14, %s1742_s24 }
0x1258   :  { %v1662_v16 = vpop.eup %1661 }
0x1259   :  { %v775_v19 = vmul.f32 0.5, %v1662_v16 }
0x125b   :  { %v776_v22 = vadd.f32 0.5, %v775_v19 }
0x125d   :  { %v778_v26 = vmul.f32 %v776_v22, %v711_v2 }
0x12c9   :  { %v781_v23 = vpop.permute.xlu1 %780 }
0x12ca   :  { %v783_v24 = vmul.f32 %v781_v23, %v776_v22 }
0x12cc   :  { %785 = vrot.lane.b32.xlu0 %v783_v24, %s1743_s25 }
0x133e   :  { %v786_v27 = vpop.permute.xlu0 %785 }
0x133f   :  { %v788_v28 = vadd.f32 %v786_v27, %v778_v26 }
0x1341   :  { %1663 = vtanh.f32 %v788_v28 }
0x134e   :  { %v1664_v29 = vpop.eup %1663 }
0x134f   :  { %791 = vrot.lane.b32.xlu1 %v1664_v29, %s1742_s24 }
0x13c1   :  { %v792_v30 = vpop.permute.xlu1 %791 }
0x13c2   :  { %v794_v31 = vmul.f32 %v792_v30, %v776_v22 }
0x13c4   :  { %v802_v32 = vpack.c.bf16 %v794_v31, %v794_v31 }
0x13c6   :  { %804 = vrot.lane.b32.xlu0 %v802_v32, %s1743_s25 }
0x1438   :  { %v805_v33 = vpop.permute.xlu0 %804 }
0x1439   :  { %1561 = vmatmul.mubr.msk.bf16.vlgmr.msra.gmra.mxu0 %vm89_vm0, %v805_v33 }
0x143a   :  { %1588 = vmatprep.mubr.msk.bf16.mxu0 %vm1741_vm1, %v1740_v18  ;;  %vm1166_vm1 = vcmask 1046528  }
0x14f9   :  { %v843_v35 = vpop.f32.mrf.mxu0 }
0x14fa   :  { %v849_v36 = vadd.f32 %v843_v35, %v801_v34 }
0x14fb   :  { %v1562_v37 = vpop.f32.mrf.mxu0 }
0x14fc   :  { %1665 = vtanh.f32 %v849_v36  ;;  %v850_v42 = vmul.f32 0.5, %v849_v36 }
0x14fd   :  { %v846_v38 = vpop.f32.mrf.mxu0 }
0x14fe   :  { %1667 = vtanh.f32 %v850_v42 }
0x14ff   :  { %v1563_v39 = vpop.f32.mrf.mxu0 }
0x1509   :  { %v1666_v40 = vpop.eup %1665 }
0x150a   :  { %857 = vrot.lane.b32.xlu1 %v1666_v40, %s1742_s24 }
0x150b   :  { %v1668_v43 = vpop.eup %1667 }
0x150c   :  { %v852_v44 = vmul.f32 0.5, %v1668_v43 }
0x150e   :  { %v853_v45 = vadd.f32 0.5, %v852_v44 }
0x1510   :  { %v855_v49 = vmul.f32 %v853_v45, %v788_v28 }
0x157c   :  { %v858_v46 = vpop.permute.xlu1 %857 }
0x157d   :  { %v860_v48 = vmul.f32 %v858_v46, %v853_v45 }
0x157f   :  { %862 = vrot.lane.b32.xlu0 %v860_v48, %s1743_s25 }
0x1583   :  { %411 = vrot.lane.b32.xlu0 %v1933_v41, %s1743_s25 }
0x1587   :  { %334 = vrot.lane.b32.xlu0 %v1918_v17, %s1743_s25 }
0x158b   :  { %642 = vrot.lane.b32.xlu0 %v1978_v47, %s1743_s25 }
0x158f   :  { %796 = vrot.lane.b32.xlu0 %v794_v31, %s1743_s25 }
0x15f1   :  { %v863_v50 = vpop.permute.xlu0 %862 }
0x15f2   :  { %v2017_v51 = vadd.f32 %v863_v50, %v855_v49 }
0x15f4   :  { %1669 = vtanh.f32 %v2017_v51 }
0x15f5   :  { %v412_v52 = vpop.permute.xlu0 %411 }
0x15f6   :  { %415 = vst.msk [vmem:[#allocation3 + $0x2] sm:$0x3] %vm337_vm9, %v412_v52 }
0x15f9   :  { %v335_v53 = vpop.permute.xlu0 %334 }
0x15fa   :  { %338 = vst.msk [vmem:[#allocation3] sm:$0x3] %vm337_vm9, %v335_v53 }
0x15fd   :  { %v643_v41 = vpop.permute.xlu0 %642  ;;  %v1432_v61 = vld.sshfl [vmem:[#allocation3 + $0x2] sm:$0x11 pattern:$0x75316420] }
0x15fe   :  { %646 = vst.msk [vmem:[#allocation3 + $0x8] sm:$0x3] %vm337_vm9, %v643_v41 }
0x1601   :  { %v1670_v17 = vpop.eup %1669  ;;  %v797_v47 = vpop.permute.xlu0 %796  ;;  %v1431_v3 = vld.sshfl [vmem:[#allocation3] sm:$0x11 pattern:$0x75316420] }
0x1602   :  { %800 = vst.msk [vmem:[#allocation3 + $0xc] sm:$0x3] %vm337_vm9, %v797_v47  ;;  %868 = vrot.lane.b32.xlu1 %v1670_v17, %s1742_s24  ;;  %v900_v13 = vcombine.high %v1431_v3, %v1431_v3 }
0x1605   :  { %v1435_v11 = vld.sshfl [vmem:[#allocation3 + $0x8] sm:$0x11 pattern:$0x75316420] }
0x1606   :  { %488 = vrot.lane.b32.xlu1 %v1948_v62, %s1743_s25  ;;  %v1744_v62 = vmov 1966171168   ;;  %v994_v27 = vcombine.high %v1435_v11, %v1435_v11 }
0x1607   :  { %v902_v58 = vunpack.c.l.s4 %v1744_v62 }
0x1609   :  { %v1437_v28 = vld.sshfl [vmem:[#allocation3 + $0xc] sm:$0x11 pattern:$0x75316420] }
0x160a   :  { %565 = vrot.lane.b32.xlu1 %v1963_v25, %s1743_s25  ;;  %v903_v25 = vunpack.c.0.s8 %v902_v58  ;;  %v1040_v40 = vcombine.high %v1437_v28, %v1437_v28 }
0x160c   :  { %v906_v2 = vsub.s32 %v903_v25, %v905_v60 }
0x160e   :  { %719 = vrot.lane.b32.xlu1 %v1993_v5, %s1743_s25  ;;  %v925_v5 = vcombine.high %v1432_v61, %v1432_v61  ;;  %v932_v8 = vrot.slane %v1432_v61, %v906_v2  ;;  %v907_v15 = vrot.slane %v1431_v3, %v906_v2  ;;  %v914_v31 = vrot.slane %v900_v13, %v906_v2 }
0x160f   :  { %v1001_v32 = vrot.slane %v1435_v11, %v906_v2  ;;  %v1008_v39 = vrot.slane %v994_v27, %v906_v2  ;;  %v1054_v41 = vrot.slane %v1040_v40, %v906_v2 }
0x1610   :  { %v939_v16 = vrot.slane %v925_v5, %v906_v2  ;;  %v1081_v24 = vrot.slane %v932_v8, %v2035_v10 }
0x1611   :  { %v1111_v46 = vrot.slane %v1001_v32, %v2035_v10  ;;  %v1115_v17 = vrot.slane %v1008_v39, %v2035_v10  ;;  %v1135_v25 = vrot.slane %v1054_v41, %v2035_v10  ;;  %v1440_v39 = vld [vmem:[%s2150_s10] ss:$0 sm:$0xff]  ;;  %s1746_s10 = smov [#allocation6]  }
0x1612   :  { %v1149_v34 = vsel %vm1148_vm10, %v907_v15, %v1081_v24  ;;  %v1085_v36 = vrot.slane %v939_v16, %v2035_v10  ;;  %v1610_v15 = vld [vmem:[%s2151_s11] sm:$0xff]   ;;  %v1611_v16 = vld [vmem:[%s2152_s12 + $0x38] sm:$0xff]  }
0x1613   :  { %1573 = vmatpush3.bf16.msra.mxu0 %v1611_v16  ;;  %v1615_v24 = vld [vmem:[%s2152_s12 + $0x18] sm:$0xff]  }
0x1614   :  { %v1150_v44 = vsel %vm1148_vm10, %v914_v31, %v1085_v36  ;;  %1574 = vmatprep.subr.bf16.mxu0 %v1740_v18 }
0x1674   :  { %v869_v54 = vpop.permute.xlu1 %868 }
0x1675   :  { %v871_v55 = vmul.f32 %v869_v54, %v853_v45  ;;  %v1047_v45 = vrot.slane %v1437_v28, %v906_v2 }
0x1677   :  { %873 = vrot.lane.b32.xlu1 %v871_v55, %s1743_s25 }
0x1678   :  { %v489_v56 = vpop.permute.xlu1 %488 }
0x1679   :  { %492 = vst.msk [vmem:[#allocation3 + $0x4] sm:$0x3] %vm337_vm9, %v489_v56  ;;  %v1131_v56 = vrot.slane %v1047_v45, %v2035_v10  ;;  %v1617_v45 = vld [vmem:[%s2152_s12 + $0x8] sm:$0xff]  }
0x167c   :  { %v566_v20 = vpop.permute.xlu1 %565 }
0x167d   :  { %569 = vst.msk [vmem:[#allocation3 + $0x6] sm:$0x3] %vm337_vm9, %v566_v20 }
0x1680   :  { %v720_v57 = vpop.permute.xlu1 %719  ;;  %v1433_v21 = vld.sshfl [vmem:[#allocation3 + $0x4] sm:$0x11 pattern:$0x75316420] }
0x1681   :  { %723 = vst.msk [vmem:[#allocation3 + $0xa] sm:$0x3] %vm337_vm9, %v720_v57  ;;  %v948_v4 = vcombine.high %v1433_v21, %v1433_v21  ;;  %v955_v9 = vrot.slane %v1433_v21, %v906_v2 }
0x1683   :  { %v962_v14 = vrot.slane %v948_v4, %v906_v2  ;;  %v1091_v26 = vrot.slane %v955_v9, %v2035_v10 }
0x1684   :  { %v1434_v63 = vld.sshfl [vmem:[#allocation3 + $0x6] sm:$0x11 pattern:$0x75316420] }
0x1685   :  { %v971_v6 = vcombine.high %v1434_v63, %v1434_v63  ;;  %v978_v12 = vrot.slane %v1434_v63, %v906_v2  ;;  %v1095_v33 = vrot.slane %v962_v14, %v2035_v10  ;;  %v1152_v38 = vsel %vm1151_vm11, %v1149_v34, %v1091_v26  ;;  %v1616_v26 = vld [vmem:[%s2152_s12 + $0x10] sm:$0xff]  }
0x1687   :  { %v985_v19 = vrot.slane %v971_v6, %v906_v2  ;;  %v1101_v30 = vrot.slane %v978_v12, %v2035_v10  ;;  %v1153_v48 = vsel %vm1151_vm11, %v1150_v44, %v1095_v33 }
0x1688   :  { %v1436_v7 = vld.sshfl [vmem:[#allocation3 + $0xa] sm:$0x11 pattern:$0x75316420] }
0x1689   :  { %v1017_v22 = vcombine.high %v1436_v7, %v1436_v7  ;;  %v1024_v29 = vrot.slane %v1436_v7, %v906_v2  ;;  %v1105_v37 = vrot.slane %v985_v19, %v2035_v10  ;;  %v1155_v43 = vsel %vm1154_vm12, %v1152_v38, %v1101_v30  ;;  %v1612_v19 = vld [vmem:[%s2152_s12 + $0x30] sm:$0xff]  }
0x168a   :  { %v1158_v53 = vsel %vm1157_vm13, %v1155_v43, %v1111_v46  ;;  %1575 = vmatpush3.bf16.msra.mxu0 %v1612_v19  ;;  %v1618_v46 = vld [vmem:[%s2152_s12] sm:$0xff]  }
0x168b   :  { %v1031_v35 = vrot.slane %v1017_v22, %v906_v2  ;;  %v1121_v42 = vrot.slane %v1024_v29, %v2035_v10  ;;  %v1156_v50 = vsel %vm1154_vm12, %v1153_v48, %v1105_v37  ;;  %v1613_v22 = vld [vmem:[%s2152_s12 + $0x28] sm:$0xff]   ;;  %1576 = vmatprep.subr.bf16.mxu0 %v1740_v18 }
0x168c   :  { %v1159_v20 = vsel %vm1157_vm13, %v1156_v50, %v1115_v17 }
0x168d   :  { %v1125_v49 = vrot.slane %v1031_v35, %v2035_v10  ;;  %v1161_v54 = vsel %vm1160_vm14, %v1158_v53, %v1121_v42  ;;  %v1439_v35 = vld [vmem:[%s2149_s9] ss:$0 sm:$0xff] }
0x168e   :  { %v1164_v59 = vsel %vm1163_vm15, %v1161_v54, %v1131_v56  ;;  %1577 = vmatpush3.bf16.msra.mxu0 %v1613_v22 }
0x168f   :  { %v1162_v58 = vsel %vm1160_vm14, %v1159_v20, %v1125_v49  ;;  %1578 = vmatprep.subr.bf16.mxu0 %v1740_v18 }
0x1690   :  { %v1165_v63 = vsel %vm1163_vm15, %v1162_v58, %v1135_v25 }
0x16e9   :  { %v874_v23 = vpop.permute.xlu1 %873 }
0x16ea   :  { %877 = vst.msk [vmem:[#allocation3 + $0xe] sm:$0x3] %vm337_vm9, %v874_v23  ;;  %878 = vst.msk [vmem:[#allocation6] sm:$0x3] %vm337_vm9, %v874_v23  ;;  %v1614_v23 = vld [vmem:[%s2152_s12 + $0x20] sm:$0xff]  }
0x16eb   :  { %1579 = vmatpush3.bf16.msra.mxu0 %v1614_v23 }
0x16ec   :  { %1580 = vmatprep.subr.bf16.mxu0 %v1740_v18 }
0x16ef   :  { %1581 = vmatpush3.bf16.msra.mxu0 %v1615_v24 }
0x16f0   :  { %1582 = vmatprep.subr.bf16.mxu0 %v1740_v18 }
0x16f1   :  { %v1438_v52 = vld.sshfl [vmem:[#allocation3 + $0xe] sm:$0x11 pattern:$0x75316420] }
0x16f2   :  { %v1070_v47 = vrot.slane %v1438_v52, %v906_v2  ;;  %v1063_v55 = vcombine.high %v1438_v52, %v1438_v52 }
0x16f3   :  { %1583 = vmatpush3.bf16.msra.mxu0 %v1616_v26 }
0x16f4   :  { %v1141_v57 = vrot.slane %v1070_v47, %v2035_v10  ;;  %v1077_v62 = vrot.slane %v1063_v55, %v906_v2  ;;  %1584 = vmatprep.subr.bf16.mxu0 %v1740_v18 }
0x16f6   :  { %v1167_v60 = vsel %vm1166_vm1, %v1164_v59, %v1141_v57  ;;  %v1145_v61 = vrot.slane %v1077_v62, %v2035_v10 }
0x16f7   :  { %v2064_v21 = vadd.f32 %v1167_v60, %v1839_v0  ;;  %1585 = vmatpush3.bf16.msra.mxu0 %v1617_v45 }
0x16f8   :  { %v1168_v3 = vsel %vm1166_vm1, %v1165_v63, %v1145_v61  ;;  %1586 = vmatprep.subr.bf16.mxu0 %v1740_v18 }
0x16f9   :  { %v1171_v4 = vsel %vm89_vm0, %v2064_v21, 0.0  ;;  %v2069_v5 = vadd.f32 %v1168_v3, %v1844_v1 }
0x16fa   :  { %1172 = vadd.xlane.f32.xlu0 %v1171_v4 }
0x16fb   :  { %v1174_v2 = vsel %vm89_vm0, %v2069_v5, 0.0  ;;  %1587 = vmatpush3.bf16.msra.mxu0 %v1618_v46 }
0x16fc   :  { %1175 = vadd.xlane.f32.xlu1 %v1174_v2 }
0x170d   :  { %880 = vrot.lane.b32.xlu1 %v2017_v51, %s1745_s3  ;;  %v1609_v51 = vld [vmem:[%s2151_s11 + $0x8] sm:$0xff]   ;;  %s1390_s3 = sshll.u32 %s1746_s10, 4  ;;  %s1391_s3 = int_to_ptr.vmem [resolvable:$true] %s1390_s3 }
0x170e   :  { %1565 = vmatpush3.bf16.msra.mxu1 %v1609_v51  ;;  %s1675_s26 = scalar_lea.vmem %s1391_s3, 32  ;;  %p1680_p1 = scmp.lt.s32.totalorder %s1391_s3, %s1391_s3 }
0x170f   :  { %1566 = vmatprep.subr.bf16.mxu1 %v1740_v18  ;;  %p1676_p0 = scmp.ne.s32.totalorder %s1391_s3, %s1675_s26  ;;  %p1681_p2 = scmp.lt.s32.totalorder %s1675_s26, %s1675_s26 }
0x1711   :  { %p1682_p3 = por %p1681_p2, %p1680_p1 }
0x1712   :  { %1567 = vmatpush3.bf16.msra.mxu1 %v1610_v15 }
0x1713   :  { %p1683_p4 = pnand %p1682_p3, %p1676_p0 }
0x1783   :  { %v1173_v6 = vpop.xlane.xlu0 %1172 }
0x1784   :  { %v1177_v7 = vmul.f32 0.03125, %v1173_v6 }
0x1785   :  { %v1176_v0 = vpop.xlane.xlu1 %1175 }
0x1786   :  { %v1179_v8 = vsub.f32 %v2064_v21, %v1177_v7  ;;  %v1178_v9 = vmul.f32 0.03125, %v1176_v0 }
0x1788   :  { %v1180_v10 = vsub.f32 %v2069_v5, %v1178_v9  ;;  %v1181_v11 = vmul.f32 %v1179_v8, %v1179_v8 }
0x1789   :  { %v881_v12 = vpop.permute.xlu1 %880 }
0x178a   :  { %883 = vst.msk [vmem:[#allocation8] sm:$0x3] %vm337_vm9, %v881_v12  ;;  %v1183_v1 = vsel %vm89_vm0, %v1181_v11, 0.0  ;;  %v1182_v13 = vmul.f32 %v1180_v10, %v1180_v10 }
0x178b   :  { %1184 = vadd.xlane.f32.xlu0 %v1183_v1 }
0x178c   :  { %v1186_v14 = vsel %vm89_vm0, %v1182_v13, 0.0 }
0x178f   :  { %1187 = vadd.xlane.f32.xlu0 %v1186_v14 }
0x1814   :  { %v1185_v27 = vpop.xlane.xlu0 %1184 }
0x1815   :  { %v1189_v28 = vmul.f32 0.03125, %v1185_v27 }
0x1817   :  { %v1191_v29 = vadd.f32 1e-05, %v1189_v28 }
0x1818   :  { %v1188_v30 = vpop.xlane.xlu0 %1187 }
0x1819   :  { %1671 = vrsqrt.f32 %v1191_v29  ;;  %v1190_v31 = vmul.f32 0.03125, %v1188_v30 }
0x181b   :  { %v1192_v32 = vadd.f32 1e-05, %v1190_v31 }
0x181d   :  { %1673 = vrsqrt.f32 %v1192_v32 }
0x1826   :  { %v1672_v33 = vpop.eup %1671 }
0x1827   :  { %v1195_v34 = vmul.f32 %v1672_v33, %v1179_v8 }
0x1829   :  { %v1203_v38 = vmul.f32 %v1439_v35, %v1195_v34 }
0x182a   :  { %v1674_v36 = vpop.eup %1673 }
0x182b   :  { %v1196_v37 = vmul.f32 %v1674_v36, %v1180_v10  ;;  %v1211_v42 = vadd.f32 %v1440_v39, %v1203_v38 }
0x182d   :  { %v1204_v40 = vmul.f32 %v1439_v35, %v1196_v37 }
0x182f   :  { %v1212_v43 = vadd.f32 %v1440_v39, %v1204_v40 }
0x1831   :  { %v1213_v44 = vpack.c.bf16 %v1212_v43, %v1211_v42 }
0x1833   :  { %1569 = vmatmul.mubr.msk.bf16.vlgmr.msra.gmra.mxu1 %vm89_vm0, %v1213_v44 }
0x18f3   :  { %v1263_v48 = vpop.f32.mrf.mxu1 }
0x18f4   :  { %v1270_v52 = vmax.f32 %v1263_v48, 0.0 }
0x18f5   :  { %v1570_v49 = vpop.f32.mrf.mxu1 }
0x18f7   :  { %v1266_v50 = vpop.f32.mrf.mxu1 }
0x18f8   :  { %v1271_v53 = vmax.f32 %v1266_v50, 0.0 }
0x18f9   :  { %v1571_v41 = vpop.f32.mrf.mxu1 }
0x18fa   :  { %v1272_v17 = vpack.c.bf16 %v1271_v53, %v1270_v52 }
0x18fc   :  { %1589 = vmatmul.mubr.bf16.vlgmr.msra.gmra.mxu0 %v1272_v17 }
0x18fd   :  { %1686 = shalt.err (!%p1683_p4)
}
0x18fe   :  { %1393 = dma.vmem_to_hbm [thread:$0]  %s1391_s3, 32, %s2155_s15, [#allocation7]  }
0x18ff   :  { %s1747_s1 = smov [#allocation8]  }
0x1900   :  { %s1400_s28 = sshll.u32 %s1747_s1, 4  ;;  %s1401_s28 = int_to_ptr.vmem [resolvable:$true] %s1400_s28 }
0x1901   :  { %s1695_s29 = scalar_lea.vmem %s1401_s28, 32  ;;  %p1700_p6 = scmp.lt.s32.totalorder %s1401_s28, %s1401_s28 }
0x1902   :  { %p1696_p5 = scmp.ne.s32.totalorder %s1401_s28, %s1695_s29  ;;  %p1701_p7 = scmp.lt.s32.totalorder %s1695_s29, %s1695_s29 }
0x1904   :  { %p1702_p8 = por %p1701_p7, %p1700_p6 }
0x1906   :  { %p1703_p9 = pnand %p1702_p8, %p1696_p5 }
0x1908   :  { %1706 = shalt.err (!%p1703_p9)
}
0x1909   :  { %1403 = dma.vmem_to_hbm [thread:$0]  %s1401_s28, 32, %s2156_s16, [#allocation7]   ;;  %v1444_v18 = vld [vmem:[%s2153_s13] ss:$0 sm:$0xff] }
0x190a   :  { %s1748_s15 = smov [#allocation4]  }
0x190b   :  { %s1377_s18 = sshll.u32 %s1748_s15, 4  ;;  %s1378_s18 = int_to_ptr.vmem [resolvable:$true] %s1377_s18 }
0x190c   :  { %s1715_s16 = scalar_lea.vmem %s1378_s18, 256  ;;  %p1720_p11 = scmp.lt.s32.totalorder %s1378_s18, %s1378_s18 }
0x190d   :  { %p1716_p10 = scmp.ne.s32.totalorder %s1378_s18, %s1715_s16  ;;  %p1721_p12 = scmp.lt.s32.totalorder %s1715_s16, %s1715_s16 }
0x190f   :  { %p1722_p13 = por %p1721_p12, %p1720_p11 }
0x1911   :  { %p1723_p0 = pnand %p1722_p13, %p1716_p10 }
0x19bc   :  { %v1361_v47 = vpop.f32.mrf.mxu0 }
0x19bd   :  { %v1362_v54 = vadd.f32 %v1444_v18, %v1361_v47 }
0x19be   :  { %v1590_v55 = vpop.f32.mrf.mxu0 }
0x19bf   :  { %v1368_v56 = vadd.f32 %v1362_v54, %v2064_v21 }
0x19c0   :  { %v1364_v20 = vpop.f32.mrf.mxu0 }
0x19c1   :  { %1370 = vst.msk [vmem:[#allocation4] sm:$0xff] %vm89_vm0, %v1368_v56  ;;  %v1365_v57 = vadd.f32 %v1444_v18, %v1364_v20 }
0x19c2   :  { %v1591_v62 = vpop.f32.mrf.mxu0 }
0x19c3   :  { %v1369_v58 = vadd.f32 %v1365_v57, %v2069_v5 }
0x19c5   :  { %1371 = vst.msk [vmem:[#allocation4 + $0x8] sm:$0xff] %vm89_vm0, %v1369_v58 }
0x19c6   :  { %1726 = shalt.err (!%p1723_p0)
}
0x19c7   :  { %s1749_s13 = smov 128   ;;  %s1750_s11 = smov 8  }
0x19c8   :  { %1383 = dma.vmem_to_hbm [thread:$0]  %s1378_s18, 256, %s2154_s14, [#allocation5], %s1749_s13, %s1749_s13, %s1750_s11  }
0x19c9   :  { %1735 = dma.done.wait [#allocation5], 256  }
0x19ca   :  { %1736 = vsyncadd [#allocation5], 4294967040 }
0x19cb   :  { %1737 = dma.done.wait [#allocation7], 64  }
0x19cc   :  { %1738 = vsyncadd [#allocation7], 4294967232 }
0x19cd   :  { %1413 = vsyncpa [#allocation5], 1 }
0x19ce   :  { %1414 = vsyncpa [#allocation7], 1 }

// kernel: residual_recurrent_blocks.2
= control target key start
LH: loop header
LB: loop body
LE: loop exit
PB: predicated region body
PF: predicated region fallthrough
CT: control target
= control target key end

     0   :  { %s2106_s0 = inlined_call_operand.vmem [shape: f32[2,8,32], index: 0, kind: input, shape index: {}]   ;;  %s2107_s1 = inlined_call_operand.vmem [shape: f32[2,1], index: 1, kind: input, shape index: {}]   ;;  %s2108_s2 = inlined_call_operand.vmem [shape: f32[2,32], index: 2, kind: input, shape index: {}]   ;;  %s2109_s3 = inlined_call_operand.vmem [shape: f32[2,32], index: 3, kind: input, shape index: {}]   ;;  %s2110_s4 = inlined_call_operand.vmem [shape: f32[1,32], index: 4, kind: input, shape index: {}]   ;;  %s2111_s5 = inlined_call_operand.vmem [shape: f32[1,32], index: 5, kind: input, shape index: {}]   ;;  %s2112_s6 = inlined_call_operand.vmem [shape: bf16[32,128], index: 6, kind: input, shape index: {}]   ;;  %s2113_s7 = inlined_call_operand.vmem [shape: bf16[32,128], index: 7, kind: input, shape index: {}]   ;;  %s2114_s8 = inlined_call_operand.vmem [shape: f32[1,128], index: 8, kind: input, shape index: {}]   ;;  %s2115_s9 = inlined_call_operand.vmem [shape: f32[1,32], index: 9, kind: input, shape index: {}]   ;;  %s2116_s10 = inlined_call_operand.vmem [shape: f32[1,32], index: 10, kind: input, shape index: {}]   ;;  %s2117_s11 = inlined_call_operand.vmem [shape: bf16[32,128], index: 11, kind: input, shape index: {}]   ;;  %s2118_s12 = inlined_call_operand.vmem [shape: bf16[128,32], index: 12, kind: input, shape index: {}]   ;;  %s2119_s13 = inlined_call_operand.vmem [shape: f32[1,32], index: 13, kind: input, shape index: {}]   ;;  %s2120_s14 = inlined_call_operand.vmem [shape: f32[2,8,32], index: 14, kind: output, shape index: {0}]   ;;  %s2121_s15 = inlined_call_operand.hbm [shape: f32[2,32], index: 15, kind: output, shape index: {1}]   ;;  %s2122_s16 = inlined_call_operand.hbm [shape: f32[2,32], index: 16, kind: output, shape index: {2}]  }
   0x1   :  { %2124 = sst [smem:[#allocation10_spill]] %s2106_s0 }
   0x2   :  { %22 = vsyncpa [#allocation5], 0  ;;  %s2125_s23 = sld [smem:[#allocation10_spill]]  ;;  %vm89_vm0 = vcmask 261120  }
   0x8   :  { %v1802_v0 = vld [vmem:[%s2125_s23] sm:$0xff]  ;;  %v1807_v1 = vld [vmem:[%s2125_s23 + $0x8] sm:$0xff] }
   0x9   :  { %v90_v2 = vsel %vm89_vm0, %v1802_v0, 0.0  ;;  %v93_v3 = vsel %vm89_vm0, %v1807_v1, 0.0 }
   0xa   :  { %91 = vadd.xlane.f32.xlu0 %v90_v2 }
   0xe   :  { %94 = vadd.xlane.f32.xlu0 %v93_v3 }
   0xf   :  { %23 = vsyncpa [#allocation7], 0  ;;  %v238_v4 = vld [vmem:[%s2107_s1] sm:$0x3]  ;;  %v1705_v5 = vmov 0   ;;  %v1591_v17 = vld [vmem:[%s2112_s6 + $0x8] sm:$0xff]  }
  0x10   :  { %1590 = vset.pattern.permute.xlu0 %v1705_v5  ;;  %v239_v6 = vsub.f32 1.0, %v238_v4  ;;  %v1706_v18 = vmov 0.0   ;;  %vm1707_vm1 = vmmov 0   ;;  %v1592_v19 = vld [vmem:[%s2112_s6] sm:$0xff]   ;;  %v1837_v20 = vld [vmem:[%s2113_s7 + $0x8] sm:$0xff]   ;;  %vm199_vm2 = vcmask 1041409  }
  0x11   :  { %1481 = vmatprep.subr.bf16.mxu1 %v1706_v18  ;;  %1485 = vmatprep.mubr.msk.bf16.mxu1 %vm1707_vm1, %v1706_v18  ;;  %v1844_v21 = vld [vmem:[%s2113_s7] sm:$0xff]   ;;  %vm203_vm3 = vcmask 1042434   ;;  %vm208_vm4 = vcmask 1043459   ;;  %vm213_vm5 = vcmask 1044484   ;;  %vm218_vm6 = vcmask 1045509   ;;  %s1708_s24 = smov 64  }
  0x12   :  { %1482 = vmatpush3.bf16.msra.mxu1 %v1591_v17  ;;  %1513 = vmatprep.subr.bf16.mxu0 %v1706_v18  ;;  %v1404_v30 = vld [vmem:[%s2110_s4] ss:$0 sm:$0xff]  ;;  %vm223_vm7 = vcmask 1046534   ;;  %vm228_vm8 = vcmask 1047559   ;;  %s1709_s25 = smov 32   ;;  %vm337_vm9 = vcmask 254976  }
  0x13   :  { %1483 = vmatprep.subr.bf16.mxu1 %v1706_v18  ;;  %1517 = vmatprep.mubr.msk.bf16.mxu0 %vm1707_vm1, %v1706_v18  ;;  %v1405_v34 = vld [vmem:[%s2111_s5] ss:$0 sm:$0xff]  ;;  %vm1148_vm10 = vcmask 1040384   ;;  %vm1151_vm11 = vcmask 1041408   ;;  %vm1154_vm12 = vcmask 1042432   ;;  %vm1157_vm13 = vcmask 1043456  }
  0x14   :  { %1514 = vmatpush3.bf16.msra.mxu0 %v1837_v20  ;;  %v240_v38 = vld [vmem:[%s2108_s2] sm:$0x3]  ;;  %vm1160_vm14 = vcmask 1044480   ;;  %vm1163_vm15 = vcmask 1045504   ;;  %s1713_s26 = smov [#allocation6]  }
  0x15   :  { %1515 = vmatprep.subr.bf16.mxu0 %v1706_v18  ;;  %v1406_v43 = vld [vmem:[%s2114_s8] ss:$0 sm:$0xff]  ;;  %s1390_s27 = sshll.u32 %s1713_s26, 4  ;;  %s1391_s27 = int_to_ptr.vmem [resolvable:$true] %s1390_s27 }
  0x16   :  { %1484 = vmatpush3.bf16.msra.mxu1 %v1592_v19  ;;  %v247_v3 = vld [vmem:[%s2109_s3] sm:$0x3]  ;;  %s1711_s3 = smov 96  }
  0x17   :  { %1489 = vmatprep.subr.bf16.mxu1 %v1706_v18 }
  0x18   :  { %1516 = vmatpush3.bf16.msra.mxu0 %v1844_v21 }
  0x19   :  { %1529 = vmatprep.subr.bf16.mxu0 %v1706_v18 }
  0x24   :  { %243 = vperm.xlu0 %1590, %v239_v6  }
  0x93   :  { %v92_v7 = vpop.xlane.xlu0 %91 }
  0x94   :  { %v97_v8 = vmul.f32 0.03125, %v92_v7 }
  0x96   :  { %v99_v9 = vsub.f32 %v1802_v0, %v97_v8 }
  0x97   :  { %v95_v10 = vpop.xlane.xlu0 %94 }
  0x98   :  { %v98_v11 = vmul.f32 0.03125, %v95_v10  ;;  %v101_v12 = vmul.f32 %v99_v9, %v99_v9 }
  0x9a   :  { %v100_v13 = vsub.f32 %v1807_v1, %v98_v11  ;;  %v103_v14 = vsel %vm89_vm0, %v101_v12, 0.0 }
  0x9b   :  { %104 = vadd.xlane.f32.xlu1 %v103_v14 }
  0x9c   :  { %v102_v15 = vmul.f32 %v100_v13, %v100_v13 }
  0x9e   :  { %v106_v16 = vsel %vm89_vm0, %v102_v15, 0.0 }
  0x9f   :  { %107 = vadd.xlane.f32.xlu1 %v106_v16  ;;  %v244_v39 = vpop.permute.xlu0 %243 }
  0xa0   :  { %v246_v41 = vmul.f32 %v244_v39, %v240_v38  ;;  %v248_v4 = vmul.f32 %v247_v3, %v244_v39 }
  0xa2   :  { %v250_v42 = vpack.c.bf16 %v246_v41, %v246_v41 }
 0x124   :  { %v105_v22 = vpop.xlane.xlu1 %104 }
 0x125   :  { %v109_v23 = vmul.f32 0.03125, %v105_v22 }
 0x127   :  { %v111_v24 = vadd.f32 1e-05, %v109_v23 }
 0x128   :  { %v108_v25 = vpop.xlane.xlu1 %107 }
 0x129   :  { %1605 = vrsqrt.f32 %v111_v24  ;;  %v110_v26 = vmul.f32 0.03125, %v108_v25 }
 0x12b   :  { %v112_v27 = vadd.f32 1e-05, %v110_v26 }
 0x12d   :  { %1607 = vrsqrt.f32 %v112_v27 }
 0x136   :  { %v1606_v28 = vpop.eup %1605 }
 0x137   :  { %v115_v29 = vmul.f32 %v1606_v28, %v99_v9 }
 0x139   :  { %v123_v33 = vmul.f32 %v1404_v30, %v115_v29 }
 0x13a   :  { %v1608_v31 = vpop.eup %1607 }
 0x13b   :  { %v116_v32 = vmul.f32 %v1608_v31, %v100_v13  ;;  %v131_v36 = vadd.f32 %v1405_v34, %v123_v33 }
 0x13d   :  { %v124_v35 = vmul.f32 %v1404_v30, %v116_v32 }
 0x13f   :  { %v132_v37 = vadd.f32 %v1405_v34, %v124_v35 }
 0x141   :  { %v133_v40 = vpack.c.bf16 %v132_v37, %v131_v36 }
 0x143   :  { %1486 = vmatmul.mubr.msk.bf16.vlgmr.msra.gmra.mxu1 %vm89_vm0, %v133_v40 }
 0x144   :  { %1490 = vmatpush3.bf16.msra.mxu1 %v1837_v20  ;;  %1493 = vmatprep.mubr.msk.bf16.mxu1 %vm1707_vm1, %v1706_v18 }
 0x145   :  { %1491 = vmatprep.subr.bf16.mxu1 %v1706_v18 }
 0x148   :  { %1492 = vmatpush3.bf16.msra.mxu1 %v1844_v21 }
 0x149   :  { %1497 = vmatprep.subr.bf16.mxu1 %v1706_v18 }
 0x14b   :  { %1494 = vmatmul.mubr.msk.bf16.vlgmr.msra.gmra.mxu1 %vm89_vm0, %v250_v42 }
 0x14c   :  { %1498 = vmatpush3.bf16.msra.mxu1 %v1837_v20  ;;  %1501 = vmatprep.mubr.msk.bf16.mxu1 %vm1707_vm1, %v1706_v18 }
 0x14d   :  { %1499 = vmatprep.subr.bf16.mxu1 %v1706_v18 }
 0x150   :  { %1500 = vmatpush3.bf16.msra.mxu1 %v1844_v21 }
 0x151   :  { %1505 = vmatprep.subr.bf16.mxu1 %v1706_v18 }
 0x203   :  { %v189_v44 = vpop.f32.mrf.mxu1 }
 0x204   :  { %v190_v45 = vadd.f32 %v1406_v43, %v189_v44 }
 0x205   :  { %v1487_v46 = vpop.f32.mrf.mxu1 }
 0x206   :  { %236 = vst [vmem:[#allocation2 + $0x7] sm:$0x80] %v190_v45 }
 0x207   :  { %v192_v47 = vpop.f32.mrf.mxu1 }
 0x208   :  { %v193_v48 = vadd.f32 %v1406_v43, %v192_v47 }
 0x209   :  { %v1488_v49 = vpop.f32.mrf.mxu1 }
 0x20a   :  { %v198_v50 = vrot.slane %v193_v48, 7 }
 0x20b   :  { %v300_v51 = vpop.f32.mrf.mxu1 }
 0x20c   :  { %v200_v52 = vsel %vm199_vm2, %v198_v50, %v190_v45  ;;  %v204_v53 = vsel %vm203_vm3, %v198_v50, %v190_v45  ;;  %v209_v54 = vsel %vm208_vm4, %v198_v50, %v190_v45  ;;  %v214_v55 = vsel %vm213_vm5, %v198_v50, %v190_v45  ;;  %237 = vst [vmem:[#allocation2 + $0xf] sm:$0x1] %v198_v50 }
 0x20d   :  { %202 = vst [vmem:[#allocation2] sm:$0x3] %v200_v52  ;;  %207 = vst [vmem:[#allocation2 + $0x1] sm:$0x6] %v204_v53  ;;  %v219_v56 = vsel %vm218_vm6, %v198_v50, %v190_v45  ;;  %v224_v57 = vsel %vm223_vm7, %v198_v50, %v190_v45  ;;  %v229_v58 = vsel %vm228_vm8, %v198_v50, %v190_v45  ;;  %v1495_v59 = vpop.f32.mrf.mxu1 }
 0x20e   :  { %212 = vst [vmem:[#allocation2 + $0x2] sm:$0xc] %v209_v54  ;;  %217 = vst [vmem:[#allocation2 + $0x3] sm:$0x18] %v214_v55 }
 0x20f   :  { %222 = vst [vmem:[#allocation2 + $0x4] sm:$0x30] %v219_v56  ;;  %227 = vst [vmem:[#allocation2 + $0x5] sm:$0x60] %v224_v57  ;;  %v303_v60 = vpop.f32.mrf.mxu1 }
 0x210   :  { %232 = vst [vmem:[#allocation2 + $0x6] sm:$0xc0] %v229_v58 }
 0x211   :  { %v1496_v61 = vpop.f32.mrf.mxu1 }
 0x214   :  { %v249_v62 = vld [vmem:[#allocation2] sm:$0x3]  ;;  %v339_v23 = vld [vmem:[#allocation2 + $0x2] sm:$0x3] }
 0x215   :  { %v306_v63 = vadd.f32 %v300_v51, %v249_v62  ;;  %v416_v44 = vld [vmem:[#allocation2 + $0x4] sm:$0x3]  ;;  %v493_v3 = vld [vmem:[#allocation2 + $0x6] sm:$0x3] }
 0x217   :  { %1609 = vtanh.f32 %v306_v63  ;;  %v307_v5 = vmul.f32 0.5, %v306_v63 }
 0x219   :  { %1611 = vtanh.f32 %v307_v5 }
 0x224   :  { %v1610_v2 = vpop.eup %1609 }
 0x225   :  { %318 = vrot.lane.b32.xlu1 %v1610_v2, %s1708_s24 }
 0x226   :  { %v1612_v6 = vpop.eup %1611 }
 0x227   :  { %v309_v7 = vmul.f32 0.5, %v1612_v6 }
 0x229   :  { %313 = vrot.lane.b32.xlu1 %v248_v4, %s1709_s25  ;;  %v310_v8 = vadd.f32 0.5, %v309_v7 }
 0x297   :  { %v319_v9 = vpop.permute.xlu1 %318 }
 0x298   :  { %v321_v10 = vmul.f32 %v319_v9, %v310_v8 }
 0x29a   :  { %323 = vrot.lane.b32.xlu1 %v321_v10, %s1709_s25 }
 0x29b   :  { %v314_v11 = vpop.permute.xlu1 %313 }
 0x29c   :  { %v316_v12 = vmul.f32 %v314_v11, %v310_v8 }
 0x30c   :  { %v324_v13 = vpop.permute.xlu1 %323 }
 0x30d   :  { %v326_v14 = vadd.f32 %v324_v13, %v316_v12 }
 0x30f   :  { %1613 = vtanh.f32 %v326_v14 }
 0x31c   :  { %v1614_v15 = vpop.eup %1613 }
 0x31d   :  { %329 = vrot.lane.b32.xlu1 %v1614_v15, %s1708_s24 }
 0x38f   :  { %v330_v16 = vpop.permute.xlu1 %329 }
 0x390   :  { %v1881_v17 = vmul.f32 %v330_v16, %v310_v8 }
 0x392   :  { %v340_v19 = vpack.c.bf16 %v1881_v17, %v1881_v17 }
 0x394   :  { %342 = vrot.lane.b32.xlu1 %v340_v19, %s1709_s25 }
 0x406   :  { %v343_v22 = vpop.permute.xlu1 %342 }
 0x407   :  { %1502 = vmatmul.mubr.msk.bf16.vlgmr.msra.gmra.mxu1 %vm89_vm0, %v343_v22 }
 0x408   :  { %1506 = vmatpush3.bf16.msra.mxu1 %v1837_v20  ;;  %1509 = vmatprep.mubr.msk.bf16.mxu1 %vm1707_vm1, %v1706_v18 }
 0x409   :  { %1507 = vmatprep.subr.bf16.mxu1 %v1706_v18 }
 0x40c   :  { %1508 = vmatpush3.bf16.msra.mxu1 %v1844_v21 }
 0x40d   :  { %1521 = vmatprep.subr.bf16.mxu1 %v1706_v18 }
 0x4c7   :  { %v381_v24 = vpop.f32.mrf.mxu1 }
 0x4c8   :  { %v387_v25 = vadd.f32 %v381_v24, %v339_v23 }
 0x4c9   :  { %v1503_v26 = vpop.f32.mrf.mxu1 }
 0x4ca   :  { %1615 = vtanh.f32 %v387_v25  ;;  %v388_v30 = vmul.f32 0.5, %v387_v25 }
 0x4cb   :  { %v384_v27 = vpop.f32.mrf.mxu1 }
 0x4cc   :  { %1617 = vtanh.f32 %v388_v30 }
 0x4cd   :  { %v1504_v28 = vpop.f32.mrf.mxu1 }
 0x4ce   :  { %v570_v28 = vld [vmem:[#allocation2 + $0x8] sm:$0x3] }
 0x4d7   :  { %v1616_v29 = vpop.eup %1615 }
 0x4d8   :  { %395 = vrot.lane.b32.xlu1 %v1616_v29, %s1708_s24 }
 0x4d9   :  { %v1618_v31 = vpop.eup %1617 }
 0x4da   :  { %v390_v32 = vmul.f32 0.5, %v1618_v31 }
 0x4dc   :  { %v391_v33 = vadd.f32 0.5, %v390_v32 }
 0x4de   :  { %v393_v36 = vmul.f32 %v391_v33, %v326_v14 }
 0x54a   :  { %v396_v34 = vpop.permute.xlu1 %395 }
 0x54b   :  { %v398_v35 = vmul.f32 %v396_v34, %v391_v33 }
 0x54d   :  { %400 = vrot.lane.b32.xlu1 %v398_v35, %s1709_s25 }
 0x5bf   :  { %v401_v37 = vpop.permute.xlu1 %400 }
 0x5c0   :  { %v403_v38 = vadd.f32 %v401_v37, %v393_v36 }
 0x5c2   :  { %1619 = vtanh.f32 %v403_v38 }
 0x5cf   :  { %v1620_v39 = vpop.eup %1619 }
 0x5d0   :  { %406 = vrot.lane.b32.xlu1 %v1620_v39, %s1708_s24 }
 0x642   :  { %v407_v40 = vpop.permute.xlu1 %406 }
 0x643   :  { %v1896_v41 = vmul.f32 %v407_v40, %v391_v33 }
 0x645   :  { %v417_v42 = vpack.c.bf16 %v1896_v41, %v1896_v41 }
 0x647   :  { %419 = vrot.lane.b32.xlu0 %v417_v42, %s1709_s25 }
 0x6b9   :  { %v420_v43 = vpop.permute.xlu0 %419 }
 0x6ba   :  { %1510 = vmatmul.mubr.msk.bf16.vlgmr.msra.gmra.mxu1 %vm89_vm0, %v420_v43 }
 0x6bb   :  { %1522 = vmatpush3.bf16.msra.mxu1 %v1837_v20  ;;  %1525 = vmatprep.mubr.msk.bf16.mxu1 %vm1707_vm1, %v1706_v18 }
 0x6bc   :  { %1523 = vmatprep.subr.bf16.mxu1 %v1706_v18 }
 0x6bf   :  { %1524 = vmatpush3.bf16.msra.mxu1 %v1844_v21 }
 0x6c0   :  { %1537 = vmatprep.subr.bf16.mxu1 %v1706_v18 }
 0x77a   :  { %v458_v45 = vpop.f32.mrf.mxu1 }
 0x77b   :  { %v464_v46 = vadd.f32 %v458_v45, %v416_v44 }
 0x77c   :  { %v1511_v47 = vpop.f32.mrf.mxu1 }
 0x77d   :  { %1621 = vtanh.f32 %v464_v46  ;;  %v465_v51 = vmul.f32 0.5, %v464_v46 }
 0x77e   :  { %v461_v48 = vpop.f32.mrf.mxu1 }
 0x77f   :  { %1623 = vtanh.f32 %v465_v51 }
 0x780   :  { %v1512_v49 = vpop.f32.mrf.mxu1 }
 0x78a   :  { %v1622_v50 = vpop.eup %1621 }
 0x78b   :  { %472 = vrot.lane.b32.xlu1 %v1622_v50, %s1708_s24  ;;  %v647_v50 = vld [vmem:[#allocation2 + $0xa] sm:$0x3] }
 0x78c   :  { %v1624_v52 = vpop.eup %1623 }
 0x78d   :  { %v467_v53 = vmul.f32 0.5, %v1624_v52 }
 0x78f   :  { %v468_v54 = vadd.f32 0.5, %v467_v53 }
 0x791   :  { %v470_v57 = vmul.f32 %v468_v54, %v403_v38 }
 0x7fd   :  { %v473_v55 = vpop.permute.xlu1 %472 }
 0x7fe   :  { %v475_v56 = vmul.f32 %v473_v55, %v468_v54 }
 0x800   :  { %477 = vrot.lane.b32.xlu0 %v475_v56, %s1709_s25 }
 0x872   :  { %v478_v58 = vpop.permute.xlu0 %477 }
 0x873   :  { %v480_v59 = vadd.f32 %v478_v58, %v470_v57 }
 0x875   :  { %1625 = vtanh.f32 %v480_v59 }
 0x882   :  { %v1626_v60 = vpop.eup %1625 }
 0x883   :  { %483 = vrot.lane.b32.xlu1 %v1626_v60, %s1708_s24 }
 0x8f5   :  { %v484_v61 = vpop.permute.xlu1 %483 }
 0x8f6   :  { %v1911_v62 = vmul.f32 %v484_v61, %v468_v54 }
 0x8f8   :  { %v494_v63 = vpack.c.bf16 %v1911_v62, %v1911_v62 }
 0x8fa   :  { %496 = vrot.lane.b32.xlu0 %v494_v63, %s1709_s25 }
 0x96c   :  { %v497_v2 = vpop.permute.xlu0 %496 }
 0x96d   :  { %1518 = vmatmul.mubr.msk.bf16.vlgmr.msra.gmra.mxu0 %vm89_vm0, %v497_v2 }
 0x96e   :  { %1530 = vmatpush3.bf16.msra.mxu0 %v1837_v20  ;;  %1533 = vmatprep.mubr.msk.bf16.mxu0 %vm1707_vm1, %v1706_v18 }
 0x96f   :  { %1531 = vmatprep.subr.bf16.mxu0 %v1706_v18 }
 0x972   :  { %1532 = vmatpush3.bf16.msra.mxu0 %v1844_v21 }
 0x973   :  { %1545 = vmatprep.subr.bf16.mxu0 %v1706_v18 }
 0xa2d   :  { %v535_v4 = vpop.f32.mrf.mxu0 }
 0xa2e   :  { %v541_v5 = vadd.f32 %v535_v4, %v493_v3 }
 0xa2f   :  { %v1519_v6 = vpop.f32.mrf.mxu0 }
 0xa30   :  { %1627 = vtanh.f32 %v541_v5  ;;  %v542_v10 = vmul.f32 0.5, %v541_v5 }
 0xa31   :  { %v538_v7 = vpop.f32.mrf.mxu0 }
 0xa32   :  { %1629 = vtanh.f32 %v542_v10 }
 0xa33   :  { %v1520_v8 = vpop.f32.mrf.mxu0 }
 0xa34   :  { %v724_v8 = vld [vmem:[#allocation2 + $0xc] sm:$0x3] }
 0xa3d   :  { %v1628_v9 = vpop.eup %1627 }
 0xa3e   :  { %549 = vrot.lane.b32.xlu1 %v1628_v9, %s1708_s24 }
 0xa3f   :  { %v1630_v11 = vpop.eup %1629 }
 0xa40   :  { %v544_v12 = vmul.f32 0.5, %v1630_v11 }
 0xa42   :  { %v545_v13 = vadd.f32 0.5, %v544_v12 }
 0xa44   :  { %v547_v16 = vmul.f32 %v545_v13, %v480_v59 }
 0xab0   :  { %v550_v14 = vpop.permute.xlu1 %549 }
 0xab1   :  { %v552_v15 = vmul.f32 %v550_v14, %v545_v13 }
 0xab3   :  { %554 = vrot.lane.b32.xlu0 %v552_v15, %s1709_s25 }
 0xb25   :  { %v555_v19 = vpop.permute.xlu0 %554 }
 0xb26   :  { %v557_v22 = vadd.f32 %v555_v19, %v547_v16 }
 0xb28   :  { %1631 = vtanh.f32 %v557_v22 }
 0xb35   :  { %v1632_v23 = vpop.eup %1631 }
 0xb36   :  { %560 = vrot.lane.b32.xlu1 %v1632_v23, %s1708_s24 }
 0xba8   :  { %v561_v24 = vpop.permute.xlu1 %560 }
 0xba9   :  { %v1926_v25 = vmul.f32 %v561_v24, %v545_v13 }
 0xbab   :  { %v571_v26 = vpack.c.bf16 %v1926_v25, %v1926_v25 }
 0xbad   :  { %573 = vrot.lane.b32.xlu0 %v571_v26, %s1709_s25 }
 0xc1f   :  { %v574_v27 = vpop.permute.xlu0 %573 }
 0xc20   :  { %1526 = vmatmul.mubr.msk.bf16.vlgmr.msra.gmra.mxu1 %vm89_vm0, %v574_v27 }
 0xc21   :  { %1538 = vmatpush3.bf16.msra.mxu1 %v1837_v20  ;;  %1541 = vmatprep.mubr.msk.bf16.mxu1 %vm1707_vm1, %v1706_v18 }
 0xc22   :  { %1539 = vmatprep.subr.bf16.mxu1 %v1706_v18 }
 0xc25   :  { %1540 = vmatpush3.bf16.msra.mxu1 %v1844_v21 }
 0xc26   :  { %1553 = vmatprep.subr.bf16.mxu1 %v1706_v18 }
 0xce0   :  { %v612_v29 = vpop.f32.mrf.mxu1 }
 0xce1   :  { %v618_v30 = vadd.f32 %v612_v29, %v570_v28 }
 0xce2   :  { %v1527_v31 = vpop.f32.mrf.mxu1 }
 0xce3   :  { %1633 = vtanh.f32 %v618_v30  ;;  %v619_v35 = vmul.f32 0.5, %v618_v30 }
 0xce4   :  { %v615_v32 = vpop.f32.mrf.mxu1 }
 0xce5   :  { %1635 = vtanh.f32 %v619_v35 }
 0xce6   :  { %v1528_v33 = vpop.f32.mrf.mxu1 }
 0xcf0   :  { %v1634_v34 = vpop.eup %1633 }
 0xcf1   :  { %626 = vrot.lane.b32.xlu1 %v1634_v34, %s1708_s24  ;;  %v801_v34 = vld [vmem:[#allocation2 + $0xe] sm:$0x3] }
 0xcf2   :  { %v1636_v36 = vpop.eup %1635 }
 0xcf3   :  { %v621_v37 = vmul.f32 0.5, %v1636_v36 }
 0xcf5   :  { %v622_v38 = vadd.f32 0.5, %v621_v37 }
 0xcf7   :  { %v624_v42 = vmul.f32 %v622_v38, %v557_v22 }
 0xd63   :  { %v627_v39 = vpop.permute.xlu1 %626 }
 0xd64   :  { %v629_v40 = vmul.f32 %v627_v39, %v622_v38 }
 0xd66   :  { %631 = vrot.lane.b32.xlu0 %v629_v40, %s1709_s25 }
 0xdd8   :  { %v632_v43 = vpop.permute.xlu0 %631 }
 0xdd9   :  { %v634_v44 = vadd.f32 %v632_v43, %v624_v42 }
 0xddb   :  { %1637 = vtanh.f32 %v634_v44 }
 0xde8   :  { %v1638_v45 = vpop.eup %1637 }
 0xde9   :  { %637 = vrot.lane.b32.xlu1 %v1638_v45, %s1708_s24 }
 0xe5b   :  { %v638_v46 = vpop.permute.xlu1 %637 }
 0xe5c   :  { %v1941_v47 = vmul.f32 %v638_v46, %v622_v38 }
 0xe5e   :  { %v648_v48 = vpack.c.bf16 %v1941_v47, %v1941_v47 }
 0xe60   :  { %650 = vrot.lane.b32.xlu0 %v648_v48, %s1709_s25 }
 0xed2   :  { %v651_v49 = vpop.permute.xlu0 %650 }
 0xed3   :  { %1534 = vmatmul.mubr.msk.bf16.vlgmr.msra.gmra.mxu0 %vm89_vm0, %v651_v49 }
 0xed4   :  { %1546 = vmatpush3.bf16.msra.mxu0 %v1837_v20  ;;  %1549 = vmatprep.mubr.msk.bf16.mxu0 %vm1707_vm1, %v1706_v18 }
 0xed5   :  { %1547 = vmatprep.subr.bf16.mxu0 %v1706_v18 }
 0xed8   :  { %1548 = vmatpush3.bf16.msra.mxu0 %v1844_v21 }
 0xed9   :  { %1561 = vmatprep.subr.bf16.mxu0 %v1706_v18 }
 0xf93   :  { %v689_v51 = vpop.f32.mrf.mxu0 }
 0xf94   :  { %v695_v52 = vadd.f32 %v689_v51, %v647_v50 }
 0xf95   :  { %v1535_v53 = vpop.f32.mrf.mxu0 }
 0xf96   :  { %1639 = vtanh.f32 %v695_v52  ;;  %v696_v20 = vmul.f32 0.5, %v695_v52 }
 0xf97   :  { %v692_v54 = vpop.f32.mrf.mxu0 }
 0xf98   :  { %1641 = vtanh.f32 %v696_v20 }
 0xf99   :  { %v1536_v55 = vpop.f32.mrf.mxu0 }
 0xfa3   :  { %v1640_v56 = vpop.eup %1639 }
 0xfa4   :  { %703 = vrot.lane.b32.xlu1 %v1640_v56, %s1708_s24 }
 0xfa5   :  { %v1642_v57 = vpop.eup %1641 }
 0xfa6   :  { %v698_v58 = vmul.f32 0.5, %v1642_v57 }
 0xfa8   :  { %v699_v59 = vadd.f32 0.5, %v698_v58 }
 0xfaa   :  { %v701_v21 = vmul.f32 %v699_v59, %v634_v44 }
0x1016   :  { %v704_v60 = vpop.permute.xlu1 %703 }
0x1017   :  { %v706_v61 = vmul.f32 %v704_v60, %v699_v59 }
0x1019   :  { %708 = vrot.lane.b32.xlu0 %v706_v61, %s1709_s25 }
0x108b   :  { %v709_v63 = vpop.permute.xlu0 %708 }
0x108c   :  { %v711_v2 = vadd.f32 %v709_v63, %v701_v21 }
0x108e   :  { %1643 = vtanh.f32 %v711_v2 }
0x109b   :  { %v1644_v3 = vpop.eup %1643 }
0x109c   :  { %714 = vrot.lane.b32.xlu1 %v1644_v3, %s1708_s24 }
0x110e   :  { %v715_v4 = vpop.permute.xlu1 %714 }
0x110f   :  { %v1956_v5 = vmul.f32 %v715_v4, %v699_v59  ;;  %v904_v59 = vlaneseq }
0x1111   :  { %v725_v6 = vpack.c.bf16 %v1956_v5, %v1956_v5  ;;  %v905_v60 = vshrl.u32 %v904_v59, 7 }
0x1113   :  { %727 = vrot.lane.b32.xlu0 %v725_v6, %s1709_s25 }
0x1185   :  { %v728_v7 = vpop.permute.xlu0 %727 }
0x1186   :  { %1542 = vmatmul.mubr.msk.bf16.vlgmr.msra.gmra.mxu1 %vm89_vm0, %v728_v7 }
0x1187   :  { %1557 = vmatprep.mubr.msk.bf16.mxu1 %vm1707_vm1, %v1706_v18 }
0x1246   :  { %v766_v9 = vpop.f32.mrf.mxu1 }
0x1247   :  { %v772_v10 = vadd.f32 %v766_v9, %v724_v8 }
0x1248   :  { %v1543_v11 = vpop.f32.mrf.mxu1 }
0x1249   :  { %1645 = vtanh.f32 %v772_v10  ;;  %v773_v15 = vmul.f32 0.5, %v772_v10  ;;  %v1998_v10 = vsub.s32 0, %v905_v60 }
0x124a   :  { %v769_v12 = vpop.f32.mrf.mxu1 }
0x124b   :  { %1647 = vtanh.f32 %v773_v15 }
0x124c   :  { %v1544_v13 = vpop.f32.mrf.mxu1 }
0x1256   :  { %v1646_v14 = vpop.eup %1645 }
0x1257   :  { %780 = vrot.lane.b32.xlu1 %v1646_v14, %s1708_s24 }
0x1258   :  { %v1648_v16 = vpop.eup %1647 }
0x1259   :  { %v775_v19 = vmul.f32 0.5, %v1648_v16 }
0x125b   :  { %v776_v22 = vadd.f32 0.5, %v775_v19 }
0x125d   :  { %v778_v26 = vmul.f32 %v776_v22, %v711_v2 }
0x12c9   :  { %v781_v23 = vpop.permute.xlu1 %780 }
0x12ca   :  { %v783_v24 = vmul.f32 %v781_v23, %v776_v22 }
0x12cc   :  { %785 = vrot.lane.b32.xlu0 %v783_v24, %s1709_s25 }
0x133e   :  { %v786_v27 = vpop.permute.xlu0 %785 }
0x133f   :  { %v788_v28 = vadd.f32 %v786_v27, %v778_v26 }
0x1341   :  { %1649 = vtanh.f32 %v788_v28 }
0x134e   :  { %v1650_v29 = vpop.eup %1649 }
0x134f   :  { %791 = vrot.lane.b32.xlu1 %v1650_v29, %s1708_s24 }
0x13c1   :  { %v792_v30 = vpop.permute.xlu1 %791 }
0x13c2   :  { %v794_v31 = vmul.f32 %v792_v30, %v776_v22 }
0x13c4   :  { %v802_v32 = vpack.c.bf16 %v794_v31, %v794_v31 }
0x13c6   :  { %804 = vrot.lane.b32.xlu0 %v802_v32, %s1709_s25 }
0x1438   :  { %v805_v33 = vpop.permute.xlu0 %804 }
0x1439   :  { %1550 = vmatmul.mubr.msk.bf16.vlgmr.msra.gmra.mxu0 %vm89_vm0, %v805_v33 }
0x143a   :  { %1577 = vmatprep.mubr.msk.bf16.mxu0 %vm1707_vm1, %v1706_v18  ;;  %vm1166_vm1 = vcmask 1046528  }
0x14f9   :  { %v843_v35 = vpop.f32.mrf.mxu0 }
0x14fa   :  { %v849_v36 = vadd.f32 %v843_v35, %v801_v34 }
0x14fb   :  { %v1551_v37 = vpop.f32.mrf.mxu0 }
0x14fc   :  { %1651 = vtanh.f32 %v849_v36  ;;  %v850_v42 = vmul.f32 0.5, %v849_v36 }
0x14fd   :  { %v846_v38 = vpop.f32.mrf.mxu0 }
0x14fe   :  { %1653 = vtanh.f32 %v850_v42 }
0x14ff   :  { %v1552_v39 = vpop.f32.mrf.mxu0 }
0x1509   :  { %v1652_v40 = vpop.eup %1651 }
0x150a   :  { %857 = vrot.lane.b32.xlu1 %v1652_v40, %s1708_s24 }
0x150b   :  { %v1654_v43 = vpop.eup %1653 }
0x150c   :  { %v852_v44 = vmul.f32 0.5, %v1654_v43 }
0x150e   :  { %v853_v45 = vadd.f32 0.5, %v852_v44 }
0x1510   :  { %v855_v49 = vmul.f32 %v853_v45, %v788_v28 }
0x157c   :  { %v858_v46 = vpop.permute.xlu1 %857 }
0x157d   :  { %v860_v48 = vmul.f32 %v858_v46, %v853_v45 }
0x157f   :  { %862 = vrot.lane.b32.xlu0 %v860_v48, %s1709_s25 }
0x1583   :  { %411 = vrot.lane.b32.xlu0 %v1896_v41, %s1709_s25 }
0x1587   :  { %334 = vrot.lane.b32.xlu0 %v1881_v17, %s1709_s25 }
0x158b   :  { %642 = vrot.lane.b32.xlu0 %v1941_v47, %s1709_s25 }
0x158f   :  { %796 = vrot.lane.b32.xlu0 %v794_v31, %s1709_s25 }
0x15f1   :  { %v863_v50 = vpop.permute.xlu0 %862 }
0x15f2   :  { %v1980_v51 = vadd.f32 %v863_v50, %v855_v49 }
0x15f4   :  { %1655 = vtanh.f32 %v1980_v51 }
0x15f5   :  { %v412_v52 = vpop.permute.xlu0 %411 }
0x15f6   :  { %415 = vst.msk [vmem:[#allocation3 + $0x2] sm:$0x3] %vm337_vm9, %v412_v52 }
0x15f9   :  { %v335_v53 = vpop.permute.xlu0 %334 }
0x15fa   :  { %338 = vst.msk [vmem:[#allocation3] sm:$0x3] %vm337_vm9, %v335_v53 }
0x15fd   :  { %v643_v41 = vpop.permute.xlu0 %642  ;;  %v1421_v61 = vld.sshfl [vmem:[#allocation3 + $0x2] sm:$0x11 pattern:$0x75316420] }
0x15fe   :  { %646 = vst.msk [vmem:[#allocation3 + $0x8] sm:$0x3] %vm337_vm9, %v643_v41 }
0x1601   :  { %v1656_v17 = vpop.eup %1655  ;;  %v797_v47 = vpop.permute.xlu0 %796  ;;  %v1420_v3 = vld.sshfl [vmem:[#allocation3] sm:$0x11 pattern:$0x75316420] }
0x1602   :  { %800 = vst.msk [vmem:[#allocation3 + $0xc] sm:$0x3] %vm337_vm9, %v797_v47  ;;  %868 = vrot.lane.b32.xlu1 %v1656_v17, %s1708_s24  ;;  %v900_v13 = vcombine.high %v1420_v3, %v1420_v3 }
0x1605   :  { %v1424_v11 = vld.sshfl [vmem:[#allocation3 + $0x8] sm:$0x11 pattern:$0x75316420] }
0x1606   :  { %488 = vrot.lane.b32.xlu1 %v1911_v62, %s1709_s25  ;;  %v1710_v62 = vmov 1966171168   ;;  %v994_v27 = vcombine.high %v1424_v11, %v1424_v11 }
0x1607   :  { %v902_v58 = vunpack.c.l.s4 %v1710_v62 }
0x1609   :  { %v1426_v28 = vld.sshfl [vmem:[#allocation3 + $0xc] sm:$0x11 pattern:$0x75316420] }
0x160a   :  { %565 = vrot.lane.b32.xlu1 %v1926_v25, %s1709_s25  ;;  %v903_v25 = vunpack.c.0.s8 %v902_v58  ;;  %v1040_v40 = vcombine.high %v1426_v28, %v1426_v28 }
0x160c   :  { %v906_v2 = vsub.s32 %v903_v25, %v905_v60 }
0x160e   :  { %719 = vrot.lane.b32.xlu1 %v1956_v5, %s1709_s25  ;;  %v925_v5 = vcombine.high %v1421_v61, %v1421_v61  ;;  %v932_v8 = vrot.slane %v1421_v61, %v906_v2  ;;  %v907_v15 = vrot.slane %v1420_v3, %v906_v2  ;;  %v914_v31 = vrot.slane %v900_v13, %v906_v2 }
0x160f   :  { %v1001_v32 = vrot.slane %v1424_v11, %v906_v2  ;;  %v1008_v39 = vrot.slane %v994_v27, %v906_v2  ;;  %v1054_v41 = vrot.slane %v1040_v40, %v906_v2 }
0x1610   :  { %v939_v16 = vrot.slane %v925_v5, %v906_v2  ;;  %v1081_v24 = vrot.slane %v932_v8, %v1998_v10 }
0x1611   :  { %v1111_v46 = vrot.slane %v1001_v32, %v1998_v10  ;;  %v1115_v17 = vrot.slane %v1008_v39, %v1998_v10  ;;  %v1135_v25 = vrot.slane %v1054_v41, %v1998_v10  ;;  %v1429_v39 = vld [vmem:[%s2116_s10] ss:$0 sm:$0xff]  ;;  %s1712_s10 = smov [#allocation4]  }
0x1612   :  { %v1149_v34 = vsel %vm1148_vm10, %v907_v15, %v1081_v24  ;;  %v1085_v36 = vrot.slane %v939_v16, %v1998_v10  ;;  %v1596_v15 = vld [vmem:[%s2117_s11] sm:$0xff]   ;;  %v1597_v16 = vld [vmem:[%s2118_s12 + $0x38] sm:$0xff]  }
0x1613   :  { %1562 = vmatpush3.bf16.msra.mxu0 %v1597_v16  ;;  %v1601_v24 = vld [vmem:[%s2118_s12 + $0x18] sm:$0xff]  }
0x1614   :  { %v1150_v44 = vsel %vm1148_vm10, %v914_v31, %v1085_v36  ;;  %1563 = vmatprep.subr.bf16.mxu0 %v1706_v18 }
0x1674   :  { %v869_v54 = vpop.permute.xlu1 %868 }
0x1675   :  { %v871_v55 = vmul.f32 %v869_v54, %v853_v45  ;;  %v1047_v45 = vrot.slane %v1426_v28, %v906_v2 }
0x1677   :  { %873 = vrot.lane.b32.xlu1 %v871_v55, %s1709_s25 }
0x1678   :  { %v489_v56 = vpop.permute.xlu1 %488 }
0x1679   :  { %492 = vst.msk [vmem:[#allocation3 + $0x4] sm:$0x3] %vm337_vm9, %v489_v56  ;;  %v1131_v56 = vrot.slane %v1047_v45, %v1998_v10  ;;  %v1603_v45 = vld [vmem:[%s2118_s12 + $0x8] sm:$0xff]  }
0x167c   :  { %v566_v20 = vpop.permute.xlu1 %565 }
0x167d   :  { %569 = vst.msk [vmem:[#allocation3 + $0x6] sm:$0x3] %vm337_vm9, %v566_v20 }
0x1680   :  { %v720_v57 = vpop.permute.xlu1 %719  ;;  %v1422_v21 = vld.sshfl [vmem:[#allocation3 + $0x4] sm:$0x11 pattern:$0x75316420] }
0x1681   :  { %723 = vst.msk [vmem:[#allocation3 + $0xa] sm:$0x3] %vm337_vm9, %v720_v57  ;;  %v948_v4 = vcombine.high %v1422_v21, %v1422_v21  ;;  %v955_v9 = vrot.slane %v1422_v21, %v906_v2 }
0x1683   :  { %v962_v14 = vrot.slane %v948_v4, %v906_v2  ;;  %v1091_v26 = vrot.slane %v955_v9, %v1998_v10 }
0x1684   :  { %v1423_v63 = vld.sshfl [vmem:[#allocation3 + $0x6] sm:$0x11 pattern:$0x75316420] }
0x1685   :  { %v971_v6 = vcombine.high %v1423_v63, %v1423_v63  ;;  %v978_v12 = vrot.slane %v1423_v63, %v906_v2  ;;  %v1095_v33 = vrot.slane %v962_v14, %v1998_v10  ;;  %v1152_v38 = vsel %vm1151_vm11, %v1149_v34, %v1091_v26  ;;  %v1602_v26 = vld [vmem:[%s2118_s12 + $0x10] sm:$0xff]  }
0x1687   :  { %v985_v19 = vrot.slane %v971_v6, %v906_v2  ;;  %v1101_v30 = vrot.slane %v978_v12, %v1998_v10  ;;  %v1153_v48 = vsel %vm1151_vm11, %v1150_v44, %v1095_v33 }
0x1688   :  { %v1425_v7 = vld.sshfl [vmem:[#allocation3 + $0xa] sm:$0x11 pattern:$0x75316420] }
0x1689   :  { %v1017_v22 = vcombine.high %v1425_v7, %v1425_v7  ;;  %v1024_v29 = vrot.slane %v1425_v7, %v906_v2  ;;  %v1105_v37 = vrot.slane %v985_v19, %v1998_v10  ;;  %v1155_v43 = vsel %vm1154_vm12, %v1152_v38, %v1101_v30  ;;  %v1598_v19 = vld [vmem:[%s2118_s12 + $0x30] sm:$0xff]  }
0x168a   :  { %v1158_v53 = vsel %vm1157_vm13, %v1155_v43, %v1111_v46  ;;  %1564 = vmatpush3.bf16.msra.mxu0 %v1598_v19  ;;  %v1604_v46 = vld [vmem:[%s2118_s12] sm:$0xff]  }
0x168b   :  { %v1031_v35 = vrot.slane %v1017_v22, %v906_v2  ;;  %v1121_v42 = vrot.slane %v1024_v29, %v1998_v10  ;;  %v1156_v50 = vsel %vm1154_vm12, %v1153_v48, %v1105_v37  ;;  %v1599_v22 = vld [vmem:[%s2118_s12 + $0x28] sm:$0xff]   ;;  %1565 = vmatprep.subr.bf16.mxu0 %v1706_v18 }
0x168c   :  { %v1159_v20 = vsel %vm1157_vm13, %v1156_v50, %v1115_v17 }
0x168d   :  { %v1125_v49 = vrot.slane %v1031_v35, %v1998_v10  ;;  %v1161_v54 = vsel %vm1160_vm14, %v1158_v53, %v1121_v42  ;;  %v1428_v35 = vld [vmem:[%s2115_s9] ss:$0 sm:$0xff] }
0x168e   :  { %v1164_v59 = vsel %vm1163_vm15, %v1161_v54, %v1131_v56  ;;  %1566 = vmatpush3.bf16.msra.mxu0 %v1599_v22 }
0x168f   :  { %v1162_v58 = vsel %vm1160_vm14, %v1159_v20, %v1125_v49  ;;  %1567 = vmatprep.subr.bf16.mxu0 %v1706_v18 }
0x1690   :  { %v1165_v63 = vsel %vm1163_vm15, %v1162_v58, %v1135_v25 }
0x16e9   :  { %v874_v23 = vpop.permute.xlu1 %873 }
0x16ea   :  { %877 = vst.msk [vmem:[#allocation3 + $0xe] sm:$0x3] %vm337_vm9, %v874_v23  ;;  %878 = vst.msk [vmem:[#allocation4] sm:$0x3] %vm337_vm9, %v874_v23  ;;  %v1600_v23 = vld [vmem:[%s2118_s12 + $0x20] sm:$0xff]  }
0x16eb   :  { %1568 = vmatpush3.bf16.msra.mxu0 %v1600_v23 }
0x16ec   :  { %1569 = vmatprep.subr.bf16.mxu0 %v1706_v18 }
0x16ef   :  { %1570 = vmatpush3.bf16.msra.mxu0 %v1601_v24 }
0x16f0   :  { %1571 = vmatprep.subr.bf16.mxu0 %v1706_v18 }
0x16f1   :  { %v1427_v52 = vld.sshfl [vmem:[#allocation3 + $0xe] sm:$0x11 pattern:$0x75316420] }
0x16f2   :  { %v1070_v47 = vrot.slane %v1427_v52, %v906_v2  ;;  %v1063_v55 = vcombine.high %v1427_v52, %v1427_v52 }
0x16f3   :  { %1572 = vmatpush3.bf16.msra.mxu0 %v1602_v26 }
0x16f4   :  { %v1141_v57 = vrot.slane %v1070_v47, %v1998_v10  ;;  %v1077_v62 = vrot.slane %v1063_v55, %v906_v2  ;;  %1573 = vmatprep.subr.bf16.mxu0 %v1706_v18 }
0x16f6   :  { %v1167_v60 = vsel %vm1166_vm1, %v1164_v59, %v1141_v57  ;;  %v1145_v61 = vrot.slane %v1077_v62, %v1998_v10 }
0x16f7   :  { %v2027_v21 = vadd.f32 %v1167_v60, %v1802_v0  ;;  %1574 = vmatpush3.bf16.msra.mxu0 %v1603_v45 }
0x16f8   :  { %v1168_v3 = vsel %vm1166_vm1, %v1165_v63, %v1145_v61  ;;  %1575 = vmatprep.subr.bf16.mxu0 %v1706_v18 }
0x16f9   :  { %v1171_v4 = vsel %vm89_vm0, %v2027_v21, 0.0  ;;  %v2032_v5 = vadd.f32 %v1168_v3, %v1807_v1 }
0x16fa   :  { %1172 = vadd.xlane.f32.xlu0 %v1171_v4 }
0x16fb   :  { %v1174_v2 = vsel %vm89_vm0, %v2032_v5, 0.0  ;;  %1576 = vmatpush3.bf16.msra.mxu0 %v1604_v46 }
0x16fc   :  { %1175 = vadd.xlane.f32.xlu1 %v1174_v2 }
0x170d   :  { %880 = vrot.lane.b32.xlu1 %v1980_v51, %s1711_s3  ;;  %v1595_v51 = vld [vmem:[%s2117_s11 + $0x8] sm:$0xff]   ;;  %s1380_s3 = sshll.u32 %s1712_s10, 4  ;;  %s1381_s3 = int_to_ptr.vmem [resolvable:$true] %s1380_s3 }
0x170e   :  { %1554 = vmatpush3.bf16.msra.mxu1 %v1595_v51  ;;  %s1661_s1 = scalar_lea.vmem %s1381_s3, 32  ;;  %p1666_p1 = scmp.lt.s32.totalorder %s1381_s3, %s1381_s3 }
0x170f   :  { %1555 = vmatprep.subr.bf16.mxu1 %v1706_v18  ;;  %p1662_p0 = scmp.ne.s32.totalorder %s1381_s3, %s1661_s1  ;;  %p1667_p2 = scmp.lt.s32.totalorder %s1661_s1, %s1661_s1 }
0x1711   :  { %p1668_p3 = por %p1667_p2, %p1666_p1 }
0x1712   :  { %1556 = vmatpush3.bf16.msra.mxu1 %v1596_v15 }
0x1713   :  { %p1669_p4 = pnand %p1668_p3, %p1662_p0 }
0x1783   :  { %v1173_v6 = vpop.xlane.xlu0 %1172 }
0x1784   :  { %v1177_v7 = vmul.f32 0.03125, %v1173_v6 }
0x1785   :  { %v1176_v0 = vpop.xlane.xlu1 %1175 }
0x1786   :  { %v1179_v8 = vsub.f32 %v2027_v21, %v1177_v7  ;;  %v1178_v9 = vmul.f32 0.03125, %v1176_v0 }
0x1788   :  { %v1180_v10 = vsub.f32 %v2032_v5, %v1178_v9  ;;  %v1181_v11 = vmul.f32 %v1179_v8, %v1179_v8 }
0x1789   :  { %v881_v12 = vpop.permute.xlu1 %880 }
0x178a   :  { %883 = vst.msk [vmem:[#allocation6] sm:$0x3] %vm337_vm9, %v881_v12  ;;  %v1183_v1 = vsel %vm89_vm0, %v1181_v11, 0.0  ;;  %v1182_v13 = vmul.f32 %v1180_v10, %v1180_v10 }
0x178b   :  { %1184 = vadd.xlane.f32.xlu0 %v1183_v1 }
0x178c   :  { %v1186_v14 = vsel %vm89_vm0, %v1182_v13, 0.0 }
0x178f   :  { %1187 = vadd.xlane.f32.xlu0 %v1186_v14 }
0x1814   :  { %v1185_v27 = vpop.xlane.xlu0 %1184 }
0x1815   :  { %v1189_v28 = vmul.f32 0.03125, %v1185_v27 }
0x1817   :  { %v1191_v29 = vadd.f32 1e-05, %v1189_v28 }
0x1818   :  { %v1188_v30 = vpop.xlane.xlu0 %1187 }
0x1819   :  { %1657 = vrsqrt.f32 %v1191_v29  ;;  %v1190_v31 = vmul.f32 0.03125, %v1188_v30 }
0x181b   :  { %v1192_v32 = vadd.f32 1e-05, %v1190_v31 }
0x181d   :  { %1659 = vrsqrt.f32 %v1192_v32 }
0x1826   :  { %v1658_v33 = vpop.eup %1657 }
0x1827   :  { %v1195_v34 = vmul.f32 %v1658_v33, %v1179_v8 }
0x1829   :  { %v1203_v38 = vmul.f32 %v1428_v35, %v1195_v34 }
0x182a   :  { %v1660_v36 = vpop.eup %1659 }
0x182b   :  { %v1196_v37 = vmul.f32 %v1660_v36, %v1180_v10  ;;  %v1211_v42 = vadd.f32 %v1429_v39, %v1203_v38 }
0x182d   :  { %v1204_v40 = vmul.f32 %v1428_v35, %v1196_v37 }
0x182f   :  { %v1212_v43 = vadd.f32 %v1429_v39, %v1204_v40 }
0x1831   :  { %v1213_v44 = vpack.c.bf16 %v1212_v43, %v1211_v42 }
0x1833   :  { %1558 = vmatmul.mubr.msk.bf16.vlgmr.msra.gmra.mxu1 %vm89_vm0, %v1213_v44 }
0x18f3   :  { %v1263_v48 = vpop.f32.mrf.mxu1 }
0x18f4   :  { %v1270_v52 = vmax.f32 %v1263_v48, 0.0 }
0x18f5   :  { %v1559_v49 = vpop.f32.mrf.mxu1 }
0x18f7   :  { %v1266_v50 = vpop.f32.mrf.mxu1 }
0x18f8   :  { %v1271_v53 = vmax.f32 %v1266_v50, 0.0 }
0x18f9   :  { %v1560_v41 = vpop.f32.mrf.mxu1 }
0x18fa   :  { %v1272_v17 = vpack.c.bf16 %v1271_v53, %v1270_v52 }
0x18fc   :  { %1578 = vmatmul.mubr.bf16.vlgmr.msra.gmra.mxu0 %v1272_v17 }
0x18fd   :  { %1672 = shalt.err (!%p1669_p4)
}
0x18fe   :  { %1383 = dma.vmem_to_hbm [thread:$0]  %s1381_s3, 32, %s2121_s15, [#allocation5]  }
0x18ff   :  { %s1681_s29 = scalar_lea.vmem %s1391_s27, 32  ;;  %p1686_p6 = scmp.lt.s32.totalorder %s1391_s27, %s1391_s27 }
0x1900   :  { %p1682_p5 = scmp.ne.s32.totalorder %s1391_s27, %s1681_s29  ;;  %p1687_p7 = scmp.lt.s32.totalorder %s1681_s29, %s1681_s29 }
0x1902   :  { %p1688_p8 = por %p1687_p7, %p1686_p6 }
0x1904   :  { %p1689_p9 = pnand %p1688_p8, %p1682_p5 }
0x1906   :  { %1692 = shalt.err (!%p1689_p9)
}
0x1907   :  { %1393 = dma.vmem_to_hbm [thread:$0]  %s1391_s27, 32, %s2122_s16, [#allocation7]   ;;  %v1433_v18 = vld [vmem:[%s2119_s13] ss:$0 sm:$0xff] }
0x19bc   :  { %v1361_v47 = vpop.f32.mrf.mxu0 }
0x19bd   :  { %v1362_v54 = vadd.f32 %v1433_v18, %v1361_v47 }
0x19be   :  { %v1579_v55 = vpop.f32.mrf.mxu0 }
0x19bf   :  { %v1368_v56 = vadd.f32 %v1362_v54, %v2027_v21 }
0x19c0   :  { %v1364_v20 = vpop.f32.mrf.mxu0 }
0x19c1   :  { %1370 = vst.msk [vmem:[%s2120_s14] sm:$0xff] %vm89_vm0, %v1368_v56  ;;  %v1365_v57 = vadd.f32 %v1433_v18, %v1364_v20 }
0x19c2   :  { %v1580_v62 = vpop.f32.mrf.mxu0 }
0x19c3   :  { %v1369_v58 = vadd.f32 %v1365_v57, %v2032_v5 }
0x19c5   :  { %1371 = vst.msk [vmem:[%s2120_s14 + $0x8] sm:$0xff] %vm89_vm0, %v1369_v58 }
0x19c6   :  { %1701 = dma.done.wait [#allocation5], 32  }
0x19c7   :  { %1702 = vsyncadd [#allocation5], 4294967264 }
0x19c8   :  { %1703 = dma.done.wait [#allocation7], 32  }
0x19c9   :  { %1704 = vsyncadd [#allocation7], 4294967264 }
0x19ca   :  { %1402 = vsyncpa [#allocation5], 1 }
0x19cb   :  { %1403 = vsyncpa [#allocation7], 1 }

</bundles_post_ra>
